<compile_context>
chip_gen: v5e
topology: v5e:2x2
jax: 0.10.0
libtpu: 0.0.40
codegen_flags: <defaults>
</compile_context>

<pallas_src>
import functools
import math

import numpy as np
import jax
import jax.numpy as jnp
from jax.experimental import pallas as pl
from jax.experimental.pallas import tpu as pltpu


def _bottleneck_kernel(x_ref, w1_ref, b1_ref, w2_ref, b2_ref, w3_ref, b3_ref,
                       mask_l_ref, mask_r_ref, o_ref, pf_ref, *, H, W, pad):
    """One batch image per grid step. All convs run as MXU matmuls over [H*W, C]."""
    HW = H * W
    P = w1_ref.shape[1]

    x2d = x_ref[0].astype(jnp.float32)                       # (HW, Cin)

    # ---- conv1 (1x1) + folded BN1 + ReLU ----
    t1 = jnp.dot(x2d, w1_ref[...], preferred_element_type=jnp.float32)
    t1 = jnp.maximum(t1 + b1_ref[...], 0.0)                  # (HW, P)

    # ---- conv2 (3x3, pad=1, stride=1): padded flat buffer + 9 shifted matmuls ----
    # Only the pad bands need zeros (rows read as the h=-1 / h=H halo); the image
    # body is fully overwritten by t1, so skip re-zeroing it.
    pf_ref[0:pad, :] = jnp.zeros((pad, P), jnp.float32)
    pf_ref[pad + HW:pad + HW + pad, :] = jnp.zeros((pad, P), jnp.float32)
    pf_ref[pad:pad + HW, :] = t1

    # Per-row masks are diagonal row scalings: (diag(m) A) B == diag(m) (A B), so
    # sum the three H-taps of each W-column first and apply the mask once.
    def col(dw):
        a = jnp.zeros((HW, P), jnp.float32)
        for dh in range(3):
            if dh == 1 and dw == 1:
                win = t1                                      # center tap, no VMEM round-trip
            else:
                off = pad + (dh - 1) * W + (dw - 1)           # static offset
                win = pf_ref[off:off + HW, :]
            a = a + jnp.dot(win, w2_ref[dh, dw],
                            preferred_element_type=jnp.float32)
        return a

    acc = col(0) * mask_l_ref[...] + col(1) + col(2) * mask_r_ref[...]
    t2 = jnp.maximum(acc + b2_ref[...], 0.0)                  # (HW, P)

    # ---- conv3 (1x1) + folded BN3 + residual add + ReLU (fused epilogue) ----
    out = jnp.dot(t2, w3_ref[...], preferred_element_type=jnp.float32)
    out = jnp.maximum(out + b3_ref[...] + x2d, 0.0)
    o_ref[0] = out.astype(o_ref.dtype)


def _fold_bn(w, gamma, beta, mean, var, eps):
    """Fold inference-mode BatchNorm into the bias-free conv that feeds it.
    The conv weight's LAST axis must be the output-channel axis."""
    s = gamma * jax.lax.rsqrt(var + eps)
    return w * s, beta - mean * s


def bottleneck_forward(x_nchw, w1, bn1, w2, bn2, w3, bn3, eps=1e-5):
    """x_nchw: (N, Cin, H, W); w1: (Cin, P); w2: (3,3,P,P) HWIO; w3: (P, 4P);
    bn* = (gamma, beta, running_mean, running_var)."""
    N, Cin, H, W = x_nchw.shape
    P = w1.shape[1]
    Cout = w3.shape[1]
    assert Cout == Cin, "identity residual path requires inplanes == 4 * planes"
    HW = H * W

    # sublane-aligned zero band (>= W+1 rows) above and below the flattened image
    pad = ((W + 1 + 7) // 8) * 8

    w1e, b1e = _fold_bn(w1, *bn1, eps)
    w2e, b2e = _fold_bn(w2, *bn2, eps)
    w3e, b3e = _fold_bn(w3, *bn3, eps)

    # NCHW -> channel-last rows (single transpose; an NHWC-native caller would skip it)
    x_rows = jnp.transpose(x_nchw, (0, 2, 3, 1)).reshape(N, HW, Cin)

    # static column masks for the W-edge wrap of the 3x3 taps
    w_idx = np.arange(HW) % W
    mask_l = jnp.asarray(w_idx != 0, jnp.float32).reshape(HW, 1)
    mask_r = jnp.asarray(w_idx != W - 1, jnp.float32).reshape(HW, 1)

    kernel = functools.partial(_bottleneck_kernel, H=H, W=W, pad=pad)

    out_rows = pl.pallas_call(
        kernel,
        out_shape=jax.ShapeDtypeStruct((N, HW, Cout), x_nchw.dtype),
        grid_spec=pltpu.PrefetchScalarGridSpec(
            num_scalar_prefetch=0,
            grid=(N,),
            in_specs=[
                pl.BlockSpec((1, HW, Cin), lambda n: (n, 0, 0)),     # x rows
                pl.BlockSpec((Cin, P), lambda n: (0, 0)),            # w1 (BN1 folded)
                pl.BlockSpec((1, P), lambda n: (0, 0)),              # b1
                pl.BlockSpec((3, 3, P, P), lambda n: (0, 0, 0, 0)),  # w2 (BN2 folded)
                pl.BlockSpec((1, P), lambda n: (0, 0)),              # b2
                pl.BlockSpec((P, Cout), lambda n: (0, 0)),           # w3 (BN3 folded)
                pl.BlockSpec((1, Cout), lambda n: (0, 0)),           # b3
                pl.BlockSpec((HW, 1), lambda n: (0, 0)),             # mask_l
                pl.BlockSpec((HW, 1), lambda n: (0, 0)),             # mask_r
            ],
            out_specs=pl.BlockSpec((1, HW, Cout), lambda n: (n, 0, 0)),
            scratch_shapes=[pltpu.VMEM((HW + 2 * pad, P), jnp.float32)],
        ),
        compiler_params=pltpu.CompilerParams(
            dimension_semantics=("parallel",),   # batch axis -> shard across TCs on v7x
        ),
    )(x_rows, w1e, b1e.reshape(1, P), w2e, b2e.reshape(1, P),
      w3e, b3e.reshape(1, Cout), mask_l, mask_r)

    return jnp.transpose(out_rows.reshape(N, H, W, Cout), (0, 3, 1, 2))


# ---------------- pure-JAX reference (independent check) ----------------
def _bn_ref(y, gamma, beta, mean, var, eps=1e-5):
    return (y - mean) * (gamma * jax.lax.rsqrt(var + eps)) + beta


def bottleneck_reference(x_nchw, w1, bn1, w2, bn2, w3, bn3, eps=1e-5):
    hp = jax.lax.Precision.HIGHEST
    x = jnp.transpose(x_nchw, (0, 2, 3, 1)).astype(jnp.float32)   # NHWC
    y = jnp.einsum('nhwc,co->nhwo', x, w1, precision=hp)
    y = jax.nn.relu(_bn_ref(y, *bn1, eps))
    y = jax.lax.conv_general_dilated(
        y, w2, window_strides=(1, 1), padding='SAME',
        dimension_numbers=('NHWC', 'HWIO', 'NHWC'), precision=hp)
    y = jax.nn.relu(_bn_ref(y, *bn2, eps))
    y = jnp.einsum('nhwc,co->nhwo', y, w3, precision=hp)
    y = _bn_ref(y, *bn3, eps)
    y = jax.nn.relu(y + x)
    return jnp.transpose(y, (0, 3, 1, 2))


if __name__ == "__main__":
    N, H, W = 2, 16, 16
    planes = 16
    inplanes = planes * 4            # identity residual: stride=1, downsample=None

    key = jax.random.PRNGKey(0)
    ks = jax.random.split(key, 7)

    x = jax.random.normal(ks[0], (N, inplanes, H, W), jnp.float32)
    w1 = jax.random.normal(ks[1], (inplanes, planes), jnp.float32) / math.sqrt(inplanes)
    w2 = jax.random.normal(ks[2], (3, 3, planes, planes), jnp.float32) / math.sqrt(9 * planes)
    w3 = jax.random.normal(ks[3], (planes, 4 * planes), jnp.float32) / math.sqrt(planes)

    def bn_params(k, c):
        k1, k2, k3, k4 = jax.random.split(k, 4)
        gamma = jax.random.uniform(k1, (c,), jnp.float32, 0.5, 1.5)
        beta = 0.1 * jax.random.normal(k2, (c,), jnp.float32)
        mean = 0.1 * jax.random.normal(k3, (c,), jnp.float32)
        var = jax.random.uniform(k4, (c,), jnp.float32, 0.5, 1.5)
        return gamma, beta, mean, var

    bn1 = bn_params(ks[4], planes)
    bn2 = bn_params(ks[5], planes)
    bn3 = bn_params(ks[6], 4 * planes)

    y = bottleneck_forward(x, w1, bn1, w2, bn2, w3, bn3)
    y = jax.block_until_ready(y)

    y_ref = bottleneck_reference(x, w1, bn1, w2, bn2, w3, bn3)
    assert y.shape == x.shape and y.dtype == x.dtype
    # tolerance covers MXU bf16-pass rounding of f32 matmuls vs the HIGHEST-precision ref
    assert jnp.allclose(y, y_ref, atol=2e-2, rtol=2e-2), float(jnp.max(jnp.abs(y - y_ref)))
    print("KERNEL_OK")
</pallas_src>

<mosaic_0001>
module attributes {stable_mosaic.version = 11 : i64} {
  func.func @_bottleneck_kernel(%arg0: i32, %arg1: memref<1x256x64xf32, #tpu.memory_space<vmem>>, %arg2: memref<64x16xf32, #tpu.memory_space<vmem>>, %arg3: memref<1x16xf32, #tpu.memory_space<vmem>>, %arg4: memref<3x3x16x16xf32, #tpu.memory_space<vmem>>, %arg5: memref<1x16xf32, #tpu.memory_space<vmem>>, %arg6: memref<16x64xf32, #tpu.memory_space<vmem>>, %arg7: memref<1x64xf32, #tpu.memory_space<vmem>>, %arg8: memref<256x1xf32, #tpu.memory_space<vmem>>, %arg9: memref<256x1xf32, #tpu.memory_space<vmem>>, %arg10: memref<1x256x64xf32, #tpu.memory_space<vmem>>, %arg11: memref<304x16xf32, #tpu.memory_space<vmem>>) attributes {dimension_semantics = [#tpu.dimension_semantics<parallel>], iteration_bounds = array<i64: 2>, scalar_prefetch = 0 : i64, scratch_operands = 1 : i64, tpu.core_type = #tpu.core_type<tc>, window_params = [{transform_indices = @transform_0, window_bounds = array<i64: 1, 256, 64>}, {pipeline_mode = #tpu.pipeline_mode<synchronous>, transform_indices = @transform_1, window_bounds = array<i64: 64, 16>}, {pipeline_mode = #tpu.pipeline_mode<synchronous>, transform_indices = @transform_2, window_bounds = array<i64: 1, 16>}, {pipeline_mode = #tpu.pipeline_mode<synchronous>, transform_indices = @transform_3, window_bounds = array<i64: 3, 3, 16, 16>}, {pipeline_mode = #tpu.pipeline_mode<synchronous>, transform_indices = @transform_4, window_bounds = array<i64: 1, 16>}, {pipeline_mode = #tpu.pipeline_mode<synchronous>, transform_indices = @transform_5, window_bounds = array<i64: 16, 64>}, {pipeline_mode = #tpu.pipeline_mode<synchronous>, transform_indices = @transform_6, window_bounds = array<i64: 1, 64>}, {pipeline_mode = #tpu.pipeline_mode<synchronous>, transform_indices = @transform_7, window_bounds = array<i64: 256, 1>}, {pipeline_mode = #tpu.pipeline_mode<synchronous>, transform_indices = @transform_8, window_bounds = array<i64: 256, 1>}, {transform_indices = @transform_9, window_bounds = array<i64: 1, 256, 64>}]} {
    %c0 = arith.constant 0 : index
    %c0_0 = arith.constant 0 : index
    %c0_1 = arith.constant 0 : index
    %0 = vector.load %arg1[%c0, %c0_0, %c0_1] : memref<1x256x64xf32, #tpu.memory_space<vmem>>, vector<1x256x64xf32>
    %1 = vector.shape_cast %0 : vector<1x256x64xf32> to vector<256x64xf32>
    %c0_2 = arith.constant 0 : index
    %c0_3 = arith.constant 0 : index
    %2 = vector.load %arg2[%c0_2, %c0_3] : memref<64x16xf32, #tpu.memory_space<vmem>>, vector<64x16xf32>
    %cst = arith.constant dense<0.000000e+00> : vector<256x16xf32>
    %3 = tpu.matmul %1, %2, %cst {dimension_numbers = #tpu.dot_dimension_numbers<[1], [0], [0], [1], [0, 0, 1, 1], [], []>} : vector<256x64xf32>, vector<64x16xf32>, vector<256x16xf32> -> vector<256x16xf32>
    %c0_4 = arith.constant 0 : index
    %c0_5 = arith.constant 0 : index
    %4 = vector.load %arg3[%c0_4, %c0_5] : memref<1x16xf32, #tpu.memory_space<vmem>>, vector<1x16xf32>
    %5 = vector.broadcast %4 : vector<1x16xf32> to vector<256x16xf32>
    %6 = arith.addf %3, %5 : vector<256x16xf32>
    %cst_6 = arith.constant 0.000000e+00 : f32
    %7 = vector.broadcast %cst_6 : f32 to vector<256x16xf32>
    %8 = arith.maximumf %6, %7 : vector<256x16xf32>
    %cst_7 = arith.constant 0.000000e+00 : f32
    %9 = vector.broadcast %cst_7 : f32 to vector<24x16xf32>
    %c0_8 = arith.constant 0 : index
    %c0_9 = arith.constant 0 : index
    %10 = vector.load %arg11[%c0_8, %c0_9] : memref<304x16xf32, #tpu.memory_space<vmem>>, vector<24x16xf32>
    tpu.vector_store %arg11[%c0_8, %c0_9], %9 {strides = array<i32>} : memref<304x16xf32, #tpu.memory_space<vmem>>, vector<24x16xf32>,
    %cst_10 = arith.constant 0.000000e+00 : f32
    %11 = vector.broadcast %cst_10 : f32 to vector<24x16xf32>
    %c280 = arith.constant 280 : index
    %c0_11 = arith.constant 0 : index
    %12 = vector.load %arg11[%c280, %c0_11] : memref<304x16xf32, #tpu.memory_space<vmem>>, vector<24x16xf32>
    tpu.vector_store %arg11[%c280, %c0_11], %11 {strides = array<i32>} : memref<304x16xf32, #tpu.memory_space<vmem>>, vector<24x16xf32>,
    %c24 = arith.constant 24 : index
    %c0_12 = arith.constant 0 : index
    %13 = vector.load %arg11[%c24, %c0_12] : memref<304x16xf32, #tpu.memory_space<vmem>>, vector<256x16xf32>
    tpu.vector_store %arg11[%c24, %c0_12], %8 {strides = array<i32>} : memref<304x16xf32, #tpu.memory_space<vmem>>, vector<256x16xf32>,
    %cst_13 = arith.constant 0.000000e+00 : f32
    %14 = vector.broadcast %cst_13 : f32 to vector<256x16xf32>
    %c7 = arith.constant 7 : index
    %c0_14 = arith.constant 0 : index
    %15 = vector.load %arg11[%c7, %c0_14] : memref<304x16xf32, #tpu.memory_space<vmem>>, vector<256x16xf32>
    %c0_15 = arith.constant 0 : index
    %c0_16 = arith.constant 0 : index
    %c0_17 = arith.constant 0 : index
    %c0_18 = arith.constant 0 : index
    %16 = vector.load %arg4[%c0_15, %c0_16, %c0_17, %c0_18] : memref<3x3x16x16xf32, #tpu.memory_space<vmem>>, vector<1x1x16x16xf32>
    %17 = vector.shape_cast %16 : vector<1x1x16x16xf32> to vector<16x16xf32>
    %cst_19 = arith.constant dense<0.000000e+00> : vector<256x16xf32>
    %18 = tpu.matmul %15, %17, %cst_19 {dimension_numbers = #tpu.dot_dimension_numbers<[1], [0], [0], [1], [0, 0, 1, 1], [], []>} : vector<256x16xf32>, vector<16x16xf32>, vector<256x16xf32> -> vector<256x16xf32>
    %19 = arith.addf %14, %18 : vector<256x16xf32>
    %c23 = arith.constant 23 : index
    %c0_20 = arith.constant 0 : index
    %20 = vector.load %arg11[%c23, %c0_20] : memref<304x16xf32, #tpu.memory_space<vmem>>, vector<256x16xf32>
    %c1 = arith.constant 1 : index
    %c0_21 = arith.constant 0 : index
    %c0_22 = arith.constant 0 : index
    %c0_23 = arith.constant 0 : index
    %21 = vector.load %arg4[%c1, %c0_21, %c0_22, %c0_23] : memref<3x3x16x16xf32, #tpu.memory_space<vmem>>, vector<1x1x16x16xf32>
    %22 = vector.shape_cast %21 : vector<1x1x16x16xf32> to vector<16x16xf32>
    %cst_24 = arith.constant dense<0.000000e+00> : vector<256x16xf32>
    %23 = tpu.matmul %20, %22, %cst_24 {dimension_numbers = #tpu.dot_dimension_numbers<[1], [0], [0], [1], [0, 0, 1, 1], [], []>} : vector<256x16xf32>, vector<16x16xf32>, vector<256x16xf32> -> vector<256x16xf32>
    %24 = arith.addf %19, %23 : vector<256x16xf32>
    %c39 = arith.constant 39 : index
    %c0_25 = arith.constant 0 : index
    %25 = vector.load %arg11[%c39, %c0_25] : memref<304x16xf32, #tpu.memory_space<vmem>>, vector<256x16xf32>
    %c2 = arith.constant 2 : index
    %c0_26 = arith.constant 0 : index
    %c0_27 = arith.constant 0 : index
    %c0_28 = arith.constant 0 : index
    %26 = vector.load %arg4[%c2, %c0_26, %c0_27, %c0_28] : memref<3x3x16x16xf32, #tpu.memory_space<vmem>>, vector<1x1x16x16xf32>
    %27 = vector.shape_cast %26 : vector<1x1x16x16xf32> to vector<16x16xf32>
    %cst_29 = arith.constant dense<0.000000e+00> : vector<256x16xf32>
    %28 = tpu.matmul %25, %27, %cst_29 {dimension_numbers = #tpu.dot_dimension_numbers<[1], [0], [0], [1], [0, 0, 1, 1], [], []>} : vector<256x16xf32>, vector<16x16xf32>, vector<256x16xf32> -> vector<256x16xf32>
    %29 = arith.addf %24, %28 : vector<256x16xf32>
    %c0_30 = arith.constant 0 : index
    %c0_31 = arith.constant 0 : index
    %30 = vector.load %arg8[%c0_30, %c0_31] : memref<256x1xf32, #tpu.memory_space<vmem>>, vector<256x1xf32>
    %31 = vector.broadcast %30 : vector<256x1xf32> to vector<256x16xf32>
    %32 = arith.mulf %29, %31 : vector<256x16xf32>
    %cst_32 = arith.constant 0.000000e+00 : f32
    %33 = vector.broadcast %cst_32 : f32 to vector<256x16xf32>
    %c8 = arith.constant 8 : index
    %c0_33 = arith.constant 0 : index
    %34 = vector.load %arg11[%c8, %c0_33] : memref<304x16xf32, #tpu.memory_space<vmem>>, vector<256x16xf32>
    %c0_34 = arith.constant 0 : index
    %c1_35 = arith.constant 1 : index
    %c0_36 = arith.constant 0 : index
    %c0_37 = arith.constant 0 : index
    %35 = vector.load %arg4[%c0_34, %c1_35, %c0_36, %c0_37] : memref<3x3x16x16xf32, #tpu.memory_space<vmem>>, vector<1x1x16x16xf32>
    %36 = vector.shape_cast %35 : vector<1x1x16x16xf32> to vector<16x16xf32>
    %cst_38 = arith.constant dense<0.000000e+00> : vector<256x16xf32>
    %37 = tpu.matmul %34, %36, %cst_38 {dimension_numbers = #tpu.dot_dimension_numbers<[1], [0], [0], [1], [0, 0, 1, 1], [], []>} : vector<256x16xf32>, vector<16x16xf32>, vector<256x16xf32> -> vector<256x16xf32>
    %38 = arith.addf %33, %37 : vector<256x16xf32>
    %c1_39 = arith.constant 1 : index
    %c1_40 = arith.constant 1 : index
    %c0_41 = arith.constant 0 : index
    %c0_42 = arith.constant 0 : index
    %39 = vector.load %arg4[%c1_39, %c1_40, %c0_41, %c0_42] : memref<3x3x16x16xf32, #tpu.memory_space<vmem>>, vector<1x1x16x16xf32>
    %40 = vector.shape_cast %39 : vector<1x1x16x16xf32> to vector<16x16xf32>
    %cst_43 = arith.constant dense<0.000000e+00> : vector<256x16xf32>
    %41 = tpu.matmul %8, %40, %cst_43 {dimension_numbers = #tpu.dot_dimension_numbers<[1], [0], [0], [1], [0, 0, 1, 1], [], []>} : vector<256x16xf32>, vector<16x16xf32>, vector<256x16xf32> -> vector<256x16xf32>
    %42 = arith.addf %38, %41 : vector<256x16xf32>
    %c40 = arith.constant 40 : index
    %c0_44 = arith.constant 0 : index
    %43 = vector.load %arg11[%c40, %c0_44] : memref<304x16xf32, #tpu.memory_space<vmem>>, vector<256x16xf32>
    %c2_45 = arith.constant 2 : index
    %c1_46 = arith.constant 1 : index
    %c0_47 = arith.constant 0 : index
    %c0_48 = arith.constant 0 : index
    %44 = vector.load %arg4[%c2_45, %c1_46, %c0_47, %c0_48] : memref<3x3x16x16xf32, #tpu.memory_space<vmem>>, vector<1x1x16x16xf32>
    %45 = vector.shape_cast %44 : vector<1x1x16x16xf32> to vector<16x16xf32>
    %cst_49 = arith.constant dense<0.000000e+00> : vector<256x16xf32>
    %46 = tpu.matmul %43, %45, %cst_49 {dimension_numbers = #tpu.dot_dimension_numbers<[1], [0], [0], [1], [0, 0, 1, 1], [], []>} : vector<256x16xf32>, vector<16x16xf32>, vector<256x16xf32> -> vector<256x16xf32>
    %47 = arith.addf %42, %46 : vector<256x16xf32>
    %48 = arith.addf %32, %47 : vector<256x16xf32>
    %cst_50 = arith.constant 0.000000e+00 : f32
    %49 = vector.broadcast %cst_50 : f32 to vector<256x16xf32>
    %c9 = arith.constant 9 : index
    %c0_51 = arith.constant 0 : index
    %50 = vector.load %arg11[%c9, %c0_51] : memref<304x16xf32, #tpu.memory_space<vmem>>, vector<256x16xf32>
    %c0_52 = arith.constant 0 : index
    %c2_53 = arith.constant 2 : index
    %c0_54 = arith.constant 0 : index
    %c0_55 = arith.constant 0 : index
    %51 = vector.load %arg4[%c0_52, %c2_53, %c0_54, %c0_55] : memref<3x3x16x16xf32, #tpu.memory_space<vmem>>, vector<1x1x16x16xf32>
    %52 = vector.shape_cast %51 : vector<1x1x16x16xf32> to vector<16x16xf32>
    %cst_56 = arith.constant dense<0.000000e+00> : vector<256x16xf32>
    %53 = tpu.matmul %50, %52, %cst_56 {dimension_numbers = #tpu.dot_dimension_numbers<[1], [0], [0], [1], [0, 0, 1, 1], [], []>} : vector<256x16xf32>, vector<16x16xf32>, vector<256x16xf32> -> vector<256x16xf32>
    %54 = arith.addf %49, %53 : vector<256x16xf32>
    %c25 = arith.constant 25 : index
    %c0_57 = arith.constant 0 : index
    %55 = vector.load %arg11[%c25, %c0_57] : memref<304x16xf32, #tpu.memory_space<vmem>>, vector<256x16xf32>
    %c1_58 = arith.constant 1 : index
    %c2_59 = arith.constant 2 : index
    %c0_60 = arith.constant 0 : index
    %c0_61 = arith.constant 0 : index
    %56 = vector.load %arg4[%c1_58, %c2_59, %c0_60, %c0_61] : memref<3x3x16x16xf32, #tpu.memory_space<vmem>>, vector<1x1x16x16xf32>
    %57 = vector.shape_cast %56 : vector<1x1x16x16xf32> to vector<16x16xf32>
    %cst_62 = arith.constant dense<0.000000e+00> : vector<256x16xf32>
    %58 = tpu.matmul %55, %57, %cst_62 {dimension_numbers = #tpu.dot_dimension_numbers<[1], [0], [0], [1], [0, 0, 1, 1], [], []>} : vector<256x16xf32>, vector<16x16xf32>, vector<256x16xf32> -> vector<256x16xf32>
    %59 = arith.addf %54, %58 : vector<256x16xf32>
    %c41 = arith.constant 41 : index
    %c0_63 = arith.constant 0 : index
    %60 = vector.load %arg11[%c41, %c0_63] : memref<304x16xf32, #tpu.memory_space<vmem>>, vector<256x16xf32>
    %c2_64 = arith.constant 2 : index
    %c2_65 = arith.constant 2 : index
    %c0_66 = arith.constant 0 : index
    %c0_67 = arith.constant 0 : index
    %61 = vector.load %arg4[%c2_64, %c2_65, %c0_66, %c0_67] : memref<3x3x16x16xf32, #tpu.memory_space<vmem>>, vector<1x1x16x16xf32>
    %62 = vector.shape_cast %61 : vector<1x1x16x16xf32> to vector<16x16xf32>
    %cst_68 = arith.constant dense<0.000000e+00> : vector<256x16xf32>
    %63 = tpu.matmul %60, %62, %cst_68 {dimension_numbers = #tpu.dot_dimension_numbers<[1], [0], [0], [1], [0, 0, 1, 1], [], []>} : vector<256x16xf32>, vector<16x16xf32>, vector<256x16xf32> -> vector<256x16xf32>
    %64 = arith.addf %59, %63 : vector<256x16xf32>
    %c0_69 = arith.constant 0 : index
    %c0_70 = arith.constant 0 : index
    %65 = vector.load %arg9[%c0_69, %c0_70] : memref<256x1xf32, #tpu.memory_space<vmem>>, vector<256x1xf32>
    %66 = vector.broadcast %65 : vector<256x1xf32> to vector<256x16xf32>
    %67 = arith.mulf %64, %66 : vector<256x16xf32>
    %68 = arith.addf %48, %67 : vector<256x16xf32>
    %c0_71 = arith.constant 0 : index
    %c0_72 = arith.constant 0 : index
    %69 = vector.load %arg5[%c0_71, %c0_72] : memref<1x16xf32, #tpu.memory_space<vmem>>, vector<1x16xf32>
    %70 = vector.broadcast %69 : vector<1x16xf32> to vector<256x16xf32>
    %71 = arith.addf %68, %70 : vector<256x16xf32>
    %cst_73 = arith.constant 0.000000e+00 : f32
    %72 = vector.broadcast %cst_73 : f32 to vector<256x16xf32>
    %73 = arith.maximumf %71, %72 : vector<256x16xf32>
    %c0_74 = arith.constant 0 : index
    %c0_75 = arith.constant 0 : index
    %74 = vector.load %arg6[%c0_74, %c0_75] : memref<16x64xf32, #tpu.memory_space<vmem>>, vector<16x64xf32>
    %cst_76 = arith.constant dense<0.000000e+00> : vector<256x64xf32>
    %75 = tpu.matmul %73, %74, %cst_76 {dimension_numbers = #tpu.dot_dimension_numbers<[1], [0], [0], [1], [0, 0, 1, 1], [], []>} : vector<256x16xf32>, vector<16x64xf32>, vector<256x64xf32> -> vector<256x64xf32>
    %c0_77 = arith.constant 0 : index
    %c0_78 = arith.constant 0 : index
    %76 = vector.load %arg7[%c0_77, %c0_78] : memref<1x64xf32, #tpu.memory_space<vmem>>, vector<1x64xf32>
    %77 = vector.broadcast %76 : vector<1x64xf32> to vector<256x64xf32>
    %78 = arith.addf %75, %77 : vector<256x64xf32>
    %79 = arith.addf %78, %1 : vector<256x64xf32>
    %cst_79 = arith.constant 0.000000e+00 : f32
    %80 = vector.broadcast %cst_79 : f32 to vector<256x64xf32>
    %81 = arith.maximumf %79, %80 : vector<256x64xf32>
    %c0_80 = arith.constant 0 : index
    %c0_81 = arith.constant 0 : index
    %c0_82 = arith.constant 0 : index
    %82 = vector.load %arg10[%c0_80, %c0_81, %c0_82] : memref<1x256x64xf32, #tpu.memory_space<vmem>>, vector<1x256x64xf32>
    %83 = vector.shape_cast %82 : vector<1x256x64xf32> to vector<256x64xf32>
    %84 = vector.shape_cast %81 : vector<256x64xf32> to vector<1x256x64xf32>
    tpu.vector_store %arg10[%c0_80, %c0_81, %c0_82], %84 {strides = array<i32>} : memref<1x256x64xf32, #tpu.memory_space<vmem>>, vector<1x256x64xf32>,
    return
  }
  func.func @transform_0(%arg0: i32) -> (i32, i32, i32) {
    %c0_i32 = arith.constant 0 : i32
    %c0_i32_0 = arith.constant 0 : i32
    %c0_i32_1 = arith.constant 0 : i32
    return %arg0, %c0_i32, %c0_i32_0 : i32, i32, i32
  }
  func.func @transform_1(%arg0: i32) -> (i32, i32) {
    %c0_i32 = arith.constant 0 : i32
    %c0_i32_0 = arith.constant 0 : i32
    %c0_i32_1 = arith.constant 0 : i32
    return %c0_i32, %c0_i32_0 : i32, i32
  }
  func.func @transform_2(%arg0: i32) -> (i32, i32) {
    %c0_i32 = arith.constant 0 : i32
    %c0_i32_0 = arith.constant 0 : i32
    %c0_i32_1 = arith.constant 0 : i32
    return %c0_i32, %c0_i32_0 : i32, i32
  }
  func.func @transform_3(%arg0: i32) -> (i32, i32, i32, i32) {
    %c0_i32 = arith.constant 0 : i32
    %c0_i32_0 = arith.constant 0 : i32
    %c0_i32_1 = arith.constant 0 : i32
    %c0_i32_2 = arith.constant 0 : i32
    %c0_i32_3 = arith.constant 0 : i32
    return %c0_i32, %c0_i32_0, %c0_i32_1, %c0_i32_2 : i32, i32, i32, i32
  }
  func.func @transform_4(%arg0: i32) -> (i32, i32) {
    %c0_i32 = arith.constant 0 : i32
    %c0_i32_0 = arith.constant 0 : i32
    %c0_i32_1 = arith.constant 0 : i32
    return %c0_i32, %c0_i32_0 : i32, i32
  }
  func.func @transform_5(%arg0: i32) -> (i32, i32) {
    %c0_i32 = arith.constant 0 : i32
    %c0_i32_0 = arith.constant 0 : i32
    %c0_i32_1 = arith.constant 0 : i32
    return %c0_i32, %c0_i32_0 : i32, i32
  }
  func.func @transform_6(%arg0: i32) -> (i32, i32) {
    %c0_i32 = arith.constant 0 : i32
    %c0_i32_0 = arith.constant 0 : i32
    %c0_i32_1 = arith.constant 0 : i32
    return %c0_i32, %c0_i32_0 : i32, i32
  }
  func.func @transform_7(%arg0: i32) -> (i32, i32) {
    %c0_i32 = arith.constant 0 : i32
    %c0_i32_0 = arith.constant 0 : i32
    %c0_i32_1 = arith.constant 0 : i32
    return %c0_i32, %c0_i32_0 : i32, i32
  }
  func.func @transform_8(%arg0: i32) -> (i32, i32) {
    %c0_i32 = arith.constant 0 : i32
    %c0_i32_0 = arith.constant 0 : i32
    %c0_i32_1 = arith.constant 0 : i32
    return %c0_i32, %c0_i32_0 : i32, i32
  }
  func.func @transform_9(%arg0: i32) -> (i32, i32, i32) {
    %c0_i32 = arith.constant 0 : i32
    %c0_i32_0 = arith.constant 0 : i32
    %c0_i32_1 = arith.constant 0 : i32
    return %arg0, %c0_i32, %c0_i32_0 : i32, i32, i32
  }
}

</mosaic_0001>

<bundles_post_ra>
// kernel: tpu_custom_call.1
= control target key start
LH: loop header
LB: loop body
LE: loop exit
PB: predicated region body
PF: predicated region fallthrough
CT: control target
= control target key end

     0   :  { %s4118_s30 = smov 0   ;;  %s5868_s0 = inlined_call_operand.vmem [shape: f32[2,256,64], index: 0, kind: input, shape index: {}]   ;;  %s5869_s1 = inlined_call_operand.vmem [shape: f32[64,16], index: 1, kind: input, shape index: {}]   ;;  %s5870_s2 = inlined_call_operand.vmem [shape: f32[1,16], index: 2, kind: input, shape index: {}]   ;;  %s5871_s3 = inlined_call_operand.vmem [shape: f32[3,3,16,16], index: 3, kind: input, shape index: {}]   ;;  %s5872_s4 = inlined_call_operand.vmem [shape: f32[1,16], index: 4, kind: input, shape index: {}]   ;;  %s5873_s5 = inlined_call_operand.vmem [shape: f32[16,64], index: 5, kind: input, shape index: {}]   ;;  %s5874_s6 = inlined_call_operand.vmem [shape: f32[1,64], index: 6, kind: input, shape index: {}]   ;;  %s5875_s7 = inlined_call_operand.vmem [shape: f32[256,1], index: 7, kind: input, shape index: {}]   ;;  %s5876_s8 = inlined_call_operand.vmem [shape: f32[256,1], index: 8, kind: input, shape index: {}]   ;;  %s5877_s9 = inlined_call_operand.vmem [shape: f32[2,256,64], index: 9, kind: output, shape index: {}]  }
   0x1 LB: > { %s3623_s10 = sadd.s32 4294967295, %s4064_s30   ;;  %p3627_p0 = scmp.ge.s32.totalorder %s4064_s30, 1  ;;  %s4064_s30 = sphi %s4118_s30, %s19_s30  }
   0x2   : > { %p287_p1 = scmp.lt.s32.totalorder %s4064_s30, 3 }
   0x4   : > { %p288_p2 = pnand %p3627_p0, %p287_p1 }
   0x6   : > { %291 = sbr.rel (%p288_p2) target bundleno = 1202 (0x4b2), region = 56 }
   0xb   : > { %v372_v0 = vld [vmem:[%s5869_s1 + $0x38] sm:$0xff]  ;;  %v371_v1 = vld [vmem:[%s5869_s1 + $0x30] sm:$0xff]  ;;  %p323_p3 = scmp.lt.s32.totalorder %s3623_s10, 1  ;;  %v370_v2 = vld [vmem:[%s5869_s1 + $0x28] sm:$0xff]  ;;  %vm377_vm0 = vcmask 523264   ;;  %vm619_vm1 = vcmask 130048  }
   0xc   : > { %482 = vmatpush.msra.mxu0 %v372_v0  ;;  %v369_v3 = vld [vmem:[%s5869_s1 + $0x20] sm:$0xff]  ;;  %v368_v4 = vld [vmem:[%s5869_s1 + $0x18] sm:$0xff]  ;;  %v367_v5 = vld [vmem:[%s5869_s1 + $0x10] sm:$0xff]  ;;  %v4066_v21 = vmov 0.0   ;;  %v4067_v54 = vmov 0  }
   0xd   : > { %s6086_s10 = smov (!%p323_p3, %s3623_s10), 1  ;;  %v366_v6 = vld [vmem:[%s5869_s1 + $0x8] sm:$0xff]  ;;  %v365_v7 = vld [vmem:[%s5869_s1] sm:$0xff]  ;;  %622 = vst.msk [vmem:[#allocation2 + $0x10] sm:$0xff] %vm619_vm1, %v4066_v21  ;;  %v3665_v47 = vld [vmem:[%s5871_s3 + $0x38] sm:$0xff]  ;;  %4021 = vset.pattern.permute.xlu1 %v4067_v54  ;;  %4020 = vset.pattern.permute.xlu0 %v4067_v54 }
   0xe   : > { %483 = vmatpush.msra.mxu0 %v371_v1  ;;  %s4002_s21 = sshll.u32 %s6086_s10, 8  ;;  %620 = vst.msk [vmem:[#allocation2] sm:$0xff] %vm619_vm1, %v4066_v21  ;;  %v4201_v25 = vld [vmem:[%s5870_s2] ss:$0 sm:$0xff]  ;;  %v691_v37 = vld [vmem:[%s5871_s3 + $0x8] sm:$0xff]  ;;  %4004 = vmatpush.msra.mxu1 %v3665_v47  ;;  %v3664_v49 = vld [vmem:[%s5871_s3 + $0x30] sm:$0xff] }
   0xf   : > { %s4155_s28 = scalar_lea.vmem %s5868_s0, %s4002_s21  ;;  %621 = vst.msk [vmem:[#allocation2 + $0x8] sm:$0xff] %vm619_vm1, %v4066_v21  ;;  %4006 = vmatpush.msra.mxu2 %v691_v37  ;;  %v690_v39 = vld [vmem:[%s5871_s3] sm:$0xff]  ;;  %v3765_v50 = vld [vmem:[%s5871_s3 + $0x18] sm:$0xff]  ;;  %v3767_v51 = vld [vmem:[%s5871_s3 + $0x48] sm:$0xff]  ;;  %4022 = vset.pattern.permute.xlu2 %v4067_v54  ;;  %s5682_s18 = scalar_lea.vmem %s5877_s9, %s4002_s21 }
  0x10   : > { %484 = vmatpush.msra.mxu0 %v370_v2  ;;  %v333_v8 = vld [vmem:[%s4155_s28] sm:$0xff]  ;;  %v334_v9 = vld [vmem:[%s4155_s28 + $0x8] sm:$0xff]  ;;  %v335_v10 = vld [vmem:[%s4155_s28 + $0x10] sm:$0xff]  ;;  %623 = vst.msk [vmem:[#allocation2 + $0x118] sm:$0xff] %vm619_vm1, %v4066_v21  ;;  %4005 = vmatpush.msra.mxu1 %v3664_v49 }
  0x11   : > { %v336_v11 = vld [vmem:[%s4155_s28 + $0x18] sm:$0xff]  ;;  %v337_v12 = vld [vmem:[%s4155_s28 + $0x20] sm:$0xff]  ;;  %v338_v13 = vld [vmem:[%s4155_s28 + $0x28] sm:$0xff]  ;;  %624 = vst.msk [vmem:[#allocation2 + $0x120] sm:$0xff] %vm619_vm1, %v4066_v21  ;;  %4007 = vmatpush.msra.mxu2 %v690_v39 }
  0x12   : > { %485 = vmatpush.msra.mxu0 %v369_v3  ;;  %v339_v14 = vld [vmem:[%s4155_s28 + $0x30] sm:$0xff]  ;;  %v340_v15 = vld [vmem:[%s4155_s28 + $0x38] sm:$0xff]  ;;  %v341_v16 = vld [vmem:[%s4155_s28 + $0x40] sm:$0xff]  ;;  %625 = vst.msk [vmem:[#allocation2 + $0x128] sm:$0xff] %vm619_vm1, %v4066_v21  ;;  %1673 = vmatpush.msrb.mxu1 %v3767_v51 }
  0x13   : > { %v342_v17 = vld [vmem:[%s4155_s28 + $0x48] sm:$0xff]  ;;  %v343_v18 = vld [vmem:[%s4155_s28 + $0x50] sm:$0xff]  ;;  %v344_v19 = vld [vmem:[%s4155_s28 + $0x58] sm:$0xff]  ;;  %1882 = vmatpush.msrb.mxu2 %v3765_v50 }
  0x14   : > { %486 = vmatpush.msra.mxu0 %v368_v4  ;;  %v345_v20 = vld [vmem:[%s4155_s28 + $0x60] sm:$0xff]  ;;  %v346_v22 = vld [vmem:[%s4155_s28 + $0x68] sm:$0xff]  ;;  %v347_v23 = vld [vmem:[%s4155_s28 + $0x70] sm:$0xff] }
  0x15   : > { %v348_v24 = vld [vmem:[%s4155_s28 + $0x78] sm:$0xff]  ;;  %v349_v27 = vld [vmem:[%s4155_s28 + $0x80] sm:$0xff]  ;;  %v350_v31 = vld [vmem:[%s4155_s28 + $0x88] sm:$0xff] }
  0x16   : > { %487 = vmatpush.msra.mxu0 %v367_v5  ;;  %v351_v35 = vld [vmem:[%s4155_s28 + $0x90] sm:$0xff]  ;;  %v352_v41 = vld [vmem:[%s4155_s28 + $0x98] sm:$0xff]  ;;  %v353_v45 = vld [vmem:[%s4155_s28 + $0xa0] sm:$0xff] }
  0x17   : > { %v1302_v52 = vld [vmem:[%s5875_s7 + $0x8] sm:$0xff]  ;;  %v1301_v53 = vld [vmem:[%s5875_s7] sm:$0xff]  ;;  %v355_v62 = vld [vmem:[%s4155_s28 + $0xb0] sm:$0xff] }
  0x18   : > { %488 = vmatpush.msra.mxu0 %v366_v6  ;;  %v354_v56 = vld [vmem:[%s4155_s28 + $0xa8] sm:$0xff]  ;;  %1340 = vperm.xlu1 %4021, %v1302_v52   ;;  %v2933_v60 = vld [vmem:[%s5876_s8] sm:$0xff]  ;;  %v2936_v4 = vld [vmem:[%s5876_s8 + $0x18] sm:$0xff] }
  0x19   : > { %1335 = vperm.xlu0 %4020, %v1301_v53   ;;  %v2934_v59 = vld [vmem:[%s5876_s8 + $0x8] sm:$0xff]  ;;  %v4302_v2 = vld [vmem:[%s5871_s3 + $0x60] sm:$0xff]  ;;  %v1304_v5 = vld [vmem:[%s5875_s7 + $0x18] sm:$0xff] }
  0x1a   : > { %489 = vmatpush.msra.mxu0 %v365_v7  ;;  %v4294_v0 = vld [vmem:[%s5871_s3 + $0x68] sm:$0xff]  ;;  %v356_v7 = vld [vmem:[%s4155_s28 + $0xb8] sm:$0xff]  ;;  %v1307_v21 = vld [vmem:[%s5875_s7 + $0x30] sm:$0xff] }
  0x1b   : > { %3632 = vmatmul.msk.f32.vlgmr.msra.gmra.mxu0 %vm377_vm0, %v333_v8  ;;  %4008 = vmatpush.msra.mxu3 %v4294_v0  ;;  %v1308_v53 = vld [vmem:[%s5875_s7 + $0x38] sm:$0xff]  ;;  %v2942_v54 = vld [vmem:[%s5876_s8 + $0x48] sm:$0xff] }
  0x1c   : > { %807 = vmatpush.msrb.mxu0 %v3665_v47 }
  0x1d   : > { %4009 = vmatpush.msra.mxu3 %v4302_v2 }
  0x1e   : > { %808 = vmatpush.msrb.mxu0 %v3664_v49  ;;  %v360_v49 = vld [vmem:[%s4155_s28 + $0xd8] sm:$0xff] }
  0x20   : > { %926 = vmatpush.msra.mxu0 %v691_v37  ;;  %2972 = vperm.xlu1 %4021, %v2934_v59   ;;  %v359_v37 = vld [vmem:[%s4155_s28 + $0xd0] sm:$0xff] }
  0x21   : > { %2967 = vperm.xlu0 %4020, %v2933_v60  }
  0x22   : > { %927 = vmatpush.msra.mxu0 %v690_v39 }
  0x23   : > { %3633 = vmatmul.msk.f32.gmra.mxu0 %vm377_vm0, %v334_v9 }
  0x28   : > { %2982 = vperm.xlu1 %4021, %v2936_v4   ;;  %v2943_v4 = vld [vmem:[%s5876_s8 + $0x50] sm:$0xff] }
  0x29   : > { %1350 = vperm.xlu0 %4020, %v1304_v5  }
  0x2b   : > { %3634 = vmatmul.msk.f32.gmra.mxu0 %vm377_vm0, %v335_v10 }
  0x33   : > { %3635 = vmatmul.msk.f32.gmra.mxu0 %vm377_vm0, %v336_v11  ;;  %v1303_v11 = vld [vmem:[%s5875_s7 + $0x10] sm:$0xff] }
  0x34   : > { %1345 = vperm.xlu2 %4022, %v1303_v11  }
  0x3b   : > { %3636 = vmatmul.msk.f32.gmra.mxu0 %vm377_vm0, %v337_v12  ;;  %v1306_v12 = vld [vmem:[%s5875_s7 + $0x28] sm:$0xff] }
  0x3c   : > { %1360 = vperm.xlu1 %4021, %v1306_v12  }
  0x43   : > { %3637 = vmatmul.msk.f32.gmra.mxu0 %vm377_vm0, %v338_v13  ;;  %v2937_v13 = vld [vmem:[%s5876_s8 + $0x20] sm:$0xff] }
  0x44   : > { %2987 = vperm.xlu0 %4020, %v2937_v13   ;;  %v2941_v13 = vld [vmem:[%s5876_s8 + $0x40] sm:$0xff] }
  0x4b   : > { %3638 = vmatmul.msk.f32.gmra.mxu0 %vm377_vm0, %v339_v14 }
  0x4c   : > { %1365 = vperm.xlu0 %4020, %v1307_v21  }
  0x53   : > { %3639 = vmatmul.msk.f32.gmra.mxu0 %vm377_vm0, %v340_v15  ;;  %v357_v15 = vld [vmem:[%s4155_s28 + $0xc0] sm:$0xff] }
  0x5b   : > { %3640 = vmatmul.msk.f32.gmra.mxu0 %vm377_vm0, %v341_v16 }
  0x63   : > { %3641 = vmatmul.msk.f32.gmra.mxu0 %vm377_vm0, %v342_v17 }
  0x6b   : > { %3642 = vmatmul.msk.f32.gmra.mxu0 %vm377_vm0, %v343_v18 }
  0x73   : > { %3643 = vmatmul.msk.f32.gmra.mxu0 %vm377_vm0, %v344_v19  ;;  %v2935_v19 = vld [vmem:[%s5876_s8 + $0x10] sm:$0xff] }
  0x74   : > { %2977 = vperm.xlu2 %4022, %v2935_v19  }
  0x7b   : > { %3644 = vmatmul.msk.f32.gmra.mxu0 %vm377_vm0, %v345_v20  ;;  %v2939_v20 = vld [vmem:[%s5876_s8 + $0x30] sm:$0xff] }
  0x7c   : > { %2997 = vperm.xlu1 %4021, %v2939_v20  }
  0x83   : > { %3645 = vmatmul.msk.f32.gmra.mxu0 %vm377_vm0, %v346_v22 }
  0x8b   : > { %3646 = vmatmul.msk.f32.gmra.mxu0 %vm377_vm0, %v347_v23  ;;  %v358_v23 = vld [vmem:[%s4155_s28 + $0xc8] sm:$0xff] }
  0x93   : > { %3647 = vmatmul.msk.f32.gmra.mxu0 %vm377_vm0, %v348_v24 }
  0x98   : > { %v491_v26 = vpop.f32.mrf.mxu0 }
  0x99   : > { %v4205_v28 = vadd.f32 %v4201_v25, %v491_v26 }
  0x9b   : > { %v587_v29 = vmax.f32 %v4205_v28, 0.0  ;;  %3648 = vmatmul.msk.f32.gmra.mxu0 %vm377_vm0, %v349_v27  ;;  %v2962_v28 = vld [vmem:[%s5876_s8 + $0xe8] sm:$0xff] }
  0x9d   : > { %626 = vst.msk [vmem:[#allocation2 + $0x18] sm:$0xff] %vm619_vm1, %v587_v29 }
  0xa0   : > { %v494_v30 = vpop.f32.mrf.mxu0 }
  0xa1   : > { %v4214_v32 = vadd.f32 %v4201_v25, %v494_v30  ;;  %v1305_v30 = vld [vmem:[%s5875_s7 + $0x20] sm:$0xff] }
  0xa2   : > { %1355 = vperm.xlu2 %4022, %v1305_v30   ;;  %v364_v30 = vld [vmem:[%s4155_s28 + $0xf8] sm:$0xff] }
  0xa3   : > { %v588_v33 = vmax.f32 %v4214_v32, 0.0  ;;  %3649 = vmatmul.msk.f32.gmra.mxu0 %vm377_vm0, %v350_v31  ;;  %v1309_v31 = vld [vmem:[%s5875_s7 + $0x40] sm:$0xff] }
  0xa4   : > { %1375 = vperm.xlu1 %4021, %v1309_v31  }
  0xa5   : > { %627 = vst.msk [vmem:[#allocation2 + $0x20] sm:$0xff] %vm619_vm1, %v588_v33 }
  0xa8   : > { %v497_v34 = vpop.f32.mrf.mxu0 }
  0xa9   : > { %v4223_v36 = vadd.f32 %v4201_v25, %v497_v34  ;;  %v2940_v34 = vld [vmem:[%s5876_s8 + $0x38] sm:$0xff] }
  0xaa   : > { %3002 = vperm.xlu0 %4020, %v2940_v34  }
  0xab   : > { %v589_v38 = vmax.f32 %v4223_v36, 0.0  ;;  %3650 = vmatmul.msk.f32.gmra.mxu0 %vm377_vm0, %v351_v35 }
  0xac   : > { %3012 = vperm.xlu1 %4021, %v2942_v54   ;;  %v2944_v54 = vld [vmem:[%s5876_s8 + $0x58] sm:$0xff] }
  0xad   : > { %628 = vst.msk [vmem:[#allocation2 + $0x28] sm:$0xff] %vm619_vm1, %v589_v38 }
  0xb0   : > { %v500_v40 = vpop.f32.mrf.mxu0 }
  0xb1   : > { %v4238_v42 = vadd.f32 %v4201_v25, %v500_v40 }
  0xb3   : > { %v590_v43 = vmax.f32 %v4238_v42, 0.0  ;;  %3651 = vmatmul.msk.f32.gmra.mxu0 %vm377_vm0, %v352_v41 }
  0xb5   : > { %629 = vst.msk [vmem:[#allocation2 + $0x30] sm:$0xff] %vm619_vm1, %v590_v43 }
  0xb8   : > { %v503_v44 = vpop.f32.mrf.mxu0 }
  0xb9   : > { %v4247_v46 = vadd.f32 %v4201_v25, %v503_v44  ;;  %v2938_v44 = vld [vmem:[%s5876_s8 + $0x28] sm:$0xff] }
  0xba   : > { %2992 = vperm.xlu2 %4022, %v2938_v44  }
  0xbb   : > { %v591_v48 = vmax.f32 %v4247_v46, 0.0  ;;  %3652 = vmatmul.msk.f32.gmra.mxu0 %vm377_vm0, %v353_v45  ;;  %v1310_v45 = vld [vmem:[%s5875_s7 + $0x48] sm:$0xff] }
  0xbc   : > { %1380 = vperm.xlu0 %4020, %v1310_v45  }
  0xbd   : > { %630 = vst.msk [vmem:[#allocation2 + $0x38] sm:$0xff] %vm619_vm1, %v591_v48 }
  0xc0   : > { %v506_v55 = vpop.f32.mrf.mxu0 }
  0xc1   : > { %v4274_v57 = vadd.f32 %v4201_v25, %v506_v55 }
  0xc2   : > { %1370 = vperm.xlu2 %4022, %v1308_v53   ;;  %v3764_v53 = vld [vmem:[%s5871_s3 + $0x10] sm:$0xff] }
  0xc3   : > { %v592_v58 = vmax.f32 %v4274_v57, 0.0  ;;  %3653 = vmatmul.msk.f32.gmra.mxu0 %vm377_vm0, %v354_v56  ;;  %v361_v56 = vld [vmem:[%s4155_s28 + $0xe0] sm:$0xff]  ;;  %1883 = vmatpush.msrb.mxu2 %v3764_v53 }
  0xc4   : > { %3017 = vperm.xlu0 %4020, %v2943_v4   ;;  %v1531_v42 = vld [vmem:[#allocation2 + $0x38] sm:$0xff] }
  0xc5   : > { %631 = vst.msk [vmem:[#allocation2 + $0x40] sm:$0xff] %vm619_vm1, %v592_v58 }
  0xc8   : > { %v509_v61 = vpop.f32.mrf.mxu0 }
  0xc9   : > { %v4289_v63 = vadd.f32 %v4201_v25, %v509_v61 }
  0xca   : > { %3007 = vperm.xlu2 %4022, %v2941_v13  }
  0xcb   : > { %v5902_v1 = vmax.f32 %v4289_v63, 0.0  ;;  %3654 = vmatmul.msk.f32.gmra.mxu0 %vm377_vm0, %v355_v62  ;;  %v1312_v62 = vld [vmem:[%s5875_s7 + $0x58] sm:$0xff]  ;;  %v5932_v57 = vmax.f32 %v4289_v63, 0.0 }
  0xcc   : > { %v4304_v3 = vld [vmem:[#allocation2 + $0x3f] sm:$0xff]  ;;  %1390 = vperm.xlu1 %4021, %v1312_v62  }
  0xcd   : > { %632 = vst.msk [vmem:[#allocation2 + $0x48] sm:$0xff] %vm619_vm1, %v5902_v1  ;;  %3705 = vmatmul.msk.f32.vlgmr.msra.gmra.mxu2 %vm619_vm1, %v4304_v3 }
  0xd0   : > { %v512_v6 = vpop.f32.mrf.mxu0 }
  0xd1   : > { %v4320_v8 = vadd.f32 %v4201_v25, %v512_v6  ;;  %v362_v6 = vld [vmem:[%s4155_s28 + $0xe8] sm:$0xff] }
  0xd3   : > { %v5900_v9 = vmax.f32 %v4320_v8, 0.0  ;;  %3655 = vmatmul.msk.f32.gmra.mxu0 %vm377_vm0, %v356_v7 }
  0xd4   : > { %v4324_v10 = vld [vmem:[#allocation2 + $0x47] sm:$0xff] }
  0xd5   : > { %633 = vst.msk [vmem:[#allocation2 + $0x50] sm:$0xff] %vm619_vm1, %v5900_v9  ;;  %3706 = vmatmul.msk.f32.gmra.mxu2 %vm619_vm1, %v4324_v10 }
  0xd8   : > { %v515_v14 = vpop.f32.mrf.mxu0 }
  0xd9   : > { %v4342_v16 = vadd.f32 %v4201_v25, %v515_v14  ;;  %v1313_v14 = vld [vmem:[%s5875_s7 + $0x60] sm:$0xff] }
  0xda   : > { %1395 = vperm.xlu0 %4020, %v1313_v14   ;;  %v4539_v14 = vld [vmem:[#allocation2 + $0x27] sm:$0xff] }
  0xdb   : > { %v5899_v17 = vmax.f32 %v4342_v16, 0.0  ;;  %3656 = vmatmul.msk.f32.gmra.mxu0 %vm377_vm0, %v357_v15 }
  0xdc   : > { %v667_v18 = vld [vmem:[#allocation2 + $0x4f] sm:$0xff] }
  0xdd   : > { %634 = vst.msk [vmem:[#allocation2 + $0x58] sm:$0xff] %vm619_vm1, %v5899_v17  ;;  %3673 = vmatmul.msk.f32.vlgmr.msra.gmra.mxu1 %vm619_vm1, %v667_v18  ;;  %3707 = vmatmul.msk.f32.gmra.mxu2 %vm619_vm1, %v667_v18  ;;  %v363_v18 = vld [vmem:[%s4155_s28 + $0xf0] sm:$0xff] }
  0xde   : > { %v1534_v63 = vld [vmem:[#allocation2 + $0x50] sm:$0xff] }
  0xe0   : > { %v518_v22 = vpop.f32.mrf.mxu0 }
  0xe1   : > { %v4362_v24 = vadd.f32 %v4201_v25, %v518_v22  ;;  %v1311_v22 = vld [vmem:[%s5875_s7 + $0x50] sm:$0xff] }
  0xe2   : > { %1385 = vperm.xlu2 %4022, %v1311_v22   ;;  %v2949_v22 = vld [vmem:[%s5876_s8 + $0x80] sm:$0xff] }
  0xe3   : > { %v5897_v26 = vmax.f32 %v4362_v24, 0.0  ;;  %3657 = vmatmul.msk.f32.gmra.mxu0 %vm377_vm0, %v358_v23  ;;  %v2945_v23 = vld [vmem:[%s5876_s8 + $0x60] sm:$0xff] }
  0xe4   : > { %v668_v27 = vld [vmem:[#allocation2 + $0x57] sm:$0xff]  ;;  %3027 = vperm.xlu1 %4021, %v2945_v23  }
  0xe5   : > { %635 = vst.msk [vmem:[#allocation2 + $0x60] sm:$0xff] %vm619_vm1, %v5897_v26  ;;  %3674 = vmatmul.msk.f32.gmra.mxu1 %vm619_vm1, %v668_v27  ;;  %3708 = vmatmul.msk.f32.gmra.mxu2 %vm619_vm1, %v668_v27  ;;  %v1031_v36 = vld [vmem:[#allocation2 + $0x57] sm:$0xff] }
  0xe8   : > { %v521_v35 = vpop.f32.mrf.mxu0 }
  0xe9   : > { %v4382_v39 = vadd.f32 %v4201_v25, %v521_v35 }
  0xea   : > { %3022 = vperm.xlu2 %4022, %v2944_v54   ;;  %v4579_v54 = vld [vmem:[#allocation2 + $0x37] sm:$0xff] }
  0xeb   : > { %v5896_v40 = vmax.f32 %v4382_v39, 0.0  ;;  %3658 = vmatmul.msk.f32.gmra.mxu0 %vm377_vm0, %v359_v37  ;;  %v1315_v37 = vld [vmem:[%s5875_s7 + $0x70] sm:$0xff] }
  0xec   : > { %v669_v41 = vld [vmem:[#allocation2 + $0x5f] sm:$0xff]  ;;  %1405 = vperm.xlu1 %4021, %v1315_v37  }
  0xed   : > { %636 = vst.msk [vmem:[#allocation2 + $0x68] sm:$0xff] %vm619_vm1, %v5896_v40  ;;  %3675 = vmatmul.msk.f32.gmra.mxu1 %vm619_vm1, %v669_v41  ;;  %3709 = vmatmul.msk.f32.gmra.mxu2 %vm619_vm1, %v669_v41  ;;  %v3935_v40 = vld [vmem:[%s5871_s3 + $0x88] sm:$0xff] }
  0xee   : > { %3739 = vmatmul.msk.f32.vlgmr.msra.gmra.mxu3 %vm619_vm1, %v669_v41  ;;  %v2946_v41 = vld [vmem:[%s5876_s8 + $0x68] sm:$0xff]  ;;  %2802 = vmatpush.msra.mxu2 %v3935_v40  ;;  %v2960_v40 = vld [vmem:[%s5876_s8 + $0xd8] sm:$0xff] }
  0xef   : > { %3032 = vperm.xlu0 %4020, %v2946_v41   ;;  %v2947_v41 = vld [vmem:[%s5876_s8 + $0x70] sm:$0xff] }
  0xf0   : > { %v524_v47 = vpop.f32.mrf.mxu0 }
  0xf1   : > { %v4400_v50 = vadd.f32 %v4201_v25, %v524_v47  ;;  %v4491_v47 = vld [vmem:[#allocation2 + $0x17] sm:$0xff] }
  0xf3   : > { %v5894_v51 = vmax.f32 %v4400_v50, 0.0  ;;  %3659 = vmatmul.msk.f32.gmra.mxu0 %vm377_vm0, %v360_v49 }
  0xf4   : > { %v670_v52 = vld [vmem:[#allocation2 + $0x67] sm:$0xff] }
  0xf5   : > { %637 = vst.msk [vmem:[#allocation2 + $0x70] sm:$0xff] %vm619_vm1, %v5894_v51  ;;  %3676 = vmatmul.msk.f32.gmra.mxu1 %vm619_vm1, %v670_v52  ;;  %3710 = vmatmul.msk.f32.gmra.mxu2 %vm619_vm1, %v670_v52 }
  0xf6   : > { %3740 = vmatmul.msk.f32.gmra.mxu3 %vm619_vm1, %v670_v52 }
  0xf8   : > { %v527_v55 = vpop.f32.mrf.mxu0 }
  0xf9   : > { %v4418_v59 = vadd.f32 %v4201_v25, %v527_v55 }
  0xfb   : > { %v5893_v60 = vmax.f32 %v4418_v59, 0.0  ;;  %3660 = vmatmul.msk.f32.gmra.mxu0 %vm377_vm0, %v361_v56 }
  0xfc   : > { %v671_v61 = vld [vmem:[#allocation2 + $0x6f] sm:$0xff] }
  0xfd   : > { %638 = vst.msk [vmem:[#allocation2 + $0x78] sm:$0xff] %vm619_vm1, %v5893_v60  ;;  %3677 = vmatmul.msk.f32.gmra.mxu1 %vm619_vm1, %v671_v61  ;;  %3711 = vmatmul.msk.f32.gmra.mxu2 %vm619_vm1, %v671_v61 }
  0xfe   : > { %3741 = vmatmul.msk.f32.gmra.mxu3 %vm619_vm1, %v671_v61  ;;  %v4516_v61 = vld [vmem:[#allocation2 + $0x1f] sm:$0xff] }
 0x100   : > { %v530_v5 = vpop.f32.mrf.mxu0 }
 0x101   : > { %v4436_v7 = vadd.f32 %v4201_v25, %v530_v5  ;;  %v1314_v5 = vld [vmem:[%s5875_s7 + $0x68] sm:$0xff] }
 0x102   : > { %1400 = vperm.xlu2 %4022, %v1314_v5  }
 0x103   : > { %v5891_v11 = vmax.f32 %v4436_v7, 0.0  ;;  %3661 = vmatmul.msk.f32.gmra.mxu0 %vm377_vm0, %v362_v6  ;;  %v2948_v6 = vld [vmem:[%s5876_s8 + $0x78] sm:$0xff] }
 0x104   : > { %v672_v12 = vld [vmem:[#allocation2 + $0x77] sm:$0xff]  ;;  %3042 = vperm.xlu1 %4021, %v2948_v6  }
 0x105   : > { %639 = vst.msk [vmem:[#allocation2 + $0x80] sm:$0xff] %vm619_vm1, %v5891_v11  ;;  %3678 = vmatmul.msk.f32.gmra.mxu1 %vm619_vm1, %v672_v12  ;;  %3712 = vmatmul.msk.f32.gmra.mxu2 %vm619_vm1, %v672_v12 }
 0x106   : > { %3742 = vmatmul.msk.f32.gmra.mxu3 %vm619_vm1, %v672_v12 }
 0x108   : > { %v533_v15 = vpop.f32.mrf.mxu0 }
 0x109   : > { %v4454_v19 = vadd.f32 %v4201_v25, %v533_v15 }
 0x10a   : > { %3037 = vperm.xlu2 %4022, %v2947_v41  }
 0x10b   : > { %v5890_v20 = vmax.f32 %v4454_v19, 0.0  ;;  %3662 = vmatmul.msk.f32.gmra.mxu0 %vm377_vm0, %v363_v18 }
 0x10c   : > { %v673_v21 = vld [vmem:[#allocation2 + $0x7f] sm:$0xff] }
 0x10d   : > { %640 = vst.msk [vmem:[#allocation2 + $0x88] sm:$0xff] %vm619_vm1, %v5890_v20  ;;  %3679 = vmatmul.msk.f32.gmra.mxu1 %vm619_vm1, %v673_v21  ;;  %3713 = vmatmul.msk.f32.gmra.mxu2 %vm619_vm1, %v673_v21 }
 0x10e   : > { %3743 = vmatmul.msk.f32.gmra.mxu3 %vm619_vm1, %v673_v21  ;;  %v1318_v21 = vld [vmem:[%s5875_s7 + $0x88] sm:$0xff] }
 0x10f   : > { %1420 = vperm.xlu1 %4021, %v1318_v21   ;;  %v3833_v21 = vld [vmem:[%s5871_s3 + $0x78] sm:$0xff] }
 0x110   : > { %v536_v27 = vpop.f32.mrf.mxu0  ;;  %2126 = vmatpush.msrb.mxu3 %v3833_v21 }
 0x111   : > { %v4472_v31 = vadd.f32 %v4201_v25, %v536_v27 }
 0x113   : > { %v5889_v34 = vmax.f32 %v4472_v31, 0.0  ;;  %3663 = vmatmul.msk.f32.gmra.mxu0 %vm377_vm0, %v364_v30  ;;  %v4559_v30 = vld [vmem:[#allocation2 + $0x2f] sm:$0xff] }
 0x114   : > { %v674_v35 = vld [vmem:[#allocation2 + $0x87] sm:$0xff] }
 0x115   : > { %641 = vst.msk [vmem:[#allocation2 + $0x90] sm:$0xff] %vm619_vm1, %v5889_v34  ;;  %3680 = vmatmul.msk.f32.gmra.mxu1 %vm619_vm1, %v674_v35  ;;  %3714 = vmatmul.msk.f32.gmra.mxu2 %vm619_vm1, %v674_v35 }
 0x116   : > { %3744 = vmatmul.msk.f32.gmra.mxu3 %vm619_vm1, %v674_v35 }
 0x118   : > { %v539_v44 = vpop.f32.mrf.mxu0 }
 0x119   : > { %v4489_v45 = vadd.f32 %v4201_v25, %v539_v44  ;;  %v1319_v44 = vld [vmem:[%s5875_s7 + $0x90] sm:$0xff] }
 0x11b   : > { %v5888_v49 = vmax.f32 %v4489_v45, 0.0  ;;  %3666 = vmatmul.msk.f32.vlgmr.msrb.gmra.mxu0 %vm619_vm1, %v4491_v47 }
 0x11c   : > { %v675_v52 = vld [vmem:[#allocation2 + $0x8f] sm:$0xff]  ;;  %1170 = vmatpush.msrb.mxu0 %v4294_v0  ;;  %v1316_v0 = vld [vmem:[%s5875_s7 + $0x78] sm:$0xff] }
 0x11d   : > { %642 = vst.msk [vmem:[#allocation2 + $0x98] sm:$0xff] %vm619_vm1, %v5888_v49  ;;  %3681 = vmatmul.msk.f32.gmra.mxu1 %vm619_vm1, %v675_v52  ;;  %3715 = vmatmul.msk.f32.gmra.mxu2 %vm619_vm1, %v675_v52 }
 0x11e   : > { %3745 = vmatmul.msk.f32.gmra.mxu3 %vm619_vm1, %v675_v52  ;;  %1171 = vmatpush.msrb.mxu0 %v4302_v2  ;;  %v3766_v2 = vld [vmem:[%s5871_s3 + $0x40] sm:$0xff] }
 0x11f   : > { %1410 = vperm.xlu0 %4020, %v1316_v0   ;;  %1674 = vmatpush.msrb.mxu1 %v3766_v2  ;;  %v2951_v2 = vld [vmem:[%s5876_s8 + $0x90] sm:$0xff] }
 0x120   : > { %v542_v55 = vpop.f32.mrf.mxu0  ;;  %3057 = vperm.xlu1 %4021, %v2951_v2  }
 0x121   : > { %v4514_v56 = vadd.f32 %v4201_v25, %v542_v55 }
 0x123   : > { %v5886_v62 = vmax.f32 %v4514_v56, 0.0  ;;  %3667 = vmatmul.msk.f32.gmra.mxu0 %vm619_vm1, %v4516_v61 }
 0x124   : > { %v676_v4 = vld [vmem:[#allocation2 + $0x97] sm:$0xff] }
 0x125   : > { %643 = vst.msk [vmem:[#allocation2 + $0xa0] sm:$0xff] %vm619_vm1, %v5886_v62  ;;  %3682 = vmatmul.msk.f32.gmra.mxu1 %vm619_vm1, %v676_v4  ;;  %3716 = vmatmul.msk.f32.gmra.mxu2 %vm619_vm1, %v676_v4 }
 0x126   : > { %3746 = vmatmul.msk.f32.gmra.mxu3 %vm619_vm1, %v676_v4  ;;  %v1317_v4 = vld [vmem:[%s5875_s7 + $0x80] sm:$0xff] }
 0x127   : > { %3047 = vperm.xlu0 %4020, %v2949_v22   ;;  %1415 = vperm.xlu2 %4022, %v1317_v4   ;;  %v1321_v22 = vld [vmem:[%s5875_s7 + $0xa0] sm:$0xff]  ;;  %v1322_v4 = vld [vmem:[%s5875_s7 + $0xa8] sm:$0xff] }
 0x128   : > { %v545_v12 = vpop.f32.mrf.mxu0  ;;  %1435 = vperm.xlu1 %4021, %v1321_v22  }
 0x129   : > { %v4537_v13 = vadd.f32 %v4201_v25, %v545_v12 }
 0x12b   : > { %v5885_v15 = vmax.f32 %v4537_v13, 0.0  ;;  %3668 = vmatmul.msk.f32.gmra.mxu0 %vm619_vm1, %v4539_v14 }
 0x12c   : > { %v677_v18 = vld [vmem:[#allocation2 + $0x9f] sm:$0xff] }
 0x12d   : > { %644 = vst.msk [vmem:[#allocation2 + $0xa8] sm:$0xff] %vm619_vm1, %v5885_v15  ;;  %3683 = vmatmul.msk.f32.gmra.mxu1 %vm619_vm1, %v677_v18  ;;  %3717 = vmatmul.msk.f32.gmra.mxu2 %vm619_vm1, %v677_v18 }
 0x12e   : > { %3747 = vmatmul.msk.f32.gmra.mxu3 %vm619_vm1, %v677_v18 }
 0x12f   : > { %1425 = vperm.xlu0 %4020, %v1319_v44  }
 0x130   : > { %v548_v23 = vpop.f32.mrf.mxu0 }
 0x131   : > { %v4557_v27 = vadd.f32 %v4201_v25, %v548_v23  ;;  %v2952_v23 = vld [vmem:[%s5876_s8 + $0x98] sm:$0xff] }
 0x133   : > { %v5884_v35 = vmax.f32 %v4557_v27, 0.0  ;;  %3669 = vmatmul.msk.f32.gmra.mxu0 %vm619_vm1, %v4559_v30 }
 0x134   : > { %v678_v37 = vld [vmem:[#allocation2 + $0xa7] sm:$0xff] }
 0x135   : > { %645 = vst.msk [vmem:[#allocation2 + $0xb0] sm:$0xff] %vm619_vm1, %v5884_v35  ;;  %3684 = vmatmul.msk.f32.gmra.mxu1 %vm619_vm1, %v678_v37  ;;  %3718 = vmatmul.msk.f32.gmra.mxu2 %vm619_vm1, %v678_v37 }
 0x136   : > { %3748 = vmatmul.msk.f32.gmra.mxu3 %vm619_vm1, %v678_v37 }
 0x137   : > { %3062 = vperm.xlu0 %4020, %v2952_v23  }
 0x138   : > { %v551_v52 = vpop.f32.mrf.mxu0 }
 0x139   : > { %v4577_v53 = vadd.f32 %v4201_v25, %v551_v52 }
 0x13b   : > { %v5882_v0 = vmax.f32 %v4577_v53, 0.0  ;;  %3670 = vmatmul.msk.f32.gmra.mxu0 %vm619_vm1, %v4579_v54 }
 0x13c   : > { %v679_v55 = vld [vmem:[#allocation2 + $0xaf] sm:$0xff] }
 0x13d   : > { %646 = vst.msk [vmem:[#allocation2 + $0xb8] sm:$0xff] %vm619_vm1, %v5882_v0  ;;  %3685 = vmatmul.msk.f32.gmra.mxu1 %vm619_vm1, %v679_v55  ;;  %3719 = vmatmul.msk.f32.gmra.mxu2 %vm619_vm1, %v679_v55 }
 0x13e   : > { %3749 = vmatmul.msk.f32.gmra.mxu3 %vm619_vm1, %v679_v55  ;;  %v2950_v55 = vld [vmem:[%s5876_s8 + $0x88] sm:$0xff] }
 0x13f   : > { %3052 = vperm.xlu2 %4022, %v2950_v55   ;;  %1440 = vperm.xlu0 %4020, %v1322_v4  }
 0x140   : > { %v554_v5 = vpop.f32.mrf.mxu0 }
 0x141   : > { %v4597_v6 = vadd.f32 %v4201_v25, %v554_v5 }
 0x143   : > { %v5881_v12 = vmax.f32 %v4597_v6, 0.0  ;;  %3671 = vmatmul.msk.f32.gmra.mxu0 %vm619_vm1, %v4304_v3 }
 0x144   : > { %v680_v18 = vld [vmem:[#allocation2 + $0xb7] sm:$0xff] }
 0x145   : > { %647 = vst.msk [vmem:[#allocation2 + $0xc0] sm:$0xff] %vm619_vm1, %v5881_v12  ;;  %3686 = vmatmul.msk.f32.gmra.mxu1 %vm619_vm1, %v680_v18  ;;  %3720 = vmatmul.msk.f32.gmra.mxu2 %vm619_vm1, %v680_v18 }
 0x146   : > { %3750 = vmatmul.msk.f32.gmra.mxu3 %vm619_vm1, %v680_v18  ;;  %v658_v18 = vld [vmem:[#allocation2 + $0x7] sm:$0xff] }
 0x148   : > { %v557_v37 = vpop.f32.mrf.mxu0 }
 0x149   : > { %v4618_v41 = vadd.f32 %v4201_v25, %v557_v37  ;;  %v1320_v37 = vld [vmem:[%s5875_s7 + $0x98] sm:$0xff] }
 0x14a   : > { %1430 = vperm.xlu2 %4022, %v1320_v37   ;;  %v1324_v37 = vld [vmem:[%s5875_s7 + $0xb8] sm:$0xff] }
 0x14b   : > { %v5879_v44 = vmax.f32 %v4618_v41, 0.0  ;;  %3672 = vmatmul.msk.f32.gmra.mxu0 %vm619_vm1, %v4324_v10 }
 0x14c   : > { %v681_v52 = vld [vmem:[#allocation2 + $0xbf] sm:$0xff] }
 0x14d   : > { %648 = vst.msk [vmem:[#allocation2 + $0xc8] sm:$0xff] %vm619_vm1, %v5879_v44  ;;  %3687 = vmatmul.msk.f32.gmra.mxu1 %vm619_vm1, %v681_v52  ;;  %3721 = vmatmul.msk.f32.gmra.mxu2 %vm619_vm1, %v681_v52 }
 0x14e   : > { %3751 = vmatmul.msk.f32.gmra.mxu3 %vm619_vm1, %v681_v52  ;;  %v2954_v52 = vld [vmem:[%s5876_s8 + $0xa8] sm:$0xff] }
 0x14f   : > { %3072 = vperm.xlu1 %4021, %v2954_v52   ;;  %v2955_v52 = vld [vmem:[%s5876_s8 + $0xb0] sm:$0xff] }
 0x150   : > { %v560_v2 = vpop.f32.mrf.mxu0  ;;  %v950_v5 = vpop.f32.mrf.mxu2  ;;  %3077 = vperm.xlu0 %4020, %v2955_v52   ;;  %v1325_v52 = vld [vmem:[%s5875_s7 + $0xc0] sm:$0xff] }
 0x151   : > { %v4636_v21 = vadd.f32 %v4201_v25, %v560_v2  ;;  %v659_v2 = vld [vmem:[#allocation2 + $0xf] sm:$0xff] }
 0x153   : > { %v5878_v22 = vmax.f32 %v4636_v21, 0.0  ;;  %3698 = vmatmul.msk.f32.vlgmr.msra.gmra.mxu0 %vm619_vm1, %v658_v18 }
 0x154   : > { %v682_v23 = vld [vmem:[#allocation2 + $0xc7] sm:$0xff] }
 0x155   : > { %649 = vst.msk [vmem:[#allocation2 + $0xd0] sm:$0xff] %vm619_vm1, %v5878_v22  ;;  %3688 = vmatmul.msk.f32.gmra.mxu1 %vm619_vm1, %v682_v23  ;;  %3722 = vmatmul.msk.f32.gmra.mxu2 %vm619_vm1, %v682_v23 }
 0x156   : > { %3752 = vmatmul.msk.f32.gmra.mxu3 %vm619_vm1, %v682_v23 }
 0x157   : > { %1450 = vperm.xlu1 %4021, %v1324_v37   ;;  %v2953_v37 = vld [vmem:[%s5876_s8 + $0xa0] sm:$0xff] }
 0x158   : > { %v563_v55 = vpop.f32.mrf.mxu0  ;;  %v4652_v4 = vpop.f32.mrf.mxu2  ;;  %3067 = vperm.xlu2 %4022, %v2953_v37   ;;  %1455 = vperm.xlu0 %4020, %v1325_v52   ;;  %v1323_v37 = vld [vmem:[%s5875_s7 + $0xb0] sm:$0xff]  ;;  %v2957_v52 = vld [vmem:[%s5876_s8 + $0xc0] sm:$0xff] }
 0x159   : > { %v4655_v18 = vadd.f32 %v4201_v25, %v563_v55 }
 0x15a   : > { %v831_v22 = vpop.f32.mrf.mxu1 }
 0x15b   : > { %v5880_v23 = vmax.f32 %v4655_v18, 0.0  ;;  %3699 = vmatmul.msk.f32.gmra.mxu0 %vm619_vm1, %v659_v2 }
 0x15c   : > { %v683_v44 = vld [vmem:[#allocation2 + $0xcf] sm:$0xff] }
 0x15d   : > { %650 = vst.msk [vmem:[#allocation2 + $0xd8] sm:$0xff] %vm619_vm1, %v5880_v23  ;;  %3689 = vmatmul.msk.f32.gmra.mxu1 %vm619_vm1, %v683_v44  ;;  %3723 = vmatmul.msk.f32.gmra.mxu2 %vm619_vm1, %v683_v44 }
 0x15e   : > { %3753 = vmatmul.msk.f32.gmra.mxu3 %vm619_vm1, %v683_v44 }
 0x15f   : > { %3087 = vperm.xlu1 %4021, %v2957_v52  }
 0x160   : > { %v566_v55 = vpop.f32.mrf.mxu0  ;;  %v4671_v2 = vpop.f32.mrf.mxu2  ;;  %1445 = vperm.xlu2 %4022, %v1323_v37  }
 0x161   : > { %v4674_v23 = vadd.f32 %v4201_v25, %v566_v55 }
 0x162   : > { %v834_v12 = vpop.f32.mrf.mxu1 }
 0x163   : > { %v5883_v0 = vmax.f32 %v4674_v23, 0.0  ;;  %3700 = vmatmul.msk.f32.gmra.mxu0 %vm619_vm1, %v4491_v47 }
 0x164   : > { %v684_v44 = vld [vmem:[#allocation2 + $0xd7] sm:$0xff] }
 0x165   : > { %651 = vst.msk [vmem:[#allocation2 + $0xe0] sm:$0xff] %vm619_vm1, %v5883_v0  ;;  %3690 = vmatmul.msk.f32.gmra.mxu1 %vm619_vm1, %v684_v44  ;;  %3724 = vmatmul.msk.f32.gmra.mxu2 %vm619_vm1, %v684_v44 }
 0x166   : > { %3754 = vmatmul.msk.f32.gmra.mxu3 %vm619_vm1, %v684_v44 }
 0x168   : > { %v569_v47 = vpop.f32.mrf.mxu0  ;;  %v4691_v55 = vpop.f32.mrf.mxu2 }
 0x169   : > { %v4694_v0 = vadd.f32 %v4201_v25, %v569_v47 }
 0x16a   : > { %v837_v35 = vpop.f32.mrf.mxu1 }
 0x16b   : > { %v5887_v15 = vmax.f32 %v4694_v0, 0.0  ;;  %3701 = vmatmul.msk.f32.gmra.mxu0 %vm619_vm1, %v4516_v61  ;;  %v951_v61 = vadd.f32 %v950_v5, %v831_v22  ;;  %v2958_v5 = vld [vmem:[%s5876_s8 + $0xc8] sm:$0xff]  ;;  %v954_v22 = vadd.f32 %v4652_v4, %v834_v12  ;;  %v2956_v12 = vld [vmem:[%s5876_s8 + $0xb8] sm:$0xff] }
 0x16c   : > { %v685_v44 = vld [vmem:[#allocation2 + $0xdf] sm:$0xff]  ;;  %3092 = vperm.xlu0 %4020, %v2958_v5   ;;  %3082 = vperm.xlu2 %4022, %v2956_v12   ;;  %v1326_v12 = vld [vmem:[%s5875_s7 + $0xc8] sm:$0xff] }
 0x16d   : > { %652 = vst.msk [vmem:[#allocation2 + $0xe8] sm:$0xff] %vm619_vm1, %v5887_v15  ;;  %3691 = vmatmul.msk.f32.gmra.mxu1 %vm619_vm1, %v685_v44  ;;  %3725 = vmatmul.msk.f32.gmra.mxu2 %vm619_vm1, %v685_v44  ;;  %v1328_v4 = vld [vmem:[%s5875_s7 + $0xd8] sm:$0xff] }
 0x16e   : > { %3755 = vmatmul.msk.f32.gmra.mxu3 %vm619_vm1, %v685_v44 }
 0x170   : > { %v572_v47 = vpop.f32.mrf.mxu0  ;;  %v4711_v62 = vpop.f32.mrf.mxu2 }
 0x171   : > { %v4714_v15 = vadd.f32 %v4201_v25, %v572_v47  ;;  %v1194_v49 = vpop.f32.mrf.mxu3 }
 0x172   : > { %v4716_v34 = vadd.f32 %v1194_v49, %v951_v61  ;;  %v840_v44 = vpop.f32.mrf.mxu1  ;;  %v1327_v49 = vld [vmem:[%s5875_s7 + $0xd0] sm:$0xff] }
 0x173   : > { %v5892_v20 = vmax.f32 %v4714_v15, 0.0  ;;  %3702 = vmatmul.msk.f32.gmra.mxu0 %vm619_vm1, %v4539_v14  ;;  %1465 = vperm.xlu1 %4021, %v1327_v49   ;;  %v957_v49 = vadd.f32 %v4671_v2, %v837_v35  ;;  %v3867_v2 = vld [vmem:[%s5871_s3 + $0x28] sm:$0xff] }
 0x174   : > { %v686_v11 = vld [vmem:[#allocation2 + $0xe7] sm:$0xff]  ;;  %1470 = vperm.xlu0 %4020, %v1328_v4   ;;  %2558 = vmatpush.msra.mxu1 %v3867_v2  ;;  %v960_v4 = vadd.f32 %v4691_v55, %v840_v44 }
 0x175   : > { %653 = vst.msk [vmem:[#allocation2 + $0xf0] sm:$0xff] %vm619_vm1, %v5892_v20  ;;  %3692 = vmatmul.msk.f32.gmra.mxu1 %vm619_vm1, %v686_v11  ;;  %3726 = vmatmul.msk.f32.gmra.mxu2 %vm619_vm1, %v686_v11  ;;  %v1330_v55 = vld [vmem:[%s5875_s7 + $0xe8] sm:$0xff]  ;;  %v2961_v44 = vld [vmem:[%s5876_s8 + $0xe0] sm:$0xff] }
 0x176   : > { %3756 = vmatmul.msk.f32.gmra.mxu3 %vm619_vm1, %v686_v11  ;;  %1460 = vperm.xlu2 %4022, %v1326_v12  }
 0x178   : > { %v575_v37 = vpop.f32.mrf.mxu0  ;;  %v4734_v52 = vpop.f32.mrf.mxu2 }
 0x179   : > { %v4737_v61 = vadd.f32 %v4201_v25, %v575_v37  ;;  %v1197_v47 = vpop.f32.mrf.mxu3 }
 0x17a   : > { %v4739_v11 = vadd.f32 %v1197_v47, %v954_v22  ;;  %v843_v20 = vpop.f32.mrf.mxu1 }
 0x17b   : > { %v5895_v60 = vmax.f32 %v4737_v61, 0.0  ;;  %3703 = vmatmul.msk.f32.gmra.mxu0 %vm619_vm1, %v4559_v30  ;;  %3102 = vperm.xlu1 %4021, %v2960_v40  }
 0x17c   : > { %v687_v51 = vld [vmem:[#allocation2 + $0xef] sm:$0xff]  ;;  %3107 = vperm.xlu0 %4020, %v2961_v44  }
 0x17d   : > { %654 = vst.msk [vmem:[#allocation2 + $0xf8] sm:$0xff] %vm619_vm1, %v5895_v60  ;;  %3693 = vmatmul.msk.f32.gmra.mxu1 %vm619_vm1, %v687_v51  ;;  %3727 = vmatmul.msk.f32.gmra.mxu2 %vm619_vm1, %v687_v51 }
 0x17e   : > { %3757 = vmatmul.msk.f32.gmra.mxu3 %vm619_vm1, %v687_v51 }
 0x180   : > { %v578_v5 = vpop.f32.mrf.mxu0  ;;  %v4757_v22 = vpop.f32.mrf.mxu2 }
 0x181   : > { %v4760_v37 = vadd.f32 %v4201_v25, %v578_v5  ;;  %v1200_v47 = vpop.f32.mrf.mxu3 }
 0x182   : > { %v4762_v51 = vadd.f32 %v1200_v47, %v957_v49  ;;  %v846_v60 = vpop.f32.mrf.mxu1 }
 0x183   : > { %v5898_v26 = vmax.f32 %v4760_v37, 0.0  ;;  %3704 = vmatmul.msk.f32.gmra.mxu0 %vm619_vm1, %v4579_v54  ;;  %1480 = vperm.xlu1 %4021, %v1330_v55  }
 0x184   : > { %v688_v35 = vld [vmem:[#allocation2 + $0xf7] sm:$0xff] }
 0x185   : > { %655 = vst.msk [vmem:[#allocation2 + $0x100] sm:$0xff] %vm619_vm1, %v5898_v26  ;;  %3694 = vmatmul.msk.f32.gmra.mxu1 %vm619_vm1, %v688_v35  ;;  %3728 = vmatmul.msk.f32.gmra.mxu2 %vm619_vm1, %v688_v35 }
 0x186   : > { %3758 = vmatmul.msk.f32.gmra.mxu3 %vm619_vm1, %v688_v35 }
 0x188   : > { %v581_v49 = vpop.f32.mrf.mxu0  ;;  %v4786_v5 = vpop.f32.mrf.mxu2 }
 0x189   : > { %v4789_v47 = vadd.f32 %v4201_v25, %v581_v49  ;;  %v1203_v35 = vpop.f32.mrf.mxu3 }
 0x18a   : > { %v4791_v26 = vadd.f32 %v1203_v35, %v960_v4  ;;  %v849_v17 = vpop.f32.mrf.mxu1 }
 0x18b   : > { %v5901_v9 = vmax.f32 %v4789_v47, 0.0  ;;  %3732 = vmatmul.msk.f32.vlgmr.msrb.gmra.mxu0 %vm619_vm1, %v4539_v14  ;;  %v963_v14 = vadd.f32 %v4711_v62, %v843_v20  ;;  %v3832_v20 = vld [vmem:[%s5871_s3 + $0x70] sm:$0xff] }
 0x18c   : > { %v689_v2 = vld [vmem:[#allocation2 + $0xff] sm:$0xff]  ;;  %v1331_v62 = vld [vmem:[%s5875_s7 + $0xf0] sm:$0xff]  ;;  %2127 = vmatpush.msrb.mxu3 %v3832_v20 }
 0x18d   : > { %656 = vst.msk [vmem:[#allocation2 + $0x108] sm:$0xff] %vm619_vm1, %v5901_v9  ;;  %3695 = vmatmul.msk.f32.gmra.mxu1 %vm619_vm1, %v689_v2  ;;  %3729 = vmatmul.msk.f32.gmra.mxu2 %vm619_vm1, %v689_v2  ;;  %v1525_v9 = vld [vmem:[#allocation2 + $0x8] sm:$0xff] }
 0x18e   : > { %3759 = vmatmul.msk.f32.gmra.mxu3 %vm619_vm1, %v689_v2  ;;  %1485 = vperm.xlu0 %4020, %v1331_v62  }
 0x190   : > { %v584_v12 = vpop.f32.mrf.mxu0  ;;  %v4809_v40 = vpop.f32.mrf.mxu2 }
 0x191   : > { %v4812_v4 = vadd.f32 %v4201_v25, %v584_v12  ;;  %v1206_v49 = vpop.f32.mrf.mxu3  ;;  %v2959_v25 = vld [vmem:[%s5876_s8 + $0xd0] sm:$0xff] }
 0x192   : > { %v4814_v35 = vadd.f32 %v1206_v49, %v963_v14  ;;  %v852_v2 = vpop.f32.mrf.mxu1  ;;  %3097 = vperm.xlu2 %4022, %v2959_v25   ;;  %v1526_v49 = vld [vmem:[#allocation2 + $0x10] sm:$0xff]  ;;  %v3869_v25 = vld [vmem:[%s5871_s3 + $0x58] sm:$0xff] }
 0x193   : > { %v5903_v1 = vmax.f32 %v4812_v4, 0.0  ;;  %3733 = vmatmul.msk.f32.gmra.mxu0 %vm619_vm1, %v4559_v30  ;;  %v966_v30 = vadd.f32 %v4734_v52, %v846_v60  ;;  %v1329_v60 = vld [vmem:[%s5875_s7 + $0xe0] sm:$0xff]  ;;  %v969_v52 = vadd.f32 %v4757_v22, %v849_v17 }
 0x194   : > { %v692_v44 = vld [vmem:[#allocation2 + $0x107] sm:$0xff]  ;;  %2439 = vmatpush.msra.mxu0 %v3869_v25 }
 0x195   : > { %657 = vst.msk [vmem:[#allocation2 + $0x110] sm:$0xff] %vm619_vm1, %v5903_v1  ;;  %3696 = vmatmul.msk.f32.gmra.mxu1 %vm619_vm1, %v692_v44  ;;  %3800 = vmatmul.msk.f32.vlgmr.msrb.gmra.mxu2 %vm619_vm1, %v1525_v9 }
 0x196   : > { %3760 = vmatmul.msk.f32.gmra.mxu3 %vm619_vm1, %v692_v44 }
 0x198   : > { %v977_v55 = vpop.f32.mrf.mxu2  ;;  %v4837_v44 = vpop.f32.mrf.mxu0 }
 0x199   : > { %v1209_v14 = vpop.f32.mrf.mxu3 }
 0x19a   : > { %v4835_v12 = vadd.f32 %v1209_v14, %v966_v30  ;;  %v855_v9 = vpop.f32.mrf.mxu1  ;;  %1475 = vperm.xlu2 %4022, %v1329_v60   ;;  %v1527_v14 = vld [vmem:[#allocation2 + $0x18] sm:$0xff] }
 0x19b   : > { %3734 = vmatmul.msk.f32.gmra.mxu0 %vm619_vm1, %v4579_v54 }
 0x19c   : > { %v693_v1 = vld [vmem:[#allocation2 + $0x10f] sm:$0xff]  ;;  %v1055_v22 = vld [vmem:[#allocation2 + $0x117] sm:$0xff] }
 0x19d   : > { %3697 = vmatmul.msk.f32.gmra.mxu1 %vm619_vm1, %v693_v1  ;;  %3801 = vmatmul.msk.f32.gmra.mxu2 %vm619_vm1, %v1526_v49  ;;  %v972_v49 = vadd.f32 %v4786_v5, %v852_v2  ;;  %v975_v5 = vadd.f32 %v4809_v40, %v855_v9  ;;  %v1332_v40 = vld [vmem:[%s5875_s7 + $0xf8] sm:$0xff] }
 0x19e   : > { %3761 = vmatmul.msk.f32.gmra.mxu3 %vm619_vm1, %v693_v1  ;;  %v3868_v1 = vld [vmem:[%s5871_s3 + $0x50] sm:$0xff] }
 0x19f   : > { %2440 = vmatpush.msra.mxu0 %v3868_v1  ;;  %v1528_v1 = vld [vmem:[#allocation2 + $0x20] sm:$0xff] }
 0x1a0   : > { %v980_v20 = vpop.f32.mrf.mxu2  ;;  %v4858_v17 = vpop.f32.mrf.mxu0 }
 0x1a1   : > { %v1212_v54 = vpop.f32.mrf.mxu3 }
 0x1a2   : > { %v4851_v62 = vadd.f32 %v1212_v54, %v969_v52  ;;  %v858_v30 = vpop.f32.mrf.mxu1  ;;  %v1056_v54 = vld [vmem:[#allocation2 + $0x11f] sm:$0xff]  ;;  %3112 = vperm.xlu2 %4022, %v2962_v28  }
 0x1a3   : > { %3735 = vmatmul.msk.f32.gmra.mxu0 %vm619_vm1, %v4304_v3  ;;  %v978_v9 = vadd.f32 %v977_v55, %v858_v30 }
 0x1a5   : > { %3768 = vmatmul.msk.f32.vlgmr.msrb.gmra.mxu1 %vm619_vm1, %v587_v29  ;;  %3802 = vmatmul.msk.f32.gmra.mxu2 %vm619_vm1, %v1527_v14 }
 0x1a6   : > { %3762 = vmatmul.msk.f32.gmra.mxu3 %vm619_vm1, %v1055_v22  ;;  %v1030_v22 = vld [vmem:[#allocation2 + $0x4f] sm:$0xff] }
 0x1a8   : > { %v983_v60 = vpop.f32.mrf.mxu2  ;;  %v4878_v29 = vpop.f32.mrf.mxu0 }
 0x1a9   : > { %v1215_v52 = vpop.f32.mrf.mxu3 }
 0x1aa   : > { %v4866_v25 = vadd.f32 %v1215_v52, %v972_v49  ;;  %v861_v3 = vpop.f32.mrf.mxu1  ;;  %1490 = vperm.xlu2 %4022, %v1332_v40  }
 0x1ab   : > { %3736 = vmatmul.msk.f32.gmra.mxu0 %vm619_vm1, %v4324_v10  ;;  %v981_v55 = vadd.f32 %v980_v20, %v861_v3 }
 0x1ad   : > { %3769 = vmatmul.msk.f32.gmra.mxu1 %vm619_vm1, %v588_v33  ;;  %3803 = vmatmul.msk.f32.gmra.mxu2 %vm619_vm1, %v1528_v1  ;;  %v1529_v33 = vld [vmem:[#allocation2 + $0x28] sm:$0xff] }
 0x1ae   : > { %3763 = vmatmul.msk.f32.gmra.mxu3 %vm619_vm1, %v1056_v54 }
 0x1b0   : > { %v986_v10 = vpop.f32.mrf.mxu2  ;;  %v4892_v52 = vpop.f32.mrf.mxu0 }
 0x1b1   : > { %v1218_v2 = vpop.f32.mrf.mxu3 }
 0x1b2   : > { %v4881_v14 = vadd.f32 %v1218_v2, %v975_v5  ;;  %v864_v32 = vpop.f32.mrf.mxu1 }
 0x1b3   : > { %3737 = vmatmul.msk.f32.gmra.mxu0 %vm619_vm1, %v1030_v22 }
 0x1b5   : > { %3770 = vmatmul.msk.f32.gmra.mxu1 %vm619_vm1, %v589_v38  ;;  %3804 = vmatmul.msk.f32.gmra.mxu2 %vm619_vm1, %v1529_v33  ;;  %v1530_v38 = vld [vmem:[#allocation2 + $0x30] sm:$0xff] }
 0x1b6   : > { %3834 = vmatmul.msk.f32.vlgmr.msrb.gmra.mxu3 %vm619_vm1, %v1529_v33  ;;  %v4904_v33 = vld [vmem:[#allocation2 + $0x19] sm:$0xff] }
 0x1b8   : > { %v989_v49 = vpop.f32.mrf.mxu2  ;;  %v4906_v40 = vpop.f32.mrf.mxu0 }
 0x1b9   : > { %v1221_v54 = vpop.f32.mrf.mxu3 }
 0x1ba   : > { %v4894_v1 = vadd.f32 %v1221_v54, %v978_v9  ;;  %v867_v28 = vpop.f32.mrf.mxu1 }
 0x1bb   : > { %3738 = vmatmul.msk.f32.gmra.mxu0 %vm619_vm1, %v1031_v36  ;;  %v4917_v36 = vld [vmem:[#allocation2 + $0x21] sm:$0xff]  ;;  %v987_v46 = vadd.f32 %v986_v10, %v867_v28 }
 0x1bc   : > { %5927 = vst [vmem:[#allocation3_spill] sm:$0xff] %v4894_v1  ;;  %v5102_v1 = vld [vmem:[#allocation2 + $0x91] sm:$0xff] }
 0x1bd   : > { %3771 = vmatmul.msk.f32.gmra.mxu1 %vm619_vm1, %v590_v43  ;;  %3805 = vmatmul.msk.f32.gmra.mxu2 %vm619_vm1, %v1530_v38  ;;  %v984_v43 = vadd.f32 %v983_v60, %v864_v32  ;;  %5930 = vst [vmem:[#allocation6_spill] sm:$0xff] %v4917_v36 }
 0x1be   : > { %3835 = vmatmul.msk.f32.gmra.mxu3 %vm619_vm1, %v1530_v38  ;;  %v1532_v38 = vld [vmem:[#allocation2 + $0x40] sm:$0xff] }
 0x1c0   : > { %v992_v30 = vpop.f32.mrf.mxu2 }
 0x1c1   : > { %v1224_v5 = vpop.f32.mrf.mxu3 }
 0x1c2   : > { %v4902_v2 = vadd.f32 %v1224_v5, %v981_v55  ;;  %v870_v22 = vpop.f32.mrf.mxu1  ;;  %v4921_v55 = vpop.f32.mrf.mxu0 }
 0x1c3   : > { %3870 = vmatmul.msk.f32.vlgmr.msra.gmra.mxu0 %vm619_vm1, %v4904_v33  ;;  %v990_v10 = vadd.f32 %v989_v49, %v870_v22 }
 0x1c4   : > { %5928 = vst [vmem:[#allocation4_spill] sm:$0xff] %v4902_v2  ;;  %v1537_v2 = vld [vmem:[#allocation2 + $0x68] sm:$0xff] }
 0x1c5   : > { %3772 = vmatmul.msk.f32.gmra.mxu1 %vm619_vm1, %v591_v48  ;;  %3806 = vmatmul.msk.f32.gmra.mxu2 %vm619_vm1, %v1531_v42 }
 0x1c6   : > { %3836 = vmatmul.msk.f32.gmra.mxu3 %vm619_vm1, %v1531_v42  ;;  %v4930_v42 = vld [vmem:[#allocation2 + $0x29] sm:$0xff] }
 0x1c8   : > { %v995_v20 = vpop.f32.mrf.mxu2 }
 0x1c9   : > { %v1227_v3 = vpop.f32.mrf.mxu3 }
 0x1ca   : > { %v4915_v9 = vadd.f32 %v1227_v3, %v984_v43  ;;  %v873_v54 = vpop.f32.mrf.mxu1  ;;  %v1533_v43 = vld [vmem:[#allocation2 + $0x48] sm:$0xff] }
 0x1cb   : > { %3871 = vmatmul.msk.f32.gmra.mxu0 %vm619_vm1, %v4917_v36  ;;  %v993_v49 = vadd.f32 %v992_v30, %v873_v54 }
 0x1cc   : > { %5929 = vst [vmem:[#allocation5_spill] sm:$0xff] %v4915_v9 }
 0x1cd   : > { %3773 = vmatmul.msk.f32.gmra.mxu1 %vm619_vm1, %v592_v58  ;;  %3807 = vmatmul.msk.f32.gmra.mxu2 %vm619_vm1, %v1532_v38  ;;  %v4939_v58 = vpop.f32.mrf.mxu0 }
 0x1ce   : > { %3837 = vmatmul.msk.f32.gmra.mxu3 %vm619_vm1, %v1532_v38 }
 0x1d0   : > { %v998_v48 = vpop.f32.mrf.mxu2 }
 0x1d1   : > { %v1230_v60 = vpop.f32.mrf.mxu3 }
 0x1d2   : > { %v4928_v32 = vadd.f32 %v1230_v60, %v987_v46  ;;  %v876_v5 = vpop.f32.mrf.mxu1  ;;  %v4943_v60 = vld [vmem:[#allocation2 + $0x31] sm:$0xff] }
 0x1d3   : > { %3872 = vmatmul.msk.f32.gmra.mxu0 %vm619_vm1, %v4930_v42  ;;  %v996_v30 = vadd.f32 %v995_v20, %v876_v5 }
 0x1d4   : > { %5931 = vst [vmem:[#allocation7_spill] sm:$0xff] %v4928_v32  ;;  %v4956_v32 = vld [vmem:[#allocation2 + $0x39] sm:$0xff] }
 0x1d5   : > { %3774 = vmatmul.msk.f32.gmra.mxu1 %vm619_vm1, %v5932_v57  ;;  %3808 = vmatmul.msk.f32.gmra.mxu2 %vm619_vm1, %v1533_v43  ;;  %v5934_v57 = vmax.f32 %v4320_v8, 0.0  ;;  %v1535_v8 = vld [vmem:[#allocation2 + $0x58] sm:$0xff] }
 0x1d6   : > { %3838 = vmatmul.msk.f32.gmra.mxu3 %vm619_vm1, %v1533_v43  ;;  %v4952_v43 = vpop.f32.mrf.mxu0 }
 0x1d8   : > { %v1001_v28 = vpop.f32.mrf.mxu2 }
 0x1d9   : > { %v1233_v3 = vpop.f32.mrf.mxu3 }
 0x1da   : > { %v4941_v38 = vadd.f32 %v1233_v3, %v990_v10  ;;  %v879_v46 = vpop.f32.mrf.mxu1 }
 0x1db   : > { %3873 = vmatmul.msk.f32.gmra.mxu0 %vm619_vm1, %v4943_v60  ;;  %v999_v20 = vadd.f32 %v998_v48, %v879_v46 }
 0x1dc   : > { %5933 = vst [vmem:[#allocation8_spill] sm:$0xff] %v4941_v38 }
 0x1dd   : > { %3775 = vmatmul.msk.f32.gmra.mxu1 %vm619_vm1, %v5934_v57  ;;  %3809 = vmatmul.msk.f32.gmra.mxu2 %vm619_vm1, %v1534_v63  ;;  %v5936_v57 = vmax.f32 %v4342_v16, 0.0  ;;  %v1536_v16 = vld [vmem:[#allocation2 + $0x60] sm:$0xff] }
 0x1de   : > { %3839 = vmatmul.msk.f32.gmra.mxu3 %vm619_vm1, %v1534_v63  ;;  %v4969_v9 = vpop.f32.mrf.mxu0 }
 0x1e0   : > { %v1004_v22 = vpop.f32.mrf.mxu2 }
 0x1e1   : > { %v1236_v10 = vpop.f32.mrf.mxu3 }
 0x1e2   : > { %v4954_v3 = vadd.f32 %v1236_v10, %v993_v49  ;;  %v882_v38 = vpop.f32.mrf.mxu1 }
 0x1e3   : > { %3874 = vmatmul.msk.f32.gmra.mxu0 %vm619_vm1, %v4956_v32  ;;  %v1002_v48 = vadd.f32 %v1001_v28, %v882_v38 }
 0x1e4   : > { %5935 = vst [vmem:[#allocation9_spill] sm:$0xff] %v4954_v3  ;;  %v4967_v3 = vld [vmem:[#allocation2 + $0x41] sm:$0xff] }
 0x1e5   : > { %3776 = vmatmul.msk.f32.gmra.mxu1 %vm619_vm1, %v5936_v57  ;;  %3810 = vmatmul.msk.f32.gmra.mxu2 %vm619_vm1, %v1535_v8  ;;  %v5938_v57 = vmax.f32 %v4362_v24, 0.0  ;;  %v5940_v24 = vmax.f32 %v4382_v39, 0.0  ;;  %v5943_v39 = vmax.f32 %v4400_v50, 0.0  ;;  %v3934_v50 = vld [vmem:[%s5871_s3 + $0x80] sm:$0xff] }
 0x1e6   : > { %3840 = vmatmul.msk.f32.gmra.mxu3 %vm619_vm1, %v1535_v8  ;;  %v4984_v36 = vpop.f32.mrf.mxu0  ;;  %2803 = vmatpush.msra.mxu2 %v3934_v50 }
 0x1e8   : > { %v1007_v54 = vpop.f32.mrf.mxu2 }
 0x1e9   : > { %v1239_v63 = vpop.f32.mrf.mxu3 }
 0x1ea   : > { %v4965_v49 = vadd.f32 %v1239_v63, %v996_v30  ;;  %v885_v10 = vpop.f32.mrf.mxu1 }
 0x1eb   : > { %3875 = vmatmul.msk.f32.gmra.mxu0 %vm619_vm1, %v4967_v3  ;;  %v1005_v28 = vadd.f32 %v1004_v22, %v885_v10  ;;  %v3866_v22 = vld [vmem:[%s5871_s3 + $0x20] sm:$0xff] }
 0x1ec   : > { %5937 = vst [vmem:[#allocation10_spill] sm:$0xff] %v4965_v49  ;;  %v4980_v49 = vld [vmem:[#allocation2 + $0x49] sm:$0xff]  ;;  %2559 = vmatpush.msra.mxu1 %v3866_v22 }
 0x1ed   : > { %3777 = vmatmul.msk.f32.gmra.mxu1 %vm619_vm1, %v5938_v57  ;;  %3811 = vmatmul.msk.f32.gmra.mxu2 %vm619_vm1, %v1536_v16 }
 0x1ee   : > { %3841 = vmatmul.msk.f32.gmra.mxu3 %vm619_vm1, %v1536_v16 }
 0x1f0   : > { %v1010_v5 = vpop.f32.mrf.mxu2 }
 0x1f1   : > { %v1242_v8 = vpop.f32.mrf.mxu3 }
 0x1f2   : > { %v4978_v30 = vadd.f32 %v1242_v8, %v999_v20  ;;  %v888_v63 = vpop.f32.mrf.mxu1  ;;  %v4993_v8 = vld [vmem:[#allocation2 + $0x51] sm:$0xff] }
 0x1f3   : > { %3876 = vmatmul.msk.f32.gmra.mxu0 %vm619_vm1, %v4980_v49  ;;  %5942 = vst [vmem:[#allocation13_spill] sm:$0xff] %v4993_v8  ;;  %v1008_v10 = vadd.f32 %v1007_v54, %v888_v63  ;;  %v3258_v54 = vld [vmem:[%s5873_s5 + $0x8] sm:$0xff] }
 0x1f4   : > { %5939 = vst [vmem:[#allocation11_spill] sm:$0xff] %v4978_v30  ;;  %v1538_v30 = vld [vmem:[#allocation2 + $0x70] sm:$0xff]  ;;  %3373 = vmatpush.msra.mxu3 %v3258_v54 }
 0x1f5   : > { %3778 = vmatmul.msk.f32.gmra.mxu1 %vm619_vm1, %v5940_v24  ;;  %3812 = vmatmul.msk.f32.gmra.mxu2 %vm619_vm1, %v1537_v2 }
 0x1f6   : > { %3842 = vmatmul.msk.f32.gmra.mxu3 %vm619_vm1, %v1537_v2  ;;  %v5002_v2 = vpop.f32.mrf.mxu0 }
 0x1f8   : > { %v1013_v46 = vpop.f32.mrf.mxu2 }
 0x1f9   : > { %v1245_v16 = vpop.f32.mrf.mxu3 }
 0x1fa   : > { %v4991_v57 = vadd.f32 %v1245_v16, %v1002_v48  ;;  %v891_v20 = vpop.f32.mrf.mxu1 }
 0x1fb   : > { %3877 = vmatmul.msk.f32.gmra.mxu0 %vm619_vm1, %v4993_v8  ;;  %v1011_v63 = vadd.f32 %v1010_v5, %v891_v20 }
 0x1fc   : > { %5941 = vst [vmem:[#allocation12_spill] sm:$0xff] %v4991_v57  ;;  %v5006_v57 = vld [vmem:[#allocation2 + $0x59] sm:$0xff] }
 0x1fd   : > { %3779 = vmatmul.msk.f32.gmra.mxu1 %vm619_vm1, %v5943_v39  ;;  %3813 = vmatmul.msk.f32.gmra.mxu2 %vm619_vm1, %v1538_v30  ;;  %5945 = vst [vmem:[#allocation15_spill] sm:$0xff] %v5006_v57  ;;  %v1539_v39 = vld [vmem:[#allocation2 + $0x78] sm:$0xff] }
 0x1fe   : > { %3843 = vmatmul.msk.f32.gmra.mxu3 %vm619_vm1, %v1538_v30  ;;  %v5946_v30 = vmax.f32 %v4418_v59, 0.0  ;;  %v5025_v59 = vld [vmem:[#allocation2 + $0x61] sm:$0xff] }
 0x1ff   : > { %5948 = vst [vmem:[#allocation17_spill] sm:$0xff] %v5025_v59 }
 0x200   : > { %v1016_v38 = vpop.f32.mrf.mxu2 }
 0x201   : > { %v1248_v24 = vpop.f32.mrf.mxu3 }
 0x202   : > { %v5004_v48 = vadd.f32 %v1248_v24, %v1005_v28  ;;  %v894_v16 = vpop.f32.mrf.mxu1  ;;  %v5021_v24 = vpop.f32.mrf.mxu0 }
 0x203   : > { %3878 = vmatmul.msk.f32.gmra.mxu0 %vm619_vm1, %v5006_v57  ;;  %v1014_v5 = vadd.f32 %v1013_v46, %v894_v16 }
 0x204   : > { %5944 = vst [vmem:[#allocation14_spill] sm:$0xff] %v5004_v48 }
 0x205   : > { %3780 = vmatmul.msk.f32.gmra.mxu1 %vm619_vm1, %v5946_v30  ;;  %3814 = vmatmul.msk.f32.gmra.mxu2 %vm619_vm1, %v1539_v39  ;;  %v1540_v30 = vld [vmem:[#allocation2 + $0x80] sm:$0xff] }
 0x206   : > { %3844 = vmatmul.msk.f32.gmra.mxu3 %vm619_vm1, %v1539_v39  ;;  %v5949_v39 = vmax.f32 %v4436_v7, 0.0 }
 0x208   : > { %v1019_v28 = vpop.f32.mrf.mxu2 }
 0x209   : > { %v1251_v48 = vpop.f32.mrf.mxu3 }
 0x20a   : > { %v5023_v57 = vadd.f32 %v1251_v48, %v1008_v10  ;;  %v897_v50 = vpop.f32.mrf.mxu1  ;;  %v5041_v7 = vpop.f32.mrf.mxu0 }
 0x20b   : > { %3879 = vmatmul.msk.f32.gmra.mxu0 %vm619_vm1, %v5025_v59  ;;  %v5039_v59 = vld [vmem:[#allocation2 + $0x69] sm:$0xff]  ;;  %v1017_v46 = vadd.f32 %v1016_v38, %v897_v50 }
 0x20c   : > { %5947 = vst [vmem:[#allocation16_spill] sm:$0xff] %v5023_v57 }
 0x20d   : > { %3781 = vmatmul.msk.f32.gmra.mxu1 %vm619_vm1, %v5949_v39  ;;  %3815 = vmatmul.msk.f32.gmra.mxu2 %vm619_vm1, %v1540_v30  ;;  %5951 = vst [vmem:[#allocation19_spill] sm:$0xff] %v5039_v59  ;;  %v1541_v39 = vld [vmem:[#allocation2 + $0x88] sm:$0xff] }
 0x20e   : > { %3845 = vmatmul.msk.f32.gmra.mxu3 %vm619_vm1, %v1540_v30  ;;  %v5952_v30 = vmax.f32 %v4454_v19, 0.0  ;;  %v5955_v19 = vmax.f32 %v4472_v31, 0.0  ;;  %v5958_v31 = vmax.f32 %v4489_v45, 0.0  ;;  %v5961_v45 = vmax.f32 %v4514_v56, 0.0 }
 0x20f   : > { %v930_v56 = vadd.f32 %v4952_v43, %v4837_v44 }
 0x210   : > { %v1022_v48 = vpop.f32.mrf.mxu2 }
 0x211   : > { %v1254_v22 = vpop.f32.mrf.mxu3 }
 0x212   : > { %v5037_v10 = vadd.f32 %v1254_v22, %v1011_v63  ;;  %v900_v57 = vpop.f32.mrf.mxu1  ;;  %v5056_v8 = vpop.f32.mrf.mxu0 }
 0x213   : > { %3880 = vmatmul.msk.f32.gmra.mxu0 %vm619_vm1, %v5039_v59  ;;  %v1542_v59 = vld [vmem:[#allocation2 + $0x90] sm:$0xff]  ;;  %v1020_v50 = vadd.f32 %v1019_v28, %v900_v57 }
 0x214   : > { %5950 = vst [vmem:[#allocation18_spill] sm:$0xff] %v5037_v10  ;;  %v5052_v10 = vld [vmem:[#allocation2 + $0x71] sm:$0xff] }
 0x215   : > { %3782 = vmatmul.msk.f32.gmra.mxu1 %vm619_vm1, %v5952_v30  ;;  %3816 = vmatmul.msk.f32.gmra.mxu2 %vm619_vm1, %v1541_v39  ;;  %5954 = vst [vmem:[#allocation21_spill] sm:$0xff] %v5052_v10 }
 0x216   : > { %3846 = vmatmul.msk.f32.gmra.mxu3 %vm619_vm1, %v1541_v39 }
 0x218   : > { %v1885_v20 = vpop.f32.mrf.mxu2 }
 0x219   : > { %v1257_v54 = vpop.f32.mrf.mxu3 }
 0x21a   : > { %v5050_v63 = vadd.f32 %v1257_v54, %v1014_v5  ;;  %v903_v22 = vpop.f32.mrf.mxu1  ;;  %v5065_v54 = vld [vmem:[#allocation2 + $0x79] sm:$0xff]  ;;  %v1173_v38 = vpop.f32.mrf.mxu0 }
 0x21b   : > { %3881 = vmatmul.msk.f32.gmra.mxu0 %vm619_vm1, %v5052_v10  ;;  %5957 = vst [vmem:[#allocation23_spill] sm:$0xff] %v5065_v54  ;;  %v1023_v57 = vadd.f32 %v1022_v48, %v903_v22  ;;  %v1269_v48 = vadd.f32 %v1173_v38, %v930_v56 }
 0x21c   : > { %5953 = vst [vmem:[#allocation20_spill] sm:$0xff] %v5050_v63  ;;  %v1543_v63 = vld [vmem:[#allocation2 + $0x98] sm:$0xff] }
 0x21d   : > { %3783 = vmatmul.msk.f32.gmra.mxu1 %vm619_vm1, %v5955_v19  ;;  %3817 = vmatmul.msk.f32.gmra.mxu2 %vm619_vm1, %v1542_v59 }
 0x21e   : > { %3847 = vmatmul.msk.f32.gmra.mxu3 %vm619_vm1, %v1542_v59 }
 0x220   : > { %v1888_v16 = vpop.f32.mrf.mxu2 }
 0x221   : > { %v1260_v39 = vpop.f32.mrf.mxu3 }
 0x222   : > { %v5063_v30 = vadd.f32 %v1260_v39, %v1017_v46  ;;  %v1676_v5 = vpop.f32.mrf.mxu1 }
 0x223   : > { %3882 = vmatmul.msk.f32.gmra.mxu0 %vm619_vm1, %v5065_v54  ;;  %v1544_v54 = vld [vmem:[#allocation2 + $0xa0] sm:$0xff]  ;;  %v1886_v22 = vadd.f32 %v1885_v20, %v1676_v5  ;;  %v5965_v20 = vmax.f32 %v4557_v27, 0.0  ;;  %v1346_v27 = vpop.permute.xlu2 %1345 }
 0x224   : > { %5956 = vst [vmem:[#allocation22_spill] sm:$0xff] %v5063_v30  ;;  %v5076_v30 = vld [vmem:[#allocation2 + $0x81] sm:$0xff] }
 0x225   : > { %3784 = vmatmul.msk.f32.gmra.mxu1 %vm619_vm1, %v5958_v31  ;;  %3818 = vmatmul.msk.f32.gmra.mxu2 %vm619_vm1, %v1543_v63  ;;  %5960 = vst [vmem:[#allocation25_spill] sm:$0xff] %v5076_v30 }
 0x226   : > { %3848 = vmatmul.msk.f32.gmra.mxu3 %vm619_vm1, %v1543_v63  ;;  %v1176_v63 = vpop.f32.mrf.mxu0 }
 0x228   : > { %v1891_v59 = vpop.f32.mrf.mxu2 }
 0x229   : > { %v1263_v19 = vpop.f32.mrf.mxu3 }
 0x22a   : > { %v5074_v46 = vadd.f32 %v1263_v19, %v1020_v50  ;;  %v1679_v39 = vpop.f32.mrf.mxu1 }
 0x22b   : > { %3883 = vmatmul.msk.f32.gmra.mxu0 %vm619_vm1, %v5076_v30  ;;  %v5964_v30 = vmax.f32 %v4537_v13, 0.0  ;;  %v933_v13 = vadd.f32 %v4969_v9, %v4858_v17  ;;  %v1889_v38 = vadd.f32 %v1888_v16, %v1679_v39  ;;  %v5117_v9 = vld [vmem:[#allocation2 + $0x99] sm:$0xff]  ;;  %v5966_v39 = vmax.f32 %v4577_v53, 0.0 }
 0x22c   : > { %5959 = vst [vmem:[#allocation24_spill] sm:$0xff] %v5074_v46  ;;  %v5089_v46 = vld [vmem:[#allocation2 + $0x89] sm:$0xff]  ;;  %v939_v53 = vadd.f32 %v5002_v2, %v4892_v52 }
 0x22d   : > { %3785 = vmatmul.msk.f32.gmra.mxu1 %vm619_vm1, %v5961_v45  ;;  %3819 = vmatmul.msk.f32.gmra.mxu2 %vm619_vm1, %v1544_v54  ;;  %5963 = vst [vmem:[#allocation27_spill] sm:$0xff] %v5089_v46  ;;  %v1545_v45 = vld [vmem:[#allocation2 + $0xa8] sm:$0xff]  ;;  %v1270_v5 = vadd.f32 %v1176_v63, %v933_v13 }
 0x22e   : > { %3849 = vmatmul.msk.f32.gmra.mxu3 %vm619_vm1, %v1544_v54  ;;  %v1179_v44 = vpop.f32.mrf.mxu0 }
 0x230   : > { %v5085_v28 = vpop.f32.mrf.mxu2 }
 0x231   : > { %v1266_v31 = vpop.f32.mrf.mxu3 }
 0x232   : > { %v5087_v50 = vadd.f32 %v1266_v31, %v1023_v57  ;;  %v1682_v19 = vpop.f32.mrf.mxu1  ;;  %v1336_v57 = vpop.permute.xlu0 %1335 }
 0x233   : > { %3884 = vmatmul.msk.f32.gmra.mxu0 %vm619_vm1, %v5089_v46 }
 0x234   : > { %5962 = vst [vmem:[#allocation26_spill] sm:$0xff] %v5087_v50  ;;  %v1493_v50 = vmul.f32 %v1336_v57, %v1269_v48 }
 0x235   : > { %3786 = vmatmul.msk.f32.gmra.mxu1 %vm619_vm1, %v5964_v30  ;;  %3820 = vmatmul.msk.f32.gmra.mxu2 %vm619_vm1, %v1545_v45  ;;  %v1546_v30 = vld [vmem:[#allocation2 + $0xb0] sm:$0xff] }
 0x236   : > { %3850 = vmatmul.msk.f32.gmra.mxu3 %vm619_vm1, %v1545_v45  ;;  %v1341_v45 = vpop.permute.xlu1 %1340  ;;  %v1182_v16 = vpop.f32.mrf.mxu0 }
 0x238   : > { %v5100_v54 = vpop.f32.mrf.mxu2 }
 0x239   : > { %v2129_v31 = vpop.f32.mrf.mxu3 }
 0x23a   : > { %v2225_v46 = vadd.f32 %v2129_v31, %v1886_v22  ;;  %v1685_v10 = vpop.f32.mrf.mxu1  ;;  %v1494_v22 = vmul.f32 %v1341_v45, %v1270_v5  ;;  %v5130_v13 = vpop.permute.xlu0 %2967  ;;  %v5134_v45 = vld [vmem:[#allocation2 + $0xa1] sm:$0xff] }
 0x23b   : > { %3885 = vmatmul.msk.f32.gmra.mxu0 %vm619_vm1, %v5102_v1 }
 0x23c   : > { %v5108_v43 = vadd.f32 %v2225_v46, %v1493_v50  ;;  %v936_v46 = vadd.f32 %v4984_v36, %v4878_v29  ;;  %v1547_v50 = vld [vmem:[#allocation2 + $0xb8] sm:$0xff] }
 0x23d   : > { %3787 = vmatmul.msk.f32.gmra.mxu1 %vm619_vm1, %v5965_v20  ;;  %3821 = vmatmul.msk.f32.gmra.mxu2 %vm619_vm1, %v1546_v30 }
 0x23e   : > { %3851 = vmatmul.msk.f32.gmra.mxu3 %vm619_vm1, %v1546_v30  ;;  %v1271_v31 = vadd.f32 %v1179_v44, %v936_v46  ;;  %v1892_v30 = vadd.f32 %v1891_v59, %v1682_v19  ;;  %v5967_v59 = vmax.f32 %v4597_v6, 0.0  ;;  %v5148_v19 = vpop.permute.xlu2 %2977  ;;  %v1895_v46 = vadd.f32 %v5085_v28, %v1685_v10  ;;  %v5154_v6 = vld [vmem:[#allocation2 + $0xa9] sm:$0xff] }
 0x23f   : > { %v5968_v10 = vmax.f32 %v4618_v41, 0.0  ;;  %v5172_v41 = vld [vmem:[#allocation2 + $0xb1] sm:$0xff] }
 0x240   : > { %v5115_v56 = vpop.f32.mrf.mxu2  ;;  %v1495_v29 = vmul.f32 %v1346_v27, %v1271_v31  ;;  %v1185_v27 = vpop.f32.mrf.mxu0 }
 0x241   : > { %v2132_v48 = vpop.f32.mrf.mxu3 }
 0x242   : > { %v2226_v57 = vadd.f32 %v2132_v48, %v1889_v38  ;;  %v1688_v17 = vpop.f32.mrf.mxu1  ;;  %v1548_v48 = vld [vmem:[#allocation2 + $0xc0] sm:$0xff]  ;;  %v1351_v2 = vpop.permute.xlu0 %1350 }
 0x243   : > { %3886 = vmatmul.msk.f32.gmra.mxu0 %vm619_vm1, %v5117_v9 }
 0x244   : > { %v5123_v63 = vadd.f32 %v2226_v57, %v1494_v22  ;;  %v5142_v22 = vpop.permute.xlu1 %2972  ;;  %v1272_v57 = vadd.f32 %v1182_v16, %v939_v53  ;;  %v942_v16 = vadd.f32 %v5021_v24, %v4906_v40 }
 0x245   : > { %3788 = vmatmul.msk.f32.gmra.mxu1 %vm619_vm1, %v5966_v39  ;;  %3822 = vmatmul.msk.f32.gmra.mxu2 %vm619_vm1, %v1547_v50 }
 0x246   : > { %3852 = vmatmul.msk.f32.gmra.mxu3 %vm619_vm1, %v1547_v50  ;;  %v1496_v39 = vmul.f32 %v1351_v2, %v1272_v57  ;;  %v1273_v28 = vadd.f32 %v1185_v27, %v942_v16  ;;  %v1356_v53 = vpop.permute.xlu2 %1355  ;;  %v945_v27 = vadd.f32 %v5041_v7, %v4921_v55 }
 0x248   : > { %v5132_v20 = vpop.f32.mrf.mxu2  ;;  %v1188_v40 = vpop.f32.mrf.mxu0  ;;  %v1497_v57 = vmul.f32 %v1356_v53, %v1273_v28 }
 0x249   : > { %v2135_v5 = vpop.f32.mrf.mxu3 }
 0x24a   : > { %v2227_v36 = vadd.f32 %v2135_v5, %v1892_v30  ;;  %v1691_v38 = vpop.f32.mrf.mxu1 }
 0x24b   : > { %3887 = vmatmul.msk.f32.gmra.mxu0 %vm619_vm1, %v5134_v45  ;;  %v1901_v16 = vadd.f32 %v5115_v56, %v1691_v38  ;;  %v5970_v38 = vmax.f32 %v4655_v18, 0.0 }
 0x24c   : > { %v5140_v44 = vadd.f32 %v2227_v36, %v1495_v29  ;;  %v1549_v29 = vld [vmem:[#allocation2 + $0xc8] sm:$0xff]  ;;  %v5167_v36 = vpop.permute.xlu1 %2982 }
 0x24d   : > { %3789 = vmatmul.msk.f32.gmra.mxu1 %vm619_vm1, %v5967_v59  ;;  %3823 = vmatmul.msk.f32.gmra.mxu2 %vm619_vm1, %v1548_v48 }
 0x24e   : > { %3853 = vmatmul.msk.f32.gmra.mxu3 %vm619_vm1, %v1548_v48  ;;  %v1898_v48 = vadd.f32 %v5100_v54, %v1688_v17  ;;  %v5969_v54 = vmax.f32 %v4636_v21, 0.0  ;;  %v1274_v17 = vadd.f32 %v1188_v40, %v945_v27  ;;  %v948_v40 = vadd.f32 %v5056_v8, %v4939_v58  ;;  %v5198_v56 = vpop.permute.xlu2 %2992 }
 0x250   : > { %v5152_v52 = vpop.f32.mrf.mxu2  ;;  %v1191_v21 = vpop.f32.mrf.mxu0 }
 0x251   : > { %v2138_v50 = vpop.f32.mrf.mxu3 }
 0x252   : > { %v2228_v31 = vadd.f32 %v2138_v50, %v1895_v46  ;;  %v1694_v30 = vpop.f32.mrf.mxu1 }
 0x253   : > { %3888 = vmatmul.msk.f32.gmra.mxu0 %vm619_vm1, %v5154_v6  ;;  %v1904_v27 = vadd.f32 %v5132_v20, %v1694_v30 }
 0x254   : > { %v5160_v5 = vadd.f32 %v2228_v31, %v1496_v39  ;;  %v1550_v39 = vld [vmem:[#allocation2 + $0xd0] sm:$0xff]  ;;  %v5185_v31 = vpop.permute.xlu0 %2987 }
 0x255   : > { %3790 = vmatmul.msk.f32.gmra.mxu1 %vm619_vm1, %v5968_v10  ;;  %3824 = vmatmul.msk.f32.gmra.mxu2 %vm619_vm1, %v1549_v29  ;;  %v1361_v10 = vpop.permute.xlu1 %1360 }
 0x256   : > { %3854 = vmatmul.msk.f32.gmra.mxu3 %vm619_vm1, %v1549_v29  ;;  %v1498_v7 = vmul.f32 %v1361_v10, %v1274_v17  ;;  %v5206_v10 = vld [vmem:[#allocation2 + $0xc1] sm:$0xff]  ;;  %v1371_v20 = vpop.permute.xlu2 %1370 }
 0x258   : > { %v5170_v59 = vpop.f32.mrf.mxu2 }
 0x259   : > { %v2141_v24 = vpop.f32.mrf.mxu3 }
 0x25a   : > { %v2229_v46 = vadd.f32 %v2141_v24, %v1898_v48  ;;  %v1697_v2 = vpop.f32.mrf.mxu1  ;;  %v5190_v48 = vld [vmem:[#allocation2 + $0xb9] sm:$0xff] }
 0x25b   : > { %3889 = vmatmul.msk.f32.gmra.mxu0 %vm619_vm1, %v5172_v41  ;;  %v1907_v30 = vadd.f32 %v5152_v52, %v1697_v2  ;;  %v5974_v52 = vmax.f32 %v4694_v0, 0.0 }
 0x25c   : > { %v5178_v50 = vadd.f32 %v2229_v46, %v1497_v57  ;;  %v1551_v57 = vld [vmem:[#allocation2 + $0xd8] sm:$0xff]  ;;  %v1275_v46 = vadd.f32 %v1191_v21, %v948_v40 }
 0x25d   : > { %3791 = vmatmul.msk.f32.gmra.mxu1 %vm619_vm1, %v5969_v54  ;;  %3825 = vmatmul.msk.f32.gmra.mxu2 %vm619_vm1, %v1550_v39  ;;  %v1366_v54 = vpop.permute.xlu0 %1365 }
 0x25e   : > { %3855 = vmatmul.msk.f32.gmra.mxu3 %vm619_vm1, %v1550_v39  ;;  %v1499_v58 = vmul.f32 %v1366_v54, %v1275_v46  ;;  %v1553_v54 = vld [vmem:[#allocation2 + $0xe8] sm:$0xff] }
 0x260   : > { %v5188_v29 = vpop.f32.mrf.mxu2 }
 0x261   : > { %v2144_v55 = vpop.f32.mrf.mxu3 }
 0x262   : > { %v2230_v28 = vadd.f32 %v2144_v55, %v1901_v16  ;;  %v1700_v53 = vpop.f32.mrf.mxu1  ;;  %v1552_v55 = vld [vmem:[#allocation2 + $0xe0] sm:$0xff] }
 0x263   : > { %3890 = vmatmul.msk.f32.gmra.mxu0 %vm619_vm1, %v5190_v48  ;;  %v1910_v2 = vadd.f32 %v5170_v59, %v1700_v53 }
 0x264   : > { %v5196_v24 = vadd.f32 %v2230_v28, %v1498_v7  ;;  %v5212_v7 = vpop.permute.xlu1 %2997  ;;  %v5971_v28 = vmax.f32 %v4674_v23, 0.0 }
 0x265   : > { %3792 = vmatmul.msk.f32.gmra.mxu1 %vm619_vm1, %v5970_v38  ;;  %3826 = vmatmul.msk.f32.gmra.mxu2 %vm619_vm1, %v1551_v57 }
 0x266   : > { %3856 = vmatmul.msk.f32.gmra.mxu3 %vm619_vm1, %v1551_v57  ;;  %v1500_v57 = vmul.f32 %v1371_v20, %v4716_v34 }
 0x268   : > { %v1915_v39 = vpop.f32.mrf.mxu2 }
 0x269   : > { %v2147_v17 = vpop.f32.mrf.mxu3 }
 0x26a   : > { %v2231_v8 = vadd.f32 %v2147_v17, %v1904_v27  ;;  %v1703_v16 = vpop.f32.mrf.mxu1  ;;  %v5223_v27 = vld [vmem:[#allocation2 + $0xc9] sm:$0xff]  ;;  %v5229_v17 = vpop.permute.xlu0 %3002 }
 0x26b   : > { %3891 = vmatmul.msk.f32.gmra.mxu0 %vm619_vm1, %v5206_v10  ;;  %5973 = vst [vmem:[#allocation29_spill] sm:$0xff] %v5229_v17  ;;  %v1913_v53 = vadd.f32 %v5188_v29, %v1703_v16 }
 0x26c   : > { %v5210_v18 = vadd.f32 %v2231_v8, %v1499_v58  ;;  %v5231_v58 = vpop.f32.mrf.mxu0  ;;  %v1376_v34 = vpop.permute.xlu1 %1375 }
 0x26d   : > { %3793 = vmatmul.msk.f32.gmra.mxu1 %vm619_vm1, %v5971_v28  ;;  %3827 = vmatmul.msk.f32.gmra.mxu2 %vm619_vm1, %v1552_v55  ;;  %v1501_v28 = vmul.f32 %v1376_v34, %v4739_v11 }
 0x26e   : > { %3857 = vmatmul.msk.f32.gmra.mxu3 %vm619_vm1, %v1552_v55 }
 0x270   : > { %v5220_v21 = vpop.f32.mrf.mxu2 }
 0x271   : > { %v2150_v40 = vpop.f32.mrf.mxu3 }
 0x272   : > { %v2232_v38 = vadd.f32 %v2150_v40, %v1907_v30  ;;  %v1706_v46 = vpop.f32.mrf.mxu1  ;;  %v5242_v40 = vld [vmem:[#allocation2 + $0xd1] sm:$0xff]  ;;  %v1381_v11 = vpop.permute.xlu0 %1380 }
 0x273   : > { %3892 = vmatmul.msk.f32.gmra.mxu0 %vm619_vm1, %v5223_v27  ;;  %v1916_v29 = vadd.f32 %v1915_v39, %v1706_v46  ;;  %v2964_v39 = vld [vmem:[%s5876_s8 + $0xf8] sm:$0xff] }
 0x274   : > { %v5227_v23 = vadd.f32 %v2232_v38, %v1500_v57  ;;  %v1554_v57 = vld [vmem:[#allocation2 + $0xf0] sm:$0xff]  ;;  %v5248_v38 = vpop.permute.xlu2 %3007  ;;  %v5255_v59 = vpop.f32.mrf.mxu0  ;;  %3122 = vperm.xlu0 %4020, %v2964_v39   ;;  %v5986_v39 = vmax.f32 %v4789_v47, 0.0 }
 0x275   : > { %3794 = vmatmul.msk.f32.gmra.mxu1 %vm619_vm1, %v5974_v52  ;;  %3828 = vmatmul.msk.f32.gmra.mxu2 %vm619_vm1, %v1553_v54  ;;  %5976 = vst [vmem:[#allocation31_spill] sm:$0xff] %v5248_v38  ;;  %v5386_v38 = vld [vmem:[#allocation2 + $0x111] sm:$0xff] }
 0x276   : > { %5972 = vst [vmem:[#allocation28_spill] sm:$0xff] %v5227_v23  ;;  %3858 = vmatmul.msk.f32.gmra.mxu3 %vm619_vm1, %v1553_v54  ;;  %v5977_v54 = vmax.f32 %v4714_v15, 0.0 }
 0x278   : > { %v5239_v8 = vpop.f32.mrf.mxu2 }
 0x279   : > { %v2153_v55 = vpop.f32.mrf.mxu3 }
 0x27a   : > { %v2233_v20 = vadd.f32 %v2153_v55, %v1910_v2  ;;  %v1709_v30 = vpop.f32.mrf.mxu1  ;;  %v1502_v2 = vmul.f32 %v1381_v11, %v4762_v51  ;;  %v5288_v46 = vpop.permute.xlu0 %3017 }
 0x27b   : > { %3893 = vmatmul.msk.f32.gmra.mxu0 %vm619_vm1, %v5242_v40  ;;  %5982 = vst [vmem:[#allocation35_spill] sm:$0xff] %v5288_v46 }
 0x27c   : > { %v5246_v0 = vadd.f32 %v2233_v20, %v1501_v28  ;;  %v5261_v20 = vld [vmem:[#allocation2 + $0xd9] sm:$0xff]  ;;  %v1386_v51 = vpop.permute.xlu2 %1385  ;;  %v5276_v11 = vpop.f32.mrf.mxu0 }
 0x27d   : > { %3795 = vmatmul.msk.f32.gmra.mxu1 %vm619_vm1, %v5977_v54  ;;  %3829 = vmatmul.msk.f32.gmra.mxu2 %vm619_vm1, %v1554_v57  ;;  %v5267_v54 = vpop.permute.xlu1 %3012 }
 0x27e   : > { %5975 = vst [vmem:[#allocation30_spill] sm:$0xff] %v5246_v0  ;;  %3859 = vmatmul.msk.f32.gmra.mxu3 %vm619_vm1, %v1554_v57  ;;  %v1555_v57 = vld [vmem:[#allocation2 + $0xf8] sm:$0xff]  ;;  %v5980_v0 = vmax.f32 %v4737_v61, 0.0 }
 0x27f   : > { %5979 = vst [vmem:[#allocation33_spill] sm:$0xff] %v5267_v54 }
 0x280   : > { %v5258_v52 = vpop.f32.mrf.mxu2 }
 0x281   : > { %v2156_v34 = vpop.f32.mrf.mxu3 }
 0x282   : > { %v2234_v55 = vadd.f32 %v2156_v34, %v1913_v53  ;;  %v1712_v28 = vpop.f32.mrf.mxu1  ;;  %v1503_v34 = vmul.f32 %v1386_v51, %v4791_v26  ;;  %v3257_v26 = vld [vmem:[%s5873_s5] sm:$0xff] }
 0x283   : > { %3894 = vmatmul.msk.f32.gmra.mxu0 %vm619_vm1, %v5261_v20  ;;  %3374 = vmatpush.msra.mxu3 %v3257_v26  ;;  %v1396_v26 = vpop.permute.xlu0 %1395 }
 0x284   : > { %v5265_v15 = vadd.f32 %v2234_v55, %v1502_v2  ;;  %v5304_v46 = vpop.f32.mrf.mxu0 }
 0x285   : > { %3796 = vmatmul.msk.f32.gmra.mxu1 %vm619_vm1, %v5980_v0  ;;  %3830 = vmatmul.msk.f32.gmra.mxu2 %vm619_vm1, %v1555_v57  ;;  %v1556_v0 = vld [vmem:[#allocation2 + $0x100] sm:$0xff]  ;;  %v1391_v51 = vpop.permute.xlu1 %1390 }
 0x286   : > { %5978 = vst [vmem:[#allocation32_spill] sm:$0xff] %v5265_v15  ;;  %3860 = vmatmul.msk.f32.gmra.mxu3 %vm619_vm1, %v1555_v57  ;;  %v5279_v15 = vld [vmem:[#allocation2 + $0xe1] sm:$0xff]  ;;  %v5983_v57 = vmax.f32 %v4760_v37, 0.0  ;;  %v1504_v37 = vmul.f32 %v1391_v51, %v4814_v35  ;;  %v1922_v51 = vadd.f32 %v5239_v8, %v1712_v28  ;;  %v2010_v8 = vld [vmem:[#allocation2 + $0x110] sm:$0xff] }
 0x287   : > { %v2009_v35 = vld [vmem:[#allocation2 + $0x108] sm:$0xff] }
 0x288   : > { %v5274_v16 = vpop.f32.mrf.mxu2 }
 0x289   : > { %v2159_v53 = vpop.f32.mrf.mxu3 }
 0x28a   : > { %v2235_v2 = vadd.f32 %v2159_v53, %v1916_v29  ;;  %v1715_v55 = vpop.f32.mrf.mxu1  ;;  %v1919_v29 = vadd.f32 %v5220_v21, %v1709_v30  ;;  %v2963_v21 = vld [vmem:[%s5876_s8 + $0xf0] sm:$0xff]  ;;  %v5313_v30 = vpop.permute.xlu2 %3022 }
 0x28b   : > { %3895 = vmatmul.msk.f32.gmra.mxu0 %vm619_vm1, %v5279_v15  ;;  %5985 = vst [vmem:[#allocation37_spill] sm:$0xff] %v5313_v30  ;;  %3117 = vperm.xlu1 %4021, %v2963_v21   ;;  %v5323_v30 = vld [vmem:[#allocation2 + $0xf1] sm:$0xff]  ;;  %v5989_v21 = vmax.f32 %v4812_v4, 0.0  ;;  %v1925_v28 = vadd.f32 %v5258_v52, %v1715_v55  ;;  %v2289_v4 = vld [vmem:[#allocation2 + $0x9] sm:$0xff]  ;;  %v5347_v54 = vpop.permute.xlu0 %3032 }
 0x28c   : > { %v5283_v61 = vadd.f32 %v2235_v2, %v1503_v34  ;;  %5992 = vst [vmem:[#allocation42_spill] sm:$0xff] %v5347_v54 }
 0x28d   : > { %3797 = vmatmul.msk.f32.gmra.mxu1 %vm619_vm1, %v5983_v57  ;;  %3831 = vmatmul.msk.f32.gmra.mxu2 %vm619_vm1, %v1556_v0 }
 0x28e   : > { %5981 = vst [vmem:[#allocation34_spill] sm:$0xff] %v5283_v61  ;;  %3861 = vmatmul.msk.f32.gmra.mxu3 %vm619_vm1, %v1556_v0  ;;  %v5302_v61 = vld [vmem:[#allocation2 + $0xe9] sm:$0xff] }
 0x290   : > { %v5299_v53 = vpop.f32.mrf.mxu2 }
 0x291   : > { %v2162_v34 = vpop.f32.mrf.mxu3 }
 0x292   : > { %v2236_v2 = vadd.f32 %v2162_v34, %v1919_v29  ;;  %v1718_v57 = vpop.f32.mrf.mxu1 }
 0x293   : > { %3896 = vmatmul.msk.f32.gmra.mxu0 %vm619_vm1, %v5302_v61  ;;  %v1928_v55 = vadd.f32 %v5274_v16, %v1718_v57 }
 0x294   : > { %v5308_v0 = vadd.f32 %v2236_v2, %v1504_v37  ;;  %v1505_v37 = vmul.f32 %v1396_v26, %v4835_v12  ;;  %v1401_v12 = vpop.permute.xlu2 %1400 }
 0x295   : > { %3798 = vmatmul.msk.f32.gmra.mxu1 %vm619_vm1, %v5986_v39  ;;  %3936 = vmatmul.msk.f32.vlgmr.msra.gmra.mxu2 %vm619_vm1, %v4930_v42  ;;  %v5329_v39 = vpop.permute.xlu1 %3027 }
 0x296   : > { %5984 = vst [vmem:[#allocation36_spill] sm:$0xff] %v5308_v0  ;;  %3862 = vmatmul.msk.f32.gmra.mxu3 %vm619_vm1, %v2009_v35  ;;  %v5331_v35 = vpop.f32.mrf.mxu0 }
 0x297   : > { %5988 = vst [vmem:[#allocation39_spill] sm:$0xff] %v5329_v39 }
 0x298   : > { %v1933_v29 = vpop.f32.mrf.mxu2 }
 0x299   : > { %v2165_v34 = vpop.f32.mrf.mxu3 }
 0x29a   : > { %v2237_v2 = vadd.f32 %v2165_v34, %v1922_v51  ;;  %v1721_v0 = vpop.f32.mrf.mxu1  ;;  %v1506_v34 = vmul.f32 %v1401_v12, %v4851_v62 }
 0x29b   : > { %3897 = vmatmul.msk.f32.gmra.mxu0 %vm619_vm1, %v5323_v30  ;;  %v1931_v16 = vadd.f32 %v5299_v53, %v1721_v0 }
 0x29c   : > { %v5327_v47 = vadd.f32 %v2237_v2, %v1505_v37  ;;  %v5363_v54 = vpop.permute.xlu2 %3037 }
 0x29d   : > { %3799 = vmatmul.msk.f32.gmra.mxu1 %vm619_vm1, %v5989_v21  ;;  %3937 = vmatmul.msk.f32.gmra.mxu2 %vm619_vm1, %v4943_v60  ;;  %v2011_v21 = vld [vmem:[#allocation2 + $0x118] sm:$0xff]  ;;  %v1406_v62 = vpop.permute.xlu1 %1405  ;;  %5995 = vst [vmem:[#allocation45_spill] sm:$0xff] %v5363_v54 }
 0x29e   : > { %5987 = vst [vmem:[#allocation38_spill] sm:$0xff] %v5327_v47  ;;  %3863 = vmatmul.msk.f32.gmra.mxu3 %vm619_vm1, %v2010_v8  ;;  %v5341_v47 = vld [vmem:[#allocation2 + $0xf9] sm:$0xff]  ;;  %v5353_v52 = vpop.f32.mrf.mxu0 }
 0x29f   : > { %5990 = vst [vmem:[#allocation40_spill] sm:$0xff] %v5341_v47 }
 0x2a0   : > { %v1936_v26 = vpop.f32.mrf.mxu2 }
 0x2a1   : > { %v2168_v51 = vpop.f32.mrf.mxu3 }
 0x2a2   : > { %v2238_v37 = vadd.f32 %v2168_v51, %v1925_v28  ;;  %v1724_v2 = vpop.f32.mrf.mxu1  ;;  %v1507_v28 = vmul.f32 %v1406_v62, %v4866_v25  ;;  %v1411_v25 = vpop.permute.xlu0 %1410 }
 0x2a3   : > { %3898 = vmatmul.msk.f32.gmra.mxu0 %vm619_vm1, %v5341_v47  ;;  %v1934_v0 = vadd.f32 %v1933_v29, %v1724_v2  ;;  %v6004_v29 = vld [vmem:[#allocation13_spill] sm:$0xff] }
 0x2a4   : > { %v5345_v39 = vadd.f32 %v2238_v37, %v1506_v34  ;;  %v5357_v37 = vld [vmem:[#allocation2 + $0x101] sm:$0xff]  ;;  %v1416_v53 = vpop.permute.xlu2 %1415 }
 0x2a5   : > { %3902 = vmatmul.msk.f32.vlgmr.msra.gmra.mxu1 %vm619_vm1, %v2289_v4  ;;  %3938 = vmatmul.msk.f32.gmra.mxu2 %vm619_vm1, %v4956_v32  ;;  %5993 = vst [vmem:[#allocation43_spill] sm:$0xff] %v5357_v37  ;;  %v2012_v4 = vld [vmem:[#allocation2 + $0x120] sm:$0xff]  ;;  %v5379_v54 = vpop.permute.xlu1 %3042 }
 0x2a6   : > { %5991 = vst [vmem:[#allocation41_spill] sm:$0xff] %v5345_v39  ;;  %3864 = vmatmul.msk.f32.gmra.mxu3 %vm619_vm1, %v2011_v21  ;;  %v2290_v21 = vld [vmem:[#allocation2 + $0x11] sm:$0xff]  ;;  %v5370_v62 = vpop.f32.mrf.mxu0 }
 0x2a7   : > { %5998 = vst [vmem:[#allocation48_spill] sm:$0xff] %v5379_v54 }
 0x2a8   : > { %v1939_v8 = vpop.f32.mrf.mxu2 }
 0x2a9   : > { %v2171_v12 = vpop.f32.mrf.mxu3 }
 0x2aa   : > { %v2239_v51 = vadd.f32 %v2171_v12, %v1928_v55  ;;  %v1727_v34 = vpop.f32.mrf.mxu1  ;;  %v1508_v12 = vmul.f32 %v1411_v25, %v4881_v14  ;;  %v5999_v25 = vld [vmem:[#allocation3_spill] sm:$0xff] }
 0x2ab   : > { %3899 = vmatmul.msk.f32.gmra.mxu0 %vm619_vm1, %v5357_v37  ;;  %6000 = vst [vmem:[#allocation3_spill] sm:$0xff] %v5386_v38 }
 0x2ac   : > { %v5361_v39 = vadd.f32 %v2239_v51, %v1507_v28 }
 0x2ad   : > { %3903 = vmatmul.msk.f32.gmra.mxu1 %vm619_vm1, %v2290_v21  ;;  %3939 = vmatmul.msk.f32.gmra.mxu2 %vm619_vm1, %v4967_v3  ;;  %v1421_v2 = vpop.permute.xlu1 %1420 }
 0x2ae   : > { %5994 = vst [vmem:[#allocation44_spill] sm:$0xff] %v5361_v39  ;;  %3865 = vmatmul.msk.f32.gmra.mxu3 %vm619_vm1, %v2012_v4  ;;  %v5373_v39 = vld [vmem:[#allocation2 + $0x109] sm:$0xff] }
 0x2af   : > { %5996 = vst [vmem:[#allocation46_spill] sm:$0xff] %v5373_v39 }
 0x2b0   : > { %v1942_v57 = vpop.f32.mrf.mxu2 }
 0x2b1   : > { %v2174_v55 = vpop.f32.mrf.mxu3 }
 0x2b2   : > { %v2240_v28 = vadd.f32 %v2174_v55, %v1931_v16  ;;  %v1730_v51 = vpop.f32.mrf.mxu1  ;;  %v1509_v16 = vmul.f32 %v1416_v53, %v5999_v25  ;;  %v1937_v53 = vadd.f32 %v1936_v26, %v1727_v34  ;;  %v6005_v25 = vld [vmem:[#allocation4_spill] sm:$0xff]  ;;  %v6009_v34 = vld [vmem:[#allocation5_spill] sm:$0xff] }
 0x2b3   : > { %3900 = vmatmul.msk.f32.gmra.mxu0 %vm619_vm1, %v5373_v39  ;;  %v1510_v54 = vmul.f32 %v1421_v2, %v6005_v25 }
 0x2b4   : > { %v5377_v21 = vadd.f32 %v2240_v28, %v1508_v12  ;;  %v5388_v12 = vpop.f32.mrf.mxu0 }
 0x2b5   : > { %3904 = vmatmul.msk.f32.gmra.mxu1 %vm619_vm1, %v4904_v33  ;;  %3940 = vmatmul.msk.f32.gmra.mxu2 %vm619_vm1, %v4980_v49  ;;  %v5394_v33 = vpop.permute.xlu0 %3047 }
 0x2b6   : > { %5997 = vst [vmem:[#allocation47_spill] sm:$0xff] %v5377_v21  ;;  %v6003_v21 = vld [vmem:[#allocation6_spill] sm:$0xff] }
 0x2b7   : > { %6002 = vst [vmem:[#allocation50_spill] sm:$0xff] %v5394_v33 }
 0x2b8   : > { %v1945_v14 = vpop.f32.mrf.mxu2 }
 0x2b9   : > { %v2177_v4 = vpop.f32.mrf.mxu3 }
 0x2ba   : > { %v2241_v55 = vadd.f32 %v2177_v4, %v1934_v0  ;;  %v1733_v37 = vpop.f32.mrf.mxu1 }
 0x2bb   : > { %3901 = vmatmul.msk.f32.gmra.mxu0 %vm619_vm1, %v5386_v38 }
 0x2bc   : > { %v5392_v28 = vadd.f32 %v2241_v55, %v1509_v16  ;;  %v5403_v16 = vpop.permute.xlu2 %3052  ;;  %v6008_v55 = vld [vmem:[#allocation15_spill] sm:$0xff] }
 0x2bd   : > { %3905 = vmatmul.msk.f32.gmra.mxu1 %vm619_vm1, %v6003_v21  ;;  %3941 = vmatmul.msk.f32.gmra.mxu2 %vm619_vm1, %v6004_v29  ;;  %6007 = vst [vmem:[#allocation13_spill] sm:$0xff] %v5403_v16  ;;  %v1426_v21 = vpop.permute.xlu0 %1425 }
 0x2be   : > { %6001 = vst [vmem:[#allocation49_spill] sm:$0xff] %v5392_v28  ;;  %v1940_v28 = vadd.f32 %v1939_v8, %v1730_v51  ;;  %v1511_v38 = vmul.f32 %v1426_v21, %v6009_v34  ;;  %v6013_v51 = vld [vmem:[#allocation7_spill] sm:$0xff] }
 0x2c0   : > { %v1948_v0 = vpop.f32.mrf.mxu2 }
 0x2c1   : > { %v2180_v4 = vpop.f32.mrf.mxu3 }
 0x2c2   : > { %v2242_v39 = vadd.f32 %v2180_v4, %v1937_v53  ;;  %v1736_v47 = vpop.f32.mrf.mxu1  ;;  %v1943_v4 = vadd.f32 %v1942_v57, %v1733_v37  ;;  %v6017_v57 = vld [vmem:[#allocation8_spill] sm:$0xff] }
 0x2c4   : > { %v5401_v23 = vadd.f32 %v2242_v39, %v1510_v54  ;;  %v5412_v54 = vpop.permute.xlu1 %3057  ;;  %v6012_v39 = vld [vmem:[#allocation17_spill] sm:$0xff] }
 0x2c5   : > { %3906 = vmatmul.msk.f32.gmra.mxu1 %vm619_vm1, %v4930_v42  ;;  %3942 = vmatmul.msk.f32.gmra.mxu2 %vm619_vm1, %v6008_v55  ;;  %6011 = vst [vmem:[#allocation15_spill] sm:$0xff] %v5412_v54  ;;  %v1431_v42 = vpop.permute.xlu2 %1430 }
 0x2c6   : > { %6006 = vst [vmem:[#allocation6_spill] sm:$0xff] %v5401_v23  ;;  %v1512_v23 = vmul.f32 %v1431_v42, %v6013_v51 }
 0x2c8   : > { %v1951_v33 = vpop.f32.mrf.mxu2 }
 0x2c9   : > { %v2183_v26 = vpop.f32.mrf.mxu3 }
 0x2ca   : > { %v2243_v17 = vadd.f32 %v2183_v26, %v1940_v28  ;;  %v1739_v2 = vpop.f32.mrf.mxu1  ;;  %v1946_v26 = vadd.f32 %v1945_v14, %v1736_v47  ;;  %v6021_v14 = vld [vmem:[#allocation9_spill] sm:$0xff] }
 0x2cc   : > { %v5410_v53 = vadd.f32 %v2243_v17, %v1511_v38  ;;  %v5421_v17 = vpop.permute.xlu0 %3062  ;;  %v6016_v38 = vld [vmem:[#allocation19_spill] sm:$0xff] }
 0x2cd   : > { %3907 = vmatmul.msk.f32.gmra.mxu1 %vm619_vm1, %v4943_v60  ;;  %3943 = vmatmul.msk.f32.gmra.mxu2 %vm619_vm1, %v6012_v39  ;;  %6015 = vst [vmem:[#allocation17_spill] sm:$0xff] %v5421_v17  ;;  %v1436_v60 = vpop.permute.xlu1 %1435 }
 0x2ce   : > { %6010 = vst [vmem:[#allocation4_spill] sm:$0xff] %v5410_v53  ;;  %v1513_v53 = vmul.f32 %v1436_v60, %v6017_v57 }
 0x2d0   : > { %v1954_v25 = vpop.f32.mrf.mxu2 }
 0x2d1   : > { %v2186_v8 = vpop.f32.mrf.mxu3 }
 0x2d2   : > { %v2244_v16 = vadd.f32 %v2186_v8, %v1943_v4  ;;  %v1742_v21 = vpop.f32.mrf.mxu1  ;;  %v1949_v8 = vadd.f32 %v1948_v0, %v1739_v2  ;;  %v6025_v2 = vld [vmem:[#allocation10_spill] sm:$0xff] }
 0x2d4   : > { %v5419_v28 = vadd.f32 %v2244_v16, %v1512_v23  ;;  %v5430_v23 = vpop.permute.xlu2 %3067  ;;  %v6020_v16 = vld [vmem:[#allocation21_spill] sm:$0xff] }
 0x2d5   : > { %3908 = vmatmul.msk.f32.gmra.mxu1 %vm619_vm1, %v4956_v32  ;;  %3944 = vmatmul.msk.f32.gmra.mxu2 %vm619_vm1, %v6016_v38  ;;  %6019 = vst [vmem:[#allocation19_spill] sm:$0xff] %v5430_v23  ;;  %v1441_v32 = vpop.permute.xlu0 %1440 }
 0x2d6   : > { %6014 = vst [vmem:[#allocation5_spill] sm:$0xff] %v5419_v28  ;;  %v1514_v28 = vmul.f32 %v1441_v32, %v6021_v14 }
 0x2d8   : > { %v1957_v34 = vpop.f32.mrf.mxu2 }
 0x2d9   : > { %v2189_v37 = vpop.f32.mrf.mxu3 }
 0x2da   : > { %v2245_v54 = vadd.f32 %v2189_v37, %v1946_v26  ;;  %v1745_v42 = vpop.f32.mrf.mxu1  ;;  %v1952_v37 = vadd.f32 %v1951_v33, %v1742_v21  ;;  %v6029_v21 = vld [vmem:[#allocation11_spill] sm:$0xff] }
 0x2dc   : > { %v5428_v4 = vadd.f32 %v2245_v54, %v1513_v53  ;;  %v5439_v53 = vpop.permute.xlu1 %3072  ;;  %v6024_v54 = vld [vmem:[#allocation23_spill] sm:$0xff] }
 0x2dd   : > { %3909 = vmatmul.msk.f32.gmra.mxu1 %vm619_vm1, %v4967_v3  ;;  %3945 = vmatmul.msk.f32.gmra.mxu2 %vm619_vm1, %v6020_v16  ;;  %6023 = vst [vmem:[#allocation21_spill] sm:$0xff] %v5439_v53  ;;  %v1446_v3 = vpop.permute.xlu2 %1445 }
 0x2de   : > { %6018 = vst [vmem:[#allocation7_spill] sm:$0xff] %v5428_v4  ;;  %v1515_v4 = vmul.f32 %v1446_v3, %v6025_v2 }
 0x2e0   : > { %v1960_v51 = vpop.f32.mrf.mxu2 }
 0x2e1   : > { %v2192_v47 = vpop.f32.mrf.mxu3 }
 0x2e2   : > { %v2246_v17 = vadd.f32 %v2192_v47, %v1949_v8  ;;  %v1748_v60 = vpop.f32.mrf.mxu1  ;;  %v1955_v47 = vadd.f32 %v1954_v25, %v1745_v42  ;;  %v6032_v42 = vld [vmem:[#allocation12_spill] sm:$0xff] }
 0x2e4   : > { %v5437_v26 = vadd.f32 %v2246_v17, %v1514_v28  ;;  %v5448_v28 = vpop.permute.xlu0 %3077  ;;  %v6028_v17 = vld [vmem:[#allocation25_spill] sm:$0xff] }
 0x2e5   : > { %3910 = vmatmul.msk.f32.gmra.mxu1 %vm619_vm1, %v4980_v49  ;;  %3946 = vmatmul.msk.f32.gmra.mxu2 %vm619_vm1, %v6024_v54  ;;  %6027 = vst [vmem:[#allocation23_spill] sm:$0xff] %v5448_v28  ;;  %v1451_v49 = vpop.permute.xlu1 %1450 }
 0x2e6   : > { %6022 = vst [vmem:[#allocation8_spill] sm:$0xff] %v5437_v26  ;;  %v1516_v26 = vmul.f32 %v1451_v49, %v6029_v21 }
 0x2e8   : > { %v1963_v57 = vpop.f32.mrf.mxu2 }
 0x2e9   : > { %v2195_v0 = vpop.f32.mrf.mxu3 }
 0x2ea   : > { %v2247_v23 = vadd.f32 %v2195_v0, %v1952_v37  ;;  %v1751_v32 = vpop.f32.mrf.mxu1  ;;  %v1958_v0 = vadd.f32 %v1957_v34, %v1748_v60  ;;  %v6034_v60 = vld [vmem:[#allocation14_spill] sm:$0xff] }
 0x2ec   : > { %v5446_v8 = vadd.f32 %v2247_v23, %v1515_v4  ;;  %v5457_v4 = vpop.permute.xlu2 %3082  ;;  %v6031_v23 = vld [vmem:[#allocation27_spill] sm:$0xff] }
 0x2ed   : > { %3911 = vmatmul.msk.f32.gmra.mxu1 %vm619_vm1, %v6004_v29  ;;  %3947 = vmatmul.msk.f32.gmra.mxu2 %vm619_vm1, %v6028_v17  ;;  %v1456_v29 = vpop.permute.xlu0 %1455 }
 0x2ee   : > { %6026 = vst [vmem:[#allocation9_spill] sm:$0xff] %v5446_v8  ;;  %v1517_v8 = vmul.f32 %v1456_v29, %v6032_v42 }
 0x2f0   : > { %v1966_v14 = vpop.f32.mrf.mxu2 }
 0x2f1   : > { %v2198_v33 = vpop.f32.mrf.mxu3 }
 0x2f2   : > { %v2248_v53 = vadd.f32 %v2198_v33, %v1955_v47  ;;  %v1754_v3 = vpop.f32.mrf.mxu1 }
 0x2f4   : > { %v5455_v37 = vadd.f32 %v2248_v53, %v1516_v26  ;;  %v5466_v26 = vpop.permute.xlu1 %3087  ;;  %v1961_v53 = vadd.f32 %v1960_v51, %v1751_v32  ;;  %v6036_v32 = vld [vmem:[#allocation16_spill] sm:$0xff] }
 0x2f5   : > { %3912 = vmatmul.msk.f32.gmra.mxu1 %vm619_vm1, %v6008_v55  ;;  %3948 = vmatmul.msk.f32.gmra.mxu2 %vm619_vm1, %v6031_v23  ;;  %v1461_v55 = vpop.permute.xlu2 %1460 }
 0x2f6   : > { %6030 = vst [vmem:[#allocation10_spill] sm:$0xff] %v5455_v37  ;;  %v1518_v21 = vmul.f32 %v1461_v55, %v6034_v60 }
 0x2f8   : > { %v1969_v2 = vpop.f32.mrf.mxu2 }
 0x2f9   : > { %v2201_v25 = vpop.f32.mrf.mxu3 }
 0x2fa   : > { %v2249_v28 = vadd.f32 %v2201_v25, %v1958_v0  ;;  %v1757_v49 = vpop.f32.mrf.mxu1 }
 0x2fc   : > { %v5464_v47 = vadd.f32 %v2249_v28, %v1517_v8  ;;  %v5475_v8 = vpop.permute.xlu0 %3092  ;;  %v1964_v28 = vadd.f32 %v1963_v57, %v1754_v3  ;;  %v6038_v3 = vld [vmem:[#allocation18_spill] sm:$0xff] }
 0x2fd   : > { %3913 = vmatmul.msk.f32.gmra.mxu1 %vm619_vm1, %v6012_v39  ;;  %3949 = vmatmul.msk.f32.gmra.mxu2 %vm619_vm1, %v5102_v1  ;;  %v1466_v39 = vpop.permute.xlu1 %1465 }
 0x2fe   : > { %6033 = vst [vmem:[#allocation25_spill] sm:$0xff] %v5464_v47  ;;  %v1519_v42 = vmul.f32 %v1466_v39, %v6036_v32 }
 0x300   : > { %v1972_v33 = vpop.f32.mrf.mxu2 }
 0x301   : > { %v2204_v34 = vpop.f32.mrf.mxu3 }
 0x302   : > { %v2250_v37 = vadd.f32 %v2204_v34, %v1961_v53  ;;  %v1760_v29 = vpop.f32.mrf.mxu1  ;;  %v1967_v34 = vadd.f32 %v1966_v14, %v1757_v49  ;;  %v6040_v49 = vld [vmem:[#allocation20_spill] sm:$0xff] }
 0x304   : > { %v5473_v0 = vadd.f32 %v2250_v37, %v1518_v21  ;;  %v5484_v37 = vpop.permute.xlu2 %3097 }
 0x305   : > { %3914 = vmatmul.msk.f32.gmra.mxu1 %vm619_vm1, %v6016_v38  ;;  %3950 = vmatmul.msk.f32.gmra.mxu2 %vm619_vm1, %v5117_v9  ;;  %v1471_v38 = vpop.permute.xlu0 %1470 }
 0x306   : > { %6035 = vst [vmem:[#allocation11_spill] sm:$0xff] %v5473_v0  ;;  %v1520_v21 = vmul.f32 %v1471_v38, %v6038_v3 }
 0x308   : > { %v1975_v25 = vpop.f32.mrf.mxu2 }
 0x309   : > { %v2207_v51 = vpop.f32.mrf.mxu3 }
 0x30a   : > { %v2251_v47 = vadd.f32 %v2207_v51, %v1964_v28  ;;  %v1763_v55 = vpop.f32.mrf.mxu1  ;;  %v1970_v51 = vadd.f32 %v1969_v2, %v1760_v29  ;;  %v6041_v29 = vld [vmem:[#allocation22_spill] sm:$0xff] }
 0x30c   : > { %v5482_v53 = vadd.f32 %v2251_v47, %v1519_v42  ;;  %v5493_v47 = vpop.permute.xlu1 %3102 }
 0x30d   : > { %3915 = vmatmul.msk.f32.gmra.mxu1 %vm619_vm1, %v6020_v16  ;;  %3951 = vmatmul.msk.f32.gmra.mxu2 %vm619_vm1, %v5134_v45  ;;  %v1476_v16 = vpop.permute.xlu2 %1475 }
 0x30e   : > { %6037 = vst [vmem:[#allocation27_spill] sm:$0xff] %v5482_v53  ;;  %v1521_v42 = vmul.f32 %v1476_v16, %v6040_v49 }
 0x310   : > { %v1978_v60 = vpop.f32.mrf.mxu2 }
 0x311   : > { %v2210_v57 = vpop.f32.mrf.mxu3 }
 0x312   : > { %v2252_v0 = vadd.f32 %v2210_v57, %v1967_v34  ;;  %v1766_v39 = vpop.f32.mrf.mxu1  ;;  %v1973_v57 = vadd.f32 %v1972_v33, %v1763_v55  ;;  %v5522_v55 = vld [vmem:[%s5872_s4] ss:$0 sm:$0xff] }
 0x314   : > { %v5491_v28 = vadd.f32 %v2252_v0, %v1520_v21  ;;  %v5502_v0 = vpop.permute.xlu0 %3107 }
 0x315   : > { %3916 = vmatmul.msk.f32.gmra.mxu1 %vm619_vm1, %v6024_v54  ;;  %3952 = vmatmul.msk.f32.gmra.mxu2 %vm619_vm1, %v5154_v6  ;;  %v1481_v54 = vpop.permute.xlu1 %1480 }
 0x316   : > { %6039 = vst [vmem:[#allocation12_spill] sm:$0xff] %v5491_v28  ;;  %v1522_v21 = vmul.f32 %v1481_v54, %v6041_v29 }
 0x318   : > { %v2805_v32 = vpop.f32.mrf.mxu2 }
 0x319   : > { %v2213_v14 = vpop.f32.mrf.mxu3 }
 0x31a   : > { %v2253_v53 = vadd.f32 %v2213_v14, %v1970_v51  ;;  %v1769_v38 = vpop.f32.mrf.mxu1  ;;  %v5512_v14 = vpop.permute.xlu2 %3112 }
 0x31c   : > { %v5500_v34 = vadd.f32 %v2253_v53, %v1521_v42 }
 0x31d   : > { %3917 = vmatmul.msk.f32.gmra.mxu1 %vm619_vm1, %v6028_v17  ;;  %3953 = vmatmul.msk.f32.gmra.mxu2 %vm619_vm1, %v5172_v41  ;;  %v1486_v17 = vpop.permute.xlu0 %1485 }
 0x320   : > { %v2808_v3 = vpop.f32.mrf.mxu2 }
 0x321   : > { %v2216_v2 = vpop.f32.mrf.mxu3 }
 0x322   : > { %v2254_v28 = vadd.f32 %v2216_v2, %v1973_v57  ;;  %v2561_v16 = vpop.f32.mrf.mxu1 }
 0x323   : > { %v2562_v51 = vadd.f32 %v2561_v16, %v5231_v58  ;;  %v1976_v58 = vadd.f32 %v1975_v25, %v1766_v39  ;;  %v1979_v39 = vadd.f32 %v1978_v60, %v1769_v38 }
 0x324   : > { %v5510_v53 = vadd.f32 %v2254_v28, %v1522_v21 }
 0x325   : > { %v2901_v49 = vadd.f32 %v2805_v32, %v2562_v51  ;;  %3918 = vmatmul.msk.f32.gmra.mxu1 %vm619_vm1, %v6031_v23  ;;  %3954 = vmatmul.msk.f32.gmra.mxu2 %vm619_vm1, %v5190_v48  ;;  %v6042_v32 = vld [vmem:[#allocation24_spill] sm:$0xff] }
 0x326   : > { %v1523_v57 = vmul.f32 %v1486_v17, %v6042_v32 }
 0x327   : > { %v3125_v33 = vmul.f32 %v5130_v13, %v2901_v49 }
 0x328   : > { %v2811_v28 = vpop.f32.mrf.mxu2 }
 0x329   : > { %v3157_v42 = vadd.f32 %v3125_v33, %v5108_v43  ;;  %v2219_v54 = vpop.f32.mrf.mxu3  ;;  %v1491_v43 = vpop.permute.xlu2 %1490  ;;  %v6043_v33 = vld [vmem:[#allocation26_spill] sm:$0xff] }
 0x32a   : > { %v2255_v2 = vadd.f32 %v2219_v54, %v1976_v58  ;;  %v2564_v23 = vpop.f32.mrf.mxu1  ;;  %v1524_v58 = vmul.f32 %v1491_v43, %v6043_v33  ;;  %v5538_v54 = vpop.f32.mrf.mxu0 }
 0x32b   : > { %v3193_v29 = vadd.f32 %v5522_v55, %v3157_v42  ;;  %v2565_v21 = vadd.f32 %v2564_v23, %v5255_v59 }
 0x32c   : > { %v5528_v16 = vadd.f32 %v2255_v2, %v1523_v57 }
 0x32d   : > { %v3225_v13 = vmax.f32 %v3193_v29, 0.0  ;;  %v2902_v51 = vadd.f32 %v2808_v3, %v2565_v21  ;;  %3919 = vmatmul.msk.f32.gmra.mxu1 %vm619_vm1, %v5102_v1  ;;  %3955 = vmatmul.msk.f32.gmra.mxu2 %vm619_vm1, %v5206_v10 }
 0x32f   : > { %v3126_v25 = vmul.f32 %v5142_v22, %v2902_v51  ;;  %3968 = vmatmul.msk.f32.vlgmr.msra.gmra.mxu3 %vm619_vm1, %v3225_v13 }
 0x330   : > { %v2814_v49 = vpop.f32.mrf.mxu2 }
 0x331   : > { %v3158_v17 = vadd.f32 %v3126_v25, %v5123_v63  ;;  %v2222_v59 = vpop.f32.mrf.mxu3 }
 0x332   : > { %v2256_v42 = vadd.f32 %v2222_v59, %v1979_v39  ;;  %v2567_v3 = vpop.f32.mrf.mxu1 }
 0x333   : > { %v2568_v1 = vadd.f32 %v2567_v3, %v5276_v11  ;;  %v3194_v32 = vadd.f32 %v5522_v55, %v3158_v17 }
 0x334   : > { %v5542_v57 = vadd.f32 %v2256_v42, %v1524_v58 }
 0x335   : > { %v2903_v22 = vadd.f32 %v2811_v28, %v2568_v1  ;;  %3920 = vmatmul.msk.f32.gmra.mxu1 %vm619_vm1, %v5117_v9  ;;  %3956 = vmatmul.msk.f32.gmra.mxu2 %vm619_vm1, %v5223_v27  ;;  %v3226_v63 = vmax.f32 %v3194_v32, 0.0  ;;  %v5553_v28 = vpop.f32.mrf.mxu0 }
 0x337   : > { %v3127_v60 = vmul.f32 %v5148_v19, %v2903_v22  ;;  %3969 = vmatmul.msk.f32.gmra.mxu3 %vm619_vm1, %v3226_v63 }
 0x338   : > { %v2817_v38 = vpop.f32.mrf.mxu2 }
 0x339   : > { %v3159_v2 = vadd.f32 %v3127_v60, %v5140_v44 }
 0x33a   : > { %v2570_v11 = vpop.f32.mrf.mxu1 }
 0x33b   : > { %v2571_v23 = vadd.f32 %v2570_v11, %v5304_v46  ;;  %v3195_v29 = vadd.f32 %v5522_v55, %v3159_v2 }
 0x33d   : > { %v2904_v21 = vadd.f32 %v2814_v49, %v2571_v23  ;;  %3921 = vmatmul.msk.f32.gmra.mxu1 %vm619_vm1, %v5134_v45  ;;  %3957 = vmatmul.msk.f32.gmra.mxu2 %vm619_vm1, %v5242_v40  ;;  %v3227_v9 = vmax.f32 %v3195_v29, 0.0  ;;  %v5568_v39 = vpop.f32.mrf.mxu0 }
 0x33f   : > { %v3128_v19 = vmul.f32 %v5167_v36, %v2904_v21  ;;  %3970 = vmatmul.msk.f32.gmra.mxu3 %vm619_vm1, %v3227_v9 }
 0x340   : > { %v2820_v44 = vpop.f32.mrf.mxu2 }
 0x341   : > { %v3160_v13 = vadd.f32 %v3128_v19, %v5160_v5 }
 0x342   : > { %v2573_v46 = vpop.f32.mrf.mxu1 }
 0x343   : > { %v2574_v51 = vadd.f32 %v2573_v46, %v5331_v35  ;;  %v3196_v43 = vadd.f32 %v5522_v55, %v3160_v13  ;;  %v6047_v46 = vld [vmem:[#allocation31_spill] sm:$0xff] }
 0x345   : > { %v2905_v25 = vadd.f32 %v2817_v38, %v2574_v51  ;;  %3922 = vmatmul.msk.f32.gmra.mxu1 %vm619_vm1, %v5154_v6  ;;  %3958 = vmatmul.msk.f32.gmra.mxu2 %vm619_vm1, %v5261_v20  ;;  %v3228_v45 = vmax.f32 %v3196_v43, 0.0  ;;  %v2475_v42 = vpop.f32.mrf.mxu0 }
 0x347   : > { %v3129_v36 = vmul.f32 %v5185_v31, %v2905_v25  ;;  %3971 = vmatmul.msk.f32.gmra.mxu3 %vm619_vm1, %v3228_v45  ;;  %v6048_v25 = vld [vmem:[#allocation30_spill] sm:$0xff] }
 0x348   : > { %v2823_v5 = vpop.f32.mrf.mxu2 }
 0x349   : > { %v3161_v49 = vadd.f32 %v3129_v36, %v5178_v50 }
 0x34a   : > { %v2576_v35 = vpop.f32.mrf.mxu1 }
 0x34b   : > { %v2577_v17 = vadd.f32 %v2576_v35, %v5353_v52  ;;  %v3197_v59 = vadd.f32 %v5522_v55, %v3161_v49 }
 0x34d   : > { %v2906_v33 = vadd.f32 %v2820_v44, %v2577_v17  ;;  %3923 = vmatmul.msk.f32.gmra.mxu1 %vm619_vm1, %v5172_v41  ;;  %3959 = vmatmul.msk.f32.gmra.mxu2 %vm619_vm1, %v5279_v15  ;;  %v3229_v6 = vmax.f32 %v3197_v59, 0.0  ;;  %v2478_v60 = vpop.f32.mrf.mxu0  ;;  %v6050_v59 = vld [vmem:[#allocation33_spill] sm:$0xff] }
 0x34f   : > { %v3130_v31 = vmul.f32 %v5198_v56, %v2906_v33  ;;  %3972 = vmatmul.msk.f32.gmra.mxu3 %vm619_vm1, %v3229_v6 }
 0x350   : > { %v2826_v58 = vpop.f32.mrf.mxu2 }
 0x351   : > { %v3162_v50 = vadd.f32 %v3130_v31, %v5196_v24  ;;  %v6051_v31 = vld [vmem:[#allocation32_spill] sm:$0xff] }
 0x352   : > { %v2579_v3 = vpop.f32.mrf.mxu1 }
 0x353   : > { %v2580_v52 = vadd.f32 %v2579_v3, %v5370_v62  ;;  %v3198_v1 = vadd.f32 %v5522_v55, %v3162_v50 }
 0x355   : > { %v2907_v32 = vadd.f32 %v2823_v5, %v2580_v52  ;;  %3924 = vmatmul.msk.f32.gmra.mxu1 %vm619_vm1, %v5190_v48  ;;  %3960 = vmatmul.msk.f32.gmra.mxu2 %vm619_vm1, %v5302_v61  ;;  %v3230_v41 = vmax.f32 %v3198_v1, 0.0  ;;  %v2481_v19 = vpop.f32.mrf.mxu0 }
 0x357   : > { %v3131_v56 = vmul.f32 %v5212_v7, %v2907_v32  ;;  %3973 = vmatmul.msk.f32.gmra.mxu3 %vm619_vm1, %v3230_v41  ;;  %v6044_v7 = vld [vmem:[#allocation29_spill] sm:$0xff]  ;;  %v6053_v32 = vld [vmem:[#allocation35_spill] sm:$0xff] }
 0x358   : > { %v2829_v22 = vpop.f32.mrf.mxu2 }
 0x359   : > { %v3163_v24 = vadd.f32 %v3131_v56, %v5210_v18  ;;  %v6045_v18 = vld [vmem:[#allocation28_spill] sm:$0xff] }
 0x35a   : > { %v2582_v63 = vpop.f32.mrf.mxu1 }
 0x35b   : > { %v2583_v62 = vadd.f32 %v2582_v63, %v5388_v12  ;;  %v3199_v38 = vadd.f32 %v5522_v55, %v3163_v24  ;;  %v6054_v24 = vld [vmem:[#allocation34_spill] sm:$0xff] }
 0x35d   : > { %v2908_v2 = vadd.f32 %v2826_v58, %v2583_v62  ;;  %3925 = vmatmul.msk.f32.gmra.mxu1 %vm619_vm1, %v5206_v10  ;;  %3961 = vmatmul.msk.f32.gmra.mxu2 %vm619_vm1, %v5323_v30  ;;  %v3231_v48 = vmax.f32 %v3199_v38, 0.0  ;;  %v6046_v10 = vld [vmem:[#allocation40_spill] sm:$0xff]  ;;  %v2484_v17 = vpop.f32.mrf.mxu0 }
 0x35f   : > { %v3132_v11 = vmul.f32 %v6044_v7, %v2908_v2  ;;  %3974 = vmatmul.msk.f32.gmra.mxu3 %vm619_vm1, %v3231_v48  ;;  %v6056_v7 = vld [vmem:[#allocation37_spill] sm:$0xff] }
 0x360   : > { %v2832_v23 = vpop.f32.mrf.mxu2 }
 0x361   : > { %v3164_v29 = vadd.f32 %v3132_v11, %v6045_v18  ;;  %v6057_v18 = vld [vmem:[#allocation36_spill] sm:$0xff] }
 0x362   : > { %v2585_v21 = vpop.f32.mrf.mxu1 }
 0x363   : > { %v2586_v12 = vadd.f32 %v2585_v21, %v5538_v54  ;;  %v3200_v9 = vadd.f32 %v5522_v55, %v3164_v29 }
 0x365   : > { %v2909_v44 = vadd.f32 %v2829_v22, %v2586_v12  ;;  %3926 = vmatmul.msk.f32.gmra.mxu1 %vm619_vm1, %v5223_v27  ;;  %3962 = vmatmul.msk.f32.gmra.mxu2 %vm619_vm1, %v6046_v10  ;;  %v3232_v13 = vmax.f32 %v3200_v9, 0.0  ;;  %v6049_v27 = vld [vmem:[#allocation43_spill] sm:$0xff]  ;;  %v2487_v22 = vpop.f32.mrf.mxu0  ;;  %v2687_v12 = vld [vmem:[#allocation2 + $0x119] sm:$0xff] }
 0x367   : > { %v3133_v51 = vmul.f32 %v6047_v46, %v2909_v44  ;;  %3975 = vmatmul.msk.f32.gmra.mxu3 %vm619_vm1, %v3232_v13  ;;  %v6058_v46 = vld [vmem:[#allocation39_spill] sm:$0xff] }
 0x368   : > { %v2835_v43 = vpop.f32.mrf.mxu2 }
 0x369   : > { %v3165_v45 = vadd.f32 %v3133_v51, %v6048_v25  ;;  %v6059_v25 = vld [vmem:[#allocation38_spill] sm:$0xff] }
 0x36a   : > { %v2588_v36 = vpop.f32.mrf.mxu1 }
 0x36b   : > { %v2589_v54 = vadd.f32 %v2588_v36, %v5553_v28  ;;  %v3201_v5 = vadd.f32 %v5522_v55, %v3165_v45 }
 0x36d   : > { %v2910_v49 = vadd.f32 %v2832_v23, %v2589_v54  ;;  %3927 = vmatmul.msk.f32.gmra.mxu1 %vm619_vm1, %v5242_v40  ;;  %3963 = vmatmul.msk.f32.gmra.mxu2 %vm619_vm1, %v6049_v27  ;;  %v3233_v35 = vmax.f32 %v3201_v5, 0.0  ;;  %v6052_v40 = vld [vmem:[#allocation46_spill] sm:$0xff] }
 0x36e   : > { %v2688_v54 = vld [vmem:[#allocation2 + $0x121] sm:$0xff] }
 0x36f   : > { %v3134_v33 = vmul.f32 %v6050_v59, %v2910_v49  ;;  %3976 = vmatmul.msk.f32.gmra.mxu3 %vm619_vm1, %v3233_v35  ;;  %v6060_v59 = vld [vmem:[#allocation42_spill] sm:$0xff] }
 0x370   : > { %v2838_v6 = vpop.f32.mrf.mxu2 }
 0x371   : > { %v3166_v58 = vadd.f32 %v3134_v33, %v6051_v31  ;;  %v6061_v31 = vld [vmem:[#allocation41_spill] sm:$0xff] }
 0x372   : > { %v2591_v50 = vpop.f32.mrf.mxu1 }
 0x373   : > { %v2592_v28 = vadd.f32 %v2591_v50, %v5568_v39  ;;  %v3202_v3 = vadd.f32 %v5522_v55, %v3166_v58 }
 0x375   : > { %v2911_v52 = vadd.f32 %v2835_v43, %v2592_v28  ;;  %3928 = vmatmul.msk.f32.gmra.mxu1 %vm619_vm1, %v5261_v20  ;;  %3964 = vmatmul.msk.f32.gmra.mxu2 %vm619_vm1, %v6052_v40  ;;  %v3234_v1 = vmax.f32 %v3202_v3, 0.0  ;;  %v6055_v20 = vld [vmem:[#allocation3_spill] sm:$0xff]  ;;  %v6062_v40 = vld [vmem:[#allocation45_spill] sm:$0xff] }
 0x377   : > { %v3135_v41 = vmul.f32 %v6053_v32, %v2911_v52  ;;  %3977 = vmatmul.msk.f32.gmra.mxu3 %vm619_vm1, %v3234_v1 }
 0x378   : > { %v2841_v56 = vpop.f32.mrf.mxu2 }
 0x379   : > { %v3167_v63 = vadd.f32 %v3135_v41, %v6054_v24  ;;  %v6063_v41 = vld [vmem:[#allocation44_spill] sm:$0xff] }
 0x37a   : > { %v2594_v62 = vpop.f32.mrf.mxu1 }
 0x37b   : > { %v2595_v39 = vadd.f32 %v2594_v62, %v2475_v42  ;;  %v3203_v38 = vadd.f32 %v5522_v55, %v3167_v63  ;;  %v2490_v42 = vpop.f32.mrf.mxu0 }
 0x37d   : > { %v2912_v2 = vadd.f32 %v2838_v6, %v2595_v39  ;;  %3929 = vmatmul.msk.f32.gmra.mxu1 %vm619_vm1, %v5279_v15  ;;  %3965 = vmatmul.msk.f32.gmra.mxu2 %vm619_vm1, %v6055_v20  ;;  %v3235_v48 = vmax.f32 %v3203_v38, 0.0  ;;  %v6064_v38 = vld [vmem:[#allocation48_spill] sm:$0xff] }
 0x37f   : > { %v3136_v11 = vmul.f32 %v6056_v7, %v2912_v2  ;;  %3978 = vmatmul.msk.f32.gmra.mxu3 %vm619_vm1, %v3235_v48  ;;  %v6065_v48 = vld [vmem:[#allocation47_spill] sm:$0xff] }
 0x380   : > { %v2844_v23 = vpop.f32.mrf.mxu2 }
 0x381   : > { %v3168_v29 = vadd.f32 %v3136_v11, %v6057_v18 }
 0x382   : > { %v2597_v21 = vpop.f32.mrf.mxu1 }
 0x383   : > { %v2598_v9 = vadd.f32 %v2597_v21, %v2478_v60  ;;  %v3204_v44 = vadd.f32 %v5522_v55, %v3168_v29  ;;  %v2493_v49 = vpop.f32.mrf.mxu0  ;;  %v6066_v21 = vld [vmem:[#allocation50_spill] sm:$0xff] }
 0x385   : > { %v2913_v13 = vadd.f32 %v2841_v56, %v2598_v9  ;;  %3930 = vmatmul.msk.f32.gmra.mxu1 %vm619_vm1, %v5302_v61  ;;  %v3236_v15 = vmax.f32 %v3204_v44, 0.0  ;;  %3966 = vmatmul.msk.f32.gmra.mxu2 %vm619_vm1, %v2687_v12  ;;  %v6067_v9 = vld [vmem:[#allocation49_spill] sm:$0xff] }
 0x387   : > { %v3137_v51 = vmul.f32 %v6058_v46, %v2913_v13  ;;  %3979 = vmatmul.msk.f32.gmra.mxu3 %vm619_vm1, %v3236_v15 }
 0x388   : > { %v2847_v43 = vpop.f32.mrf.mxu2 }
 0x389   : > { %v3169_v45 = vadd.f32 %v3137_v51, %v6059_v25 }
 0x38a   : > { %v2600_v36 = vpop.f32.mrf.mxu1 }
 0x38b   : > { %v2601_v5 = vadd.f32 %v2600_v36, %v2481_v19  ;;  %v3205_v60 = vadd.f32 %v5522_v55, %v3169_v45  ;;  %v5671_v36 = vld [vmem:[%s5874_s6] ss:$0 sm:$0xff] }
 0x38d   : > { %v2914_v35 = vadd.f32 %v2844_v23, %v2601_v5  ;;  %3931 = vmatmul.msk.f32.gmra.mxu1 %vm619_vm1, %v5323_v30  ;;  %v3237_v61 = vmax.f32 %v3205_v60, 0.0  ;;  %3967 = vmatmul.msk.f32.gmra.mxu2 %vm619_vm1, %v2688_v54  ;;  %v2496_v30 = vpop.f32.mrf.mxu0  ;;  %v6069_v5 = vld [vmem:[#allocation6_spill] sm:$0xff] }
 0x38f   : > { %v3138_v33 = vmul.f32 %v6060_v59, %v2914_v35  ;;  %3980 = vmatmul.msk.f32.gmra.mxu3 %vm619_vm1, %v3237_v61 }
 0x390   : > { %v2850_v6 = vpop.f32.mrf.mxu2 }
 0x391   : > { %v3170_v58 = vadd.f32 %v3138_v33, %v6061_v31 }
 0x392   : > { %v2603_v50 = vpop.f32.mrf.mxu1 }
 0x393   : > { %v2604_v28 = vadd.f32 %v2603_v50, %v2484_v17  ;;  %v3206_v19 = vadd.f32 %v5522_v55, %v3170_v58  ;;  %v4026_v58 = vld [vmem:[%s4155_s28] sm:$0xff] }
 0x395   : > { %v2915_v3 = vadd.f32 %v2847_v43, %v2604_v28  ;;  %3932 = vmatmul.msk.f32.gmra.mxu1 %vm619_vm1, %v6046_v10  ;;  %v3238_v52 = vmax.f32 %v3206_v19, 0.0  ;;  %v2499_v20 = vpop.f32.mrf.mxu0  ;;  %v6070_v19 = vld [vmem:[#allocation15_spill] sm:$0xff] }
 0x397   : > { %v3139_v1 = vmul.f32 %v6062_v40, %v2915_v3  ;;  %3981 = vmatmul.msk.f32.gmra.mxu3 %vm619_vm1, %v3238_v52  ;;  %v6071_v40 = vld [vmem:[#allocation4_spill] sm:$0xff] }
 0x398   : > { %v2853_v32 = vpop.f32.mrf.mxu2 }
 0x399   : > { %v3171_v56 = vadd.f32 %v3139_v1, %v6063_v41 }
 0x39a   : > { %v2606_v24 = vpop.f32.mrf.mxu1 }
 0x39b   : > { %v2607_v63 = vadd.f32 %v2606_v24, %v2487_v22  ;;  %v3207_v62 = vadd.f32 %v5522_v55, %v3171_v56 }
 0x39d   : > { %v2916_v17 = vadd.f32 %v2850_v6, %v2607_v63  ;;  %3933 = vmatmul.msk.f32.gmra.mxu1 %vm619_vm1, %v6049_v27  ;;  %v3239_v39 = vmax.f32 %v3207_v62, 0.0  ;;  %v2502_v15 = vpop.f32.mrf.mxu0 }
 0x39f   : > { %v3140_v10 = vmul.f32 %v6064_v38, %v2916_v17  ;;  %3982 = vmatmul.msk.f32.gmra.mxu3 %vm619_vm1, %v3239_v39  ;;  %v4027_v17 = vld [vmem:[%s4155_s28 + $0x8] sm:$0xff] }
 0x3a0   : > { %v2856_v2 = vpop.f32.mrf.mxu2 }
 0x3a1   : > { %v3172_v7 = vadd.f32 %v3140_v10, %v6065_v48 }
 0x3a2   : > { %v2609_v11 = vpop.f32.mrf.mxu1 }
 0x3a3   : > { %v2610_v23 = vadd.f32 %v2609_v11, %v2490_v42  ;;  %v3208_v18 = vadd.f32 %v5522_v55, %v3172_v7  ;;  %v6068_v42 = vld [vmem:[#allocation13_spill] sm:$0xff] }
 0x3a5   : > { %v2917_v22 = vadd.f32 %v2853_v32, %v2610_v23  ;;  %v3240_v29 = vmax.f32 %v3208_v18, 0.0  ;;  %v2505_v6 = vpop.f32.mrf.mxu0  ;;  %v6073_v23 = vld [vmem:[#allocation5_spill] sm:$0xff] }
 0x3a7   : > { %v3141_v12 = vmul.f32 %v6066_v21, %v2917_v22  ;;  %3983 = vmatmul.msk.f32.gmra.mxu3 %vm619_vm1, %v3240_v29 }
 0x3a8   : > { %v2859_v27 = vpop.f32.mrf.mxu2 }
 0x3a9   : > { %v3173_v44 = vadd.f32 %v3141_v12, %v6067_v9  ;;  %v4028_v9 = vld [vmem:[%s4155_s28 + $0x10] sm:$0xff] }
 0x3aa   : > { %v2612_v13 = vpop.f32.mrf.mxu1 }
 0x3ab   : > { %v2613_v46 = vadd.f32 %v2612_v13, %v2493_v49  ;;  %v3209_v51 = vadd.f32 %v5522_v55, %v3173_v44 }
 0x3ad   : > { %v2918_v43 = vadd.f32 %v2856_v2, %v2613_v46  ;;  %v3241_v25 = vmax.f32 %v3209_v51, 0.0  ;;  %v2508_v10 = vpop.f32.mrf.mxu0  ;;  %v6072_v2 = vld [vmem:[#allocation17_spill] sm:$0xff]  ;;  %v6074_v46 = vld [vmem:[#allocation19_spill] sm:$0xff] }
 0x3af   : > { %v3142_v45 = vmul.f32 %v6068_v42, %v2918_v43  ;;  %3984 = vmatmul.msk.f32.gmra.mxu3 %vm619_vm1, %v3241_v25 }
 0x3b0   : > { %v2862_v54 = vpop.f32.mrf.mxu2 }
 0x3b1   : > { %v3174_v60 = vadd.f32 %v3142_v45, %v6069_v5  ;;  %v6075_v45 = vld [vmem:[#allocation7_spill] sm:$0xff] }
 0x3b2   : > { %v2615_v35 = vpop.f32.mrf.mxu1  ;;  %v3376_v49 = vpop.f32.mrf.mxu3 }
 0x3b3   : > { %v2616_v61 = vadd.f32 %v2615_v35, %v2496_v30  ;;  %v3377_v59 = vadd.f32 %v5671_v36, %v3376_v49  ;;  %v3210_v33 = vadd.f32 %v5522_v55, %v3174_v60 }
 0x3b5   : > { %v2919_v31 = vadd.f32 %v2859_v27, %v2616_v61  ;;  %v3472_v50 = vadd.f32 %v4026_v58, %v3377_v59  ;;  %v3242_v28 = vmax.f32 %v3210_v33, 0.0  ;;  %v2511_v42 = vpop.f32.mrf.mxu0  ;;  %v4029_v59 = vld [vmem:[%s4155_s28 + $0x18] sm:$0xff]  ;;  %v6076_v58 = vld [vmem:[#allocation21_spill] sm:$0xff] }
 0x3b7   : > { %v3143_v3 = vmul.f32 %v6070_v19, %v2919_v31  ;;  %v3504_v52 = vmax.f32 %v3472_v50, 0.0  ;;  %3985 = vmatmul.msk.f32.gmra.mxu3 %vm619_vm1, %v3242_v28 }
 0x3b8   : > { %v2865_v30 = vpop.f32.mrf.mxu2 }
 0x3b9   : > { %v3175_v1 = vadd.f32 %v3143_v3, %v6071_v40  ;;  %3536 = vst.msk [vmem:[%s5682_s18] sm:$0xff] %vm377_vm0, %v3504_v52  ;;  %v6077_v3 = vld [vmem:[#allocation8_spill] sm:$0xff] }
 0x3ba   : > { %v2618_v32 = vpop.f32.mrf.mxu1  ;;  %v3379_v41 = vpop.f32.mrf.mxu3 }
 0x3bb   : > { %v2619_v56 = vadd.f32 %v2618_v32, %v2499_v20  ;;  %v3380_v24 = vadd.f32 %v5671_v36, %v3379_v41  ;;  %v3211_v63 = vadd.f32 %v5522_v55, %v3175_v1 }
 0x3bd   : > { %v2920_v62 = vadd.f32 %v2862_v54, %v2619_v56  ;;  %v3473_v39 = vadd.f32 %v4027_v17, %v3380_v24  ;;  %v3243_v38 = vmax.f32 %v3211_v63, 0.0  ;;  %v2514_v40 = vpop.f32.mrf.mxu0  ;;  %v4030_v24 = vld [vmem:[%s4155_s28 + $0x20] sm:$0xff]  ;;  %v6078_v17 = vld [vmem:[#allocation23_spill] sm:$0xff] }
 0x3bf   : > { %v3144_v48 = vmul.f32 %v6072_v2, %v2920_v62  ;;  %v3505_v7 = vmax.f32 %v3473_v39, 0.0  ;;  %3986 = vmatmul.msk.f32.gmra.mxu3 %vm619_vm1, %v3243_v38 }
 0x3c0   : > { %v2868_v11 = vpop.f32.mrf.mxu2 }
 0x3c1   : > { %v3176_v18 = vadd.f32 %v3144_v48, %v6073_v23  ;;  %3537 = vst.msk [vmem:[%s5682_s18 + $0x8] sm:$0xff] %vm377_vm0, %v3505_v7  ;;  %v6079_v48 = vld [vmem:[#allocation9_spill] sm:$0xff] }
 0x3c2   : > { %v2621_v20 = vpop.f32.mrf.mxu1  ;;  %v3382_v22 = vpop.f32.mrf.mxu3 }
 0x3c3   : > { %v2622_v29 = vadd.f32 %v2621_v20, %v2502_v15  ;;  %v3383_v21 = vadd.f32 %v5671_v36, %v3382_v22  ;;  %v3212_v12 = vadd.f32 %v5522_v55, %v3176_v18 }
 0x3c5   : > { %v2921_v27 = vadd.f32 %v2865_v30, %v2622_v29  ;;  %v3474_v44 = vadd.f32 %v4028_v9, %v3383_v21  ;;  %v3244_v13 = vmax.f32 %v3212_v12, 0.0  ;;  %v2517_v22 = vpop.f32.mrf.mxu0  ;;  %v4031_v21 = vld [vmem:[%s4155_s28 + $0x28] sm:$0xff] }
 0x3c7   : > { %v3145_v51 = vmul.f32 %v6074_v46, %v2921_v27  ;;  %v3506_v43 = vmax.f32 %v3474_v44, 0.0  ;;  %3987 = vmatmul.msk.f32.gmra.mxu3 %vm619_vm1, %v3244_v13  ;;  %v6080_v46 = vld [vmem:[#allocation10_spill] sm:$0xff] }
 0x3c8   : > { %v2871_v25 = vpop.f32.mrf.mxu2 }
 0x3c9   : > { %v3177_v54 = vadd.f32 %v3145_v51, %v6075_v45  ;;  %3538 = vst.msk [vmem:[%s5682_s18 + $0x10] sm:$0xff] %vm377_vm0, %v3506_v43 }
 0x3ca   : > { %v2624_v15 = vpop.f32.mrf.mxu1  ;;  %v3385_v5 = vpop.f32.mrf.mxu3 }
 0x3cb   : > { %v2625_v60 = vadd.f32 %v2624_v15, %v2505_v6  ;;  %v3386_v35 = vadd.f32 %v5671_v36, %v3385_v5  ;;  %v3213_v49 = vadd.f32 %v5522_v55, %v3177_v54  ;;  %v4032_v5 = vld [vmem:[%s4155_s28 + $0x30] sm:$0xff] }
 0x3cd   : > { %v2922_v61 = vadd.f32 %v2868_v11, %v2625_v60  ;;  %v3475_v33 = vadd.f32 %v4029_v59, %v3386_v35  ;;  %v3245_v31 = vmax.f32 %v3213_v49, 0.0  ;;  %v2520_v35 = vpop.f32.mrf.mxu0  ;;  %v6081_v59 = vld [vmem:[#allocation25_spill] sm:$0xff] }
 0x3cf   : > { %v3146_v50 = vmul.f32 %v6076_v58, %v2922_v61  ;;  %v3507_v28 = vmax.f32 %v3475_v33, 0.0  ;;  %3988 = vmatmul.msk.f32.gmra.mxu3 %vm619_vm1, %v3245_v31 }
 0x3d0   : > { %v2874_v19 = vpop.f32.mrf.mxu2 }
 0x3d1   : > { %v3178_v52 = vadd.f32 %v3146_v50, %v6077_v3  ;;  %3539 = vst.msk [vmem:[%s5682_s18 + $0x18] sm:$0xff] %vm377_vm0, %v3507_v28 }
 0x3d2   : > { %v2627_v6 = vpop.f32.mrf.mxu1  ;;  %v3388_v30 = vpop.f32.mrf.mxu3 }
 0x3d3   : > { %v2628_v1 = vadd.f32 %v2627_v6, %v2508_v10  ;;  %v3389_v32 = vadd.f32 %v5671_v36, %v3388_v30  ;;  %v3214_v41 = vadd.f32 %v5522_v55, %v3178_v52  ;;  %v4033_v6 = vld [vmem:[%s4155_s28 + $0x38] sm:$0xff] }
 0x3d5   : > { %v2923_v56 = vadd.f32 %v2871_v25, %v2628_v1  ;;  %v3476_v63 = vadd.f32 %v4030_v24, %v3389_v32  ;;  %v3246_v62 = vmax.f32 %v3214_v41, 0.0  ;;  %v2523_v32 = vpop.f32.mrf.mxu0  ;;  %v6082_v41 = vld [vmem:[#allocation11_spill] sm:$0xff] }
 0x3d7   : > { %v3147_v39 = vmul.f32 %v6078_v17, %v2923_v56  ;;  %v3508_v38 = vmax.f32 %v3476_v63, 0.0  ;;  %3989 = vmatmul.msk.f32.gmra.mxu3 %vm619_vm1, %v3246_v62 }
 0x3d8   : > { %v2877_v2 = vpop.f32.mrf.mxu2 }
 0x3d9   : > { %v3179_v7 = vadd.f32 %v3147_v39, %v6079_v48  ;;  %3540 = vst.msk [vmem:[%s5682_s18 + $0x20] sm:$0xff] %vm377_vm0, %v3508_v38  ;;  %v4034_v48 = vld [vmem:[%s4155_s28 + $0x40] sm:$0xff] }
 0x3da   : > { %v2630_v10 = vpop.f32.mrf.mxu1  ;;  %v3391_v11 = vpop.f32.mrf.mxu3 }
 0x3db   : > { %v2631_v23 = vadd.f32 %v2630_v10, %v2511_v42  ;;  %v3392_v18 = vadd.f32 %v5671_v36, %v3391_v11  ;;  %v3215_v20 = vadd.f32 %v5522_v55, %v3179_v7 }
 0x3dd   : > { %v2924_v29 = vadd.f32 %v2874_v19, %v2631_v23  ;;  %v3477_v12 = vadd.f32 %v4031_v21, %v3392_v18  ;;  %v3247_v27 = vmax.f32 %v3215_v20, 0.0  ;;  %v6083_v23 = vld [vmem:[#allocation27_spill] sm:$0xff] }
 0x3df   : > { %v3148_v9 = vmul.f32 %v5457_v4, %v2924_v29  ;;  %v3509_v44 = vmax.f32 %v3477_v12, 0.0  ;;  %3990 = vmatmul.msk.f32.gmra.mxu3 %vm619_vm1, %v3247_v27  ;;  %v2526_v29 = vpop.f32.mrf.mxu0 }
 0x3e0   : > { %v2880_v13 = vpop.f32.mrf.mxu2 }
 0x3e1   : > { %v3180_v51 = vadd.f32 %v3148_v9, %v6080_v46  ;;  %3541 = vst.msk [vmem:[%s5682_s18 + $0x28] sm:$0xff] %vm377_vm0, %v3509_v44 }
 0x3e2   : > { %v2633_v43 = vpop.f32.mrf.mxu1  ;;  %v3394_v25 = vpop.f32.mrf.mxu3 }
 0x3e3   : > { %v2634_v42 = vadd.f32 %v2633_v43, %v2514_v40  ;;  %v3395_v45 = vadd.f32 %v5671_v36, %v3394_v25  ;;  %v3216_v54 = vadd.f32 %v5522_v55, %v3180_v51  ;;  %v6084_v25 = vld [vmem:[#allocation12_spill] sm:$0xff] }
 0x3e5   : > { %v2925_v15 = vadd.f32 %v2877_v2, %v2634_v42  ;;  %v3478_v4 = vadd.f32 %v4032_v5, %v3395_v45  ;;  %v3248_v60 = vmax.f32 %v3216_v54, 0.0 }
 0x3e7   : > { %v3149_v49 = vmul.f32 %v5466_v26, %v2925_v15  ;;  %v3510_v61 = vmax.f32 %v3478_v4, 0.0  ;;  %3991 = vmatmul.msk.f32.gmra.mxu3 %vm619_vm1, %v3248_v60  ;;  %v2529_v60 = vpop.f32.mrf.mxu0 }
 0x3e8   : > { %v2883_v31 = vpop.f32.mrf.mxu2 }
 0x3e9   : > { %v3181_v33 = vadd.f32 %v3149_v49, %v6081_v59  ;;  %3542 = vst.msk [vmem:[%s5682_s18 + $0x30] sm:$0xff] %vm377_vm0, %v3510_v61  ;;  %v4036_v49 = vld [vmem:[%s4155_s28 + $0x50] sm:$0xff] }
 0x3ea   : > { %v2636_v58 = vpop.f32.mrf.mxu1  ;;  %v3397_v50 = vpop.f32.mrf.mxu3 }
 0x3eb   : > { %v2637_v28 = vadd.f32 %v2636_v58, %v2517_v22  ;;  %v3398_v19 = vadd.f32 %v5671_v36, %v3397_v50  ;;  %v3217_v3 = vadd.f32 %v5522_v55, %v3181_v33 }
 0x3ed   : > { %v2926_v52 = vadd.f32 %v2880_v13, %v2637_v28  ;;  %v3479_v26 = vadd.f32 %v4033_v6, %v3398_v19  ;;  %v3249_v30 = vmax.f32 %v3217_v3, 0.0 }
 0x3ef   : > { %v3150_v40 = vmul.f32 %v5475_v8, %v2926_v52  ;;  %v3511_v1 = vmax.f32 %v3479_v26, 0.0  ;;  %3992 = vmatmul.msk.f32.gmra.mxu3 %vm619_vm1, %v3249_v30  ;;  %v4037_v26 = vld [vmem:[%s4155_s28 + $0x58] sm:$0xff] }
 0x3f0   : > { %v2886_v62 = vpop.f32.mrf.mxu2 }
 0x3f1   : > { %v3182_v56 = vadd.f32 %v3150_v40, %v6082_v41  ;;  %3543 = vst.msk [vmem:[%s5682_s18 + $0x38] sm:$0xff] %vm377_vm0, %v3511_v1  ;;  %v2532_v40 = vpop.f32.mrf.mxu0 }
 0x3f2   : > { %v2639_v24 = vpop.f32.mrf.mxu1  ;;  %v3400_v63 = vpop.f32.mrf.mxu3 }
 0x3f3   : > { %v2640_v17 = vadd.f32 %v2639_v24, %v2520_v35  ;;  %v3401_v39 = vadd.f32 %v5671_v36, %v3400_v63  ;;  %v3218_v38 = vadd.f32 %v5522_v55, %v3182_v56 }
 0x3f5   : > { %v2927_v2 = vadd.f32 %v2883_v31, %v2640_v17  ;;  %v3480_v8 = vadd.f32 %v4034_v48, %v3401_v39  ;;  %v3250_v7 = vmax.f32 %v3218_v38, 0.0  ;;  %v4038_v39 = vld [vmem:[%s4155_s28 + $0x60] sm:$0xff]  ;;  %v3118_v48 = vpop.permute.xlu1 %3117 }
 0x3f7   : > { %v3151_v10 = vmul.f32 %v5484_v37, %v2927_v2  ;;  %v3512_v11 = vmax.f32 %v3480_v8, 0.0  ;;  %3993 = vmatmul.msk.f32.gmra.mxu3 %vm619_vm1, %v3250_v7  ;;  %v4035_v37 = vld [vmem:[%s4155_s28 + $0x48] sm:$0xff] }
 0x3f8   : > { %v2889_v9 = vpop.f32.mrf.mxu2 }
 0x3f9   : > { %v3183_v18 = vadd.f32 %v3151_v10, %v6083_v23  ;;  %3544 = vst.msk [vmem:[%s5682_s18 + $0x40] sm:$0xff] %vm377_vm0, %v3512_v11 }
 0x3fa   : > { %v2642_v20 = vpop.f32.mrf.mxu1  ;;  %v3403_v22 = vpop.f32.mrf.mxu3 }
 0x3fb   : > { %v2643_v21 = vadd.f32 %v2642_v20, %v2523_v32  ;;  %v3404_v12 = vadd.f32 %v5671_v36, %v3403_v22  ;;  %v3219_v27 = vadd.f32 %v5522_v55, %v3183_v18 }
 0x3fd   : > { %v2928_v44 = vadd.f32 %v2886_v62, %v2643_v21  ;;  %v3481_v13 = vadd.f32 %v4035_v37, %v3404_v12  ;;  %v3251_v46 = vmax.f32 %v3219_v27, 0.0  ;;  %v4039_v12 = vld [vmem:[%s4155_s28 + $0x68] sm:$0xff] }
 0x3ff   : > { %v3152_v51 = vmul.f32 %v5493_v47, %v2928_v44  ;;  %v3513_v43 = vmax.f32 %v3481_v13, 0.0  ;;  %3994 = vmatmul.msk.f32.gmra.mxu3 %vm619_vm1, %v3251_v46  ;;  %v3123_v44 = vpop.permute.xlu0 %3122 }
 0x400   : > { %v2892_v59 = vpop.f32.mrf.mxu2 }
 0x401   : > { %v3184_v42 = vadd.f32 %v3152_v51, %v6084_v25  ;;  %3545 = vst.msk [vmem:[%s5682_s18 + $0x48] sm:$0xff] %vm377_vm0, %v3513_v43 }
 0x402   : > { %v2645_v45 = vpop.f32.mrf.mxu1  ;;  %v3406_v54 = vpop.f32.mrf.mxu3 }
 0x403   : > { %v2646_v15 = vadd.f32 %v2645_v45, %v2526_v29  ;;  %v3407_v5 = vadd.f32 %v5671_v36, %v3406_v54  ;;  %v3220_v4 = vadd.f32 %v5522_v55, %v3184_v42  ;;  %v4040_v42 = vld [vmem:[%s4155_s28 + $0x70] sm:$0xff] }
 0x405   : > { %v2929_v35 = vadd.f32 %v2889_v9, %v2646_v15  ;;  %v3482_v47 = vadd.f32 %v4036_v49, %v3407_v5  ;;  %v3252_v61 = vmax.f32 %v3220_v4, 0.0  ;;  %v4042_v49 = vld [vmem:[%s4155_s28 + $0x80] sm:$0xff] }
 0x407   : > { %v3153_v33 = vmul.f32 %v5502_v0, %v2929_v35  ;;  %v3514_v31 = vmax.f32 %v3482_v47, 0.0  ;;  %3995 = vmatmul.msk.f32.gmra.mxu3 %vm619_vm1, %v3252_v61 }
 0x409   : > { %v3185_v58 = vadd.f32 %v3153_v33, %v5500_v34  ;;  %3546 = vst.msk [vmem:[%s5682_s18 + $0x50] sm:$0xff] %vm377_vm0, %v3514_v31  ;;  %v2895_v34 = vpop.f32.mrf.mxu2  ;;  %v4043_v31 = vld [vmem:[%s4155_s28 + $0x88] sm:$0xff] }
 0x40a   : > { %v2648_v50 = vpop.f32.mrf.mxu1  ;;  %v3409_v28 = vpop.f32.mrf.mxu3 }
 0x40b   : > { %v2649_v19 = vadd.f32 %v2648_v50, %v2529_v60  ;;  %v3410_v3 = vadd.f32 %v5671_v36, %v3409_v28  ;;  %v3221_v52 = vadd.f32 %v5522_v55, %v3185_v58 }
 0x40d   : > { %v2930_v6 = vadd.f32 %v2892_v59, %v2649_v19  ;;  %v3483_v30 = vadd.f32 %v4037_v26, %v3410_v3  ;;  %v3253_v0 = vmax.f32 %v3221_v52, 0.0  ;;  %v4044_v3 = vld [vmem:[%s4155_s28 + $0x90] sm:$0xff] }
 0x40f   : > { %v3154_v1 = vmul.f32 %v5512_v14, %v2930_v6  ;;  %v3515_v32 = vmax.f32 %v3483_v30, 0.0  ;;  %3996 = vmatmul.msk.f32.gmra.mxu3 %vm619_vm1, %v3253_v0  ;;  %v4045_v0 = vld [vmem:[%s4155_s28 + $0x98] sm:$0xff] }
 0x411   : > { %v3186_v41 = vadd.f32 %v3154_v1, %v5510_v53  ;;  %3547 = vst.msk [vmem:[%s5682_s18 + $0x58] sm:$0xff] %vm377_vm0, %v3515_v32  ;;  %v2535_v53 = vpop.f32.mrf.mxu0  ;;  %v2898_v11 = vpop.f32.mrf.mxu2 }
 0x412   : > { %v2651_v56 = vpop.f32.mrf.mxu1  ;;  %v3412_v24 = vpop.f32.mrf.mxu3 }
 0x413   : > { %v2652_v63 = vadd.f32 %v2651_v56, %v2532_v40  ;;  %v3413_v62 = vadd.f32 %v5671_v36, %v3412_v24  ;;  %v3222_v17 = vadd.f32 %v5522_v55, %v3186_v41  ;;  %v4046_v41 = vld [vmem:[%s4155_s28 + $0xa0] sm:$0xff] }
 0x415   : > { %v3484_v38 = vadd.f32 %v4038_v39, %v3413_v62  ;;  %v2931_v2 = vadd.f32 %v2895_v34, %v2652_v63  ;;  %v3254_v14 = vmax.f32 %v3222_v17, 0.0  ;;  %v4047_v17 = vld [vmem:[%s4155_s28 + $0xa8] sm:$0xff] }
 0x417   : > { %v3516_v8 = vmax.f32 %v3484_v38, 0.0  ;;  %v3155_v7 = vmul.f32 %v3118_v48, %v2931_v2  ;;  %3997 = vmatmul.msk.f32.gmra.mxu3 %vm619_vm1, %v3254_v14  ;;  %v4048_v48 = vld [vmem:[%s4155_s28 + $0xb0] sm:$0xff] }
 0x419   : > { %3548 = vst.msk [vmem:[%s5682_s18 + $0x60] sm:$0xff] %vm377_vm0, %v3516_v8  ;;  %v3187_v10 = vadd.f32 %v3155_v7, %v5528_v16 }
 0x41a   : > { %v2654_v23 = vpop.f32.mrf.mxu1  ;;  %v3415_v18 = vpop.f32.mrf.mxu3 }
 0x41b   : > { %v3223_v20 = vadd.f32 %v5522_v55, %v3187_v10  ;;  %v2655_v22 = vadd.f32 %v2654_v23, %v2535_v53  ;;  %v3416_v29 = vadd.f32 %v5671_v36, %v3415_v18 }
 0x41d   : > { %v3255_v21 = vmax.f32 %v3223_v20, 0.0  ;;  %v3485_v27 = vadd.f32 %v4039_v12, %v3416_v29  ;;  %v2932_v9 = vadd.f32 %v2898_v11, %v2655_v22  ;;  %v4049_v11 = vld [vmem:[%s4155_s28 + $0xb8] sm:$0xff]  ;;  %v4050_v29 = vld [vmem:[%s4155_s28 + $0xc0] sm:$0xff] }
 0x41f   : > { %v3517_v37 = vmax.f32 %v3485_v27, 0.0  ;;  %v3156_v13 = vmul.f32 %v3123_v44, %v2932_v9  ;;  %3998 = vmatmul.msk.f32.gmra.mxu3 %vm619_vm1, %v3255_v21  ;;  %v4051_v44 = vld [vmem:[%s4155_s28 + $0xc8] sm:$0xff] }
 0x421   : > { %3549 = vst.msk [vmem:[%s5682_s18 + $0x68] sm:$0xff] %vm377_vm0, %v3517_v37  ;;  %v3188_v16 = vadd.f32 %v3156_v13, %v5542_v57  ;;  %v4041_v57 = vld [vmem:[%s4155_s28 + $0x78] sm:$0xff] }
 0x422   : > { %v3418_v46 = vpop.f32.mrf.mxu3 }
 0x423   : > { %v3224_v51 = vadd.f32 %v5522_v55, %v3188_v16  ;;  %v3419_v43 = vadd.f32 %v5671_v36, %v3418_v46 }
 0x425   : > { %v3256_v25 = vmax.f32 %v3224_v51, 0.0  ;;  %v3486_v45 = vadd.f32 %v4040_v42, %v3419_v43  ;;  %v4052_v51 = vld [vmem:[%s4155_s28 + $0xd0] sm:$0xff] }
 0x427   : > { %v3518_v54 = vmax.f32 %v3486_v45, 0.0  ;;  %3999 = vmatmul.msk.f32.gmra.mxu3 %vm619_vm1, %v3256_v25 }
 0x429   : > { %3550 = vst.msk [vmem:[%s5682_s18 + $0x70] sm:$0xff] %vm377_vm0, %v3518_v54  ;;  %v4053_v54 = vld [vmem:[%s4155_s28 + $0xd8] sm:$0xff] }
 0x42a   : > { %v3421_v15 = vpop.f32.mrf.mxu3 }
 0x42b   : > { %v3422_v5 = vadd.f32 %v5671_v36, %v3421_v15 }
 0x42d   : > { %v3487_v4 = vadd.f32 %v4041_v57, %v3422_v5 }
 0x42f   : > { %v3519_v55 = vmax.f32 %v3487_v4, 0.0 }
 0x431   : > { %3551 = vst.msk [vmem:[%s5682_s18 + $0x78] sm:$0xff] %vm377_vm0, %v3519_v55  ;;  %v4054_v55 = vld [vmem:[%s4155_s28 + $0xe0] sm:$0xff] }
 0x432   : > { %v3424_v60 = vpop.f32.mrf.mxu3 }
 0x433   : > { %v3425_v35 = vadd.f32 %v5671_v36, %v3424_v60 }
 0x435   : > { %v3488_v47 = vadd.f32 %v4042_v49, %v3425_v35 }
 0x437   : > { %v3520_v61 = vmax.f32 %v3488_v47, 0.0 }
 0x439   : > { %3552 = vst.msk [vmem:[%s5682_s18 + $0x80] sm:$0xff] %vm377_vm0, %v3520_v61  ;;  %v4055_v61 = vld [vmem:[%s4155_s28 + $0xe8] sm:$0xff] }
 0x43a   : > { %v3427_v59 = vpop.f32.mrf.mxu3 }
 0x43b   : > { %v3428_v33 = vadd.f32 %v5671_v36, %v3427_v59 }
 0x43d   : > { %v3489_v58 = vadd.f32 %v4043_v31, %v3428_v33 }
 0x43f   : > { %v3521_v50 = vmax.f32 %v3489_v58, 0.0 }
 0x441   : > { %3553 = vst.msk [vmem:[%s5682_s18 + $0x88] sm:$0xff] %vm377_vm0, %v3521_v50  ;;  %v4056_v50 = vld [vmem:[%s4155_s28 + $0xf0] sm:$0xff] }
 0x442   : > { %v3430_v28 = vpop.f32.mrf.mxu3 }
 0x443   : > { %v3431_v19 = vadd.f32 %v5671_v36, %v3430_v28 }
 0x445   : > { %v3490_v52 = vadd.f32 %v4044_v3, %v3431_v19 }
 0x447   : > { %v3522_v6 = vmax.f32 %v3490_v52, 0.0 }
 0x449   : > { %3554 = vst.msk [vmem:[%s5682_s18 + $0x90] sm:$0xff] %vm377_vm0, %v3522_v6  ;;  %v4057_v6 = vld [vmem:[%s4155_s28 + $0xf8] sm:$0xff] }
 0x44a   : > { %v3433_v26 = vpop.f32.mrf.mxu3 }
 0x44b   : > { %v3434_v30 = vadd.f32 %v5671_v36, %v3433_v26 }
 0x44d   : > { %v3491_v40 = vadd.f32 %v4045_v0, %v3434_v30 }
 0x44f   : > { %v3523_v1 = vmax.f32 %v3491_v40, 0.0 }
 0x451   : > { %3555 = vst.msk [vmem:[%s5682_s18 + $0x98] sm:$0xff] %vm377_vm0, %v3523_v1 }
 0x452   : > { %v3436_v32 = vpop.f32.mrf.mxu3 }
 0x453   : > { %v3437_v34 = vadd.f32 %v5671_v36, %v3436_v32 }
 0x455   : > { %v3492_v56 = vadd.f32 %v4046_v41, %v3437_v34 }
 0x457   : > { %v3524_v24 = vmax.f32 %v3492_v56, 0.0 }
 0x459   : > { %3556 = vst.msk [vmem:[%s5682_s18 + $0xa0] sm:$0xff] %vm377_vm0, %v3524_v24 }
 0x45a   : > { %v3439_v63 = vpop.f32.mrf.mxu3 }
 0x45b   : > { %v3440_v62 = vadd.f32 %v5671_v36, %v3439_v63 }
 0x45d   : > { %v3493_v39 = vadd.f32 %v4047_v17, %v3440_v62 }
 0x45f   : > { %v3525_v38 = vmax.f32 %v3493_v39, 0.0 }
 0x461   : > { %3557 = vst.msk [vmem:[%s5682_s18 + $0xa8] sm:$0xff] %vm377_vm0, %v3525_v38 }
 0x462   : > { %v3442_v2 = vpop.f32.mrf.mxu3 }
 0x463   : > { %v3443_v14 = vadd.f32 %v5671_v36, %v3442_v2 }
 0x465   : > { %v3494_v8 = vadd.f32 %v4048_v48, %v3443_v14 }
 0x467   : > { %v3526_v7 = vmax.f32 %v3494_v8, 0.0 }
 0x469   : > { %3558 = vst.msk [vmem:[%s5682_s18 + $0xb0] sm:$0xff] %vm377_vm0, %v3526_v7 }
 0x46a   : > { %v3445_v53 = vpop.f32.mrf.mxu3 }
 0x46b   : > { %v3446_v10 = vadd.f32 %v5671_v36, %v3445_v53 }
 0x46d   : > { %v3495_v23 = vadd.f32 %v4049_v11, %v3446_v10 }
 0x46f   : > { %v3527_v18 = vmax.f32 %v3495_v23, 0.0 }
 0x471   : > { %3559 = vst.msk [vmem:[%s5682_s18 + $0xb8] sm:$0xff] %vm377_vm0, %v3527_v18 }
 0x472   : > { %v3448_v20 = vpop.f32.mrf.mxu3 }
 0x473   : > { %v3449_v22 = vadd.f32 %v5671_v36, %v3448_v20 }
 0x475   : > { %v3496_v21 = vadd.f32 %v4050_v29, %v3449_v22 }
 0x477   : > { %v3528_v12 = vmax.f32 %v3496_v21, 0.0 }
 0x479   : > { %3560 = vst.msk [vmem:[%s5682_s18 + $0xc0] sm:$0xff] %vm377_vm0, %v3528_v12 }
 0x47a   : > { %v3451_v27 = vpop.f32.mrf.mxu3 }
 0x47b   : > { %v3452_v9 = vadd.f32 %v5671_v36, %v3451_v27 }
 0x47d   : > { %v3497_v37 = vadd.f32 %v4051_v44, %v3452_v9 }
 0x47f   : > { %v3529_v13 = vmax.f32 %v3497_v37, 0.0 }
 0x481   : > { %3561 = vst.msk [vmem:[%s5682_s18 + $0xc8] sm:$0xff] %vm377_vm0, %v3529_v13 }
 0x482   : > { %v3454_v16 = vpop.f32.mrf.mxu3 }
 0x483   : > { %v3455_v46 = vadd.f32 %v5671_v36, %v3454_v16 }
 0x485   : > { %v3498_v43 = vadd.f32 %v4052_v51, %v3455_v46 }
 0x487   : > { %v3530_v25 = vmax.f32 %v3498_v43, 0.0 }
 0x489   : > { %3562 = vst.msk [vmem:[%s5682_s18 + $0xd0] sm:$0xff] %vm377_vm0, %v3530_v25 }
 0x48a   : > { %v3457_v42 = vpop.f32.mrf.mxu3 }
 0x48b   : > { %v3458_v45 = vadd.f32 %v5671_v36, %v3457_v42 }
 0x48d   : > { %v3499_v15 = vadd.f32 %v4053_v54, %v3458_v45 }
 0x48f   : > { %v3531_v5 = vmax.f32 %v3499_v15, 0.0 }
 0x491   : > { %3563 = vst.msk [vmem:[%s5682_s18 + $0xd8] sm:$0xff] %vm377_vm0, %v3531_v5 }
 0x492   : > { %v3460_v57 = vpop.f32.mrf.mxu3 }
 0x493   : > { %v3461_v4 = vadd.f32 %v5671_v36, %v3460_v57 }
 0x495   : > { %v3500_v60 = vadd.f32 %v4054_v55, %v3461_v4 }
 0x497   : > { %v3532_v35 = vmax.f32 %v3500_v60, 0.0 }
 0x499   : > { %3564 = vst.msk [vmem:[%s5682_s18 + $0xe0] sm:$0xff] %vm377_vm0, %v3532_v35 }
 0x49a   : > { %v3463_v49 = vpop.f32.mrf.mxu3 }
 0x49b   : > { %v3464_v47 = vadd.f32 %v5671_v36, %v3463_v49 }
 0x49d   : > { %v3501_v59 = vadd.f32 %v4055_v61, %v3464_v47 }
 0x49f   : > { %v3533_v33 = vmax.f32 %v3501_v59, 0.0 }
 0x4a1   : > { %3565 = vst.msk [vmem:[%s5682_s18 + $0xe8] sm:$0xff] %vm377_vm0, %v3533_v33 }
 0x4a2   : > { %v3466_v31 = vpop.f32.mrf.mxu3 }
 0x4a3   : > { %v3467_v58 = vadd.f32 %v5671_v36, %v3466_v31 }
 0x4a5   : > { %v3502_v28 = vadd.f32 %v4056_v50, %v3467_v58 }
 0x4a7   : > { %v3534_v19 = vmax.f32 %v3502_v28, 0.0 }
 0x4a9   : > { %3566 = vst.msk [vmem:[%s5682_s18 + $0xf0] sm:$0xff] %vm377_vm0, %v3534_v19 }
 0x4aa   : > { %v3469_v3 = vpop.f32.mrf.mxu3 }
 0x4ab   : > { %v3470_v52 = vadd.f32 %v5671_v36, %v3469_v3 }
 0x4ad   : > { %v3503_v26 = vadd.f32 %v4057_v6, %v3470_v52 }
 0x4af   : > { %v3535_v30 = vmax.f32 %v3503_v26, 0.0 }
 0x4b1   : > { %3567 = vst.msk [vmem:[%s5682_s18 + $0xf8] sm:$0xff] %vm377_vm0, %v3535_v30 }
 0x4b2 PF: > { %s19_s30 = sadd.s32 1, %s4064_s30  }
 0x4b3   : > { %p16_p4 = scmp.ge.s32.totalorder %s19_s30, 4  }
 0x4b5   :  { %18 = sbr.rel (!%p16_p4) target bundleno = 1 (0x1), region = 94 }

</bundles_post_ra>
